<compile_context>
chip_gen: v7x
topology: tpu7x:2x2x1
jax: 0.10.0
libtpu: 0.0.40
codegen_flags: <defaults>
</compile_context>

<pallas_src>
import functools

import jax
import jax.numpy as jnp
from jax import lax
from jax.experimental import pallas as pl
from jax.experimental.pallas import tpu as pltpu


# ----------------------------------------------------------------------------
# Tile / packed-parameter layout constants (all row offsets are multiples of 8)
# ----------------------------------------------------------------------------
LANE = 128          # per-gate lane tile == padded hidden width
SUB = 8             # sublane tile == padded batch rows
DP = 8              # padded observed dims

_R_WIH = 0                  # rows [0, 8):    input->gates weight (DP, 4*LANE)
_R_B = 8                    # row 8: b1 ; row 9: b2 ; row 10: [b_l1 | b_out | 0]
_R_WHH1 = 16                # rows [16, 144):  hidden->gates weight, LSTM 1
_R_WHH2 = 16 + LANE         # rows [144, 272): hidden->gates weight, LSTM 2
_R_LIN = 16 + 2 * LANE      # rows [272, 400): cols [0:128)=w_l1, [128:256)=w_out
_R_TOT = 16 + 3 * LANE      # 400 rows total -> packed buffer (400, 512) f32


# ----------------------------------------------------------------------------
# Pallas kernel: both LSTM recurrences + both Linear layers + sd**2 + slack
# ----------------------------------------------------------------------------
def lstm_encoder_kernel(
    x_ref,        # (T*SUB, DP)      time-major, batch- and dim-padded inputs
    p_ref,        # (400, 4*LANE)    packed, fused, tile-padded parameters
    out_ref,      # (T*SUB, LANE)    lanes [0,L)=means, [L,2L)=sd^2+slack
    xw_ref,       # (T*SUB, 4*LANE)  VMEM scratch: hoisted input projection
    h2s_ref,      # (T*SUB, LANE)    VMEM scratch: hidden states of LSTM 2
    *,
    n_steps,      # T (compile-time, small)
    latent,       # L
    slack,
):
    bp = SUB

    def dot(a, b):
        return jnp.dot(a, b, preferred_element_type=jnp.float32)

    def lstm_cell(pre, c):
        # pre: (SUB, 4*LANE), gate tiles [ i | f | o | g ].  One sigmoid over
        # the three leading whole tiles, one tanh over the last; every slice
        # falls on a 128-lane tile boundary (separate vregs) -> pure VPU/EUP.
        sig = jax.nn.sigmoid(pre[:, : 3 * LANE])
        i = sig[:, 0:LANE]
        f = sig[:, LANE : 2 * LANE]
        o = sig[:, 2 * LANE : 3 * LANE]
        g = jnp.tanh(pre[:, 3 * LANE :])
        c_new = f * c + i * g
        h_new = o * jnp.tanh(c_new)
        return h_new, c_new

    # --- unpack tile-padded parameters (static slices of the single buffer) --
    wih1 = p_ref[_R_WIH : _R_WIH + DP, :]                   # (8, 512)
    b1 = p_ref[_R_B : _R_B + 1, :]                          # (1, 512)
    b2 = p_ref[_R_B + 1 : _R_B + 2, :]                      # (1, 512)
    bl1 = p_ref[_R_B + 2 : _R_B + 3, 0:LANE]                # (1, 128)
    bout = p_ref[_R_B + 2 : _R_B + 3, LANE : 2 * LANE]      # (1, 128)
    whh1 = p_ref[_R_WHH1 : _R_WHH1 + LANE, :]               # (128, 512)
    whh2 = p_ref[_R_WHH2 : _R_WHH2 + LANE, :]               # (128, 512)
    wl1 = p_ref[_R_LIN : _R_LIN + LANE, 0:LANE]             # (128, 128)
    wout = p_ref[_R_LIN : _R_LIN + LANE, LANE : 2 * LANE]   # (128, 128)

    # --- input projection hoisted off the serial path (bias folded in) -------
    xw_ref[...] = dot(x_ref[...], wih1) + b1                # (T*8, 512)

    # ---- LSTM 1 over X (fully unrolled); only the last hidden state kept ----
    h1 = jnp.zeros((bp, LANE), jnp.float32)
    c1 = jnp.zeros((bp, LANE), jnp.float32)
    for t in range(n_steps):
        pre = xw_ref[t * bp : (t + 1) * bp, :] + dot(h1, whh1)
        h1, c1 = lstm_cell(pre, c1)

    # ---- Linear: last hidden state -> initial hidden of dynamics LSTM -------
    h2 = dot(h1, wl1) + bl1                                 # (8, 128)

    # ---- LSTM 2: zero inputs, h0 = h2, c0 = 0 (fully unrolled) --------------
    c2 = jnp.zeros((bp, LANE), jnp.float32)
    for t in range(n_steps):
        h2, c2 = lstm_cell(dot(h2, whh2) + b2, c2)
        h2s_ref[t * bp : (t + 1) * bp, :] = h2              # tile-aligned rows

    # ---- output projection: ONE matmul, one lane-dense store ----------------
    out = dot(h2s_ref[...], wout) + bout                    # (T*8, 128)
    col = lax.broadcasted_iota(jnp.int32, out.shape, 1)
    sd_mask = (col >= latent) & (col < 2 * latent)
    out_ref[...] = jnp.where(sd_mask, out * out + slack, out)


# ----------------------------------------------------------------------------
# Parameter packing: fuse gates, pad to tiles, pack into ONE buffer.
# Call ONCE at parameter-load time (hoisted out of the per-call path).
# ----------------------------------------------------------------------------
def pack_params(params):
    w_ih1 = params["w_ih1"]                                  # (4, D, H1), i,f,g,o
    w_hh1 = params["w_hh1"]                                  # (4, H1, H1)
    b1 = params["b1"]                                        # (4, 1, H1)
    w_l1 = params["w_l1"]                                    # (H1, H2)
    b_l1 = params["b_l1"]                                    # (1, H2)
    w_hh2 = params["w_hh2"]                                  # (4, H2, H2)
    b2 = params["b2"]                                        # (4, 1, H2)
    w_out = jnp.concatenate([params["w_mean"], params["w_sd"]], axis=-1)  # (H2, 2L)
    b_out = jnp.concatenate([params["b_mean"], params["b_sd"]], axis=-1)  # (1, 2L)

    d, h1 = w_ih1.shape[1], w_ih1.shape[2]
    h2 = w_hh2.shape[-1]
    two_l = w_out.shape[-1]
    assert d <= DP and h1 <= LANE and h2 <= LANE and two_l <= LANE

    order = (0, 1, 3, 2)  # PyTorch (i,f,g,o) -> kernel (i,f,o,g)

    def gate_pad(w, rows):
        # (4, r, H) -> (rows, 4*LANE): one zero-padded 128-lane tile per gate.
        out = jnp.zeros((rows, 4 * LANE), jnp.float32)
        for k, g in enumerate(order):
            out = out.at[: w.shape[1], k * LANE : k * LANE + w.shape[2]].set(w[g])
        return out

    p = jnp.zeros((_R_TOT, 4 * LANE), jnp.float32)
    p = p.at[_R_WIH : _R_WIH + DP].set(gate_pad(w_ih1, DP))
    p = p.at[_R_B : _R_B + 1].set(gate_pad(b1, 1))
    p = p.at[_R_B + 1 : _R_B + 2].set(gate_pad(b2, 1))
    p = p.at[_R_B + 2, 0:h2].set(b_l1[0])
    p = p.at[_R_B + 2, LANE : LANE + two_l].set(b_out[0])
    p = p.at[_R_WHH1 : _R_WHH1 + LANE].set(gate_pad(w_hh1, LANE))
    p = p.at[_R_WHH2 : _R_WHH2 + LANE].set(gate_pad(w_hh2, LANE))
    p = p.at[_R_LIN : _R_LIN + h1, 0:h2].set(w_l1)
    p = p.at[_R_LIN : _R_LIN + h2, LANE : LANE + two_l].set(w_out)
    return p


# ----------------------------------------------------------------------------
# Wrapper: pad/flatten inputs, call the kernel, rebuild means / corr_sds
# ----------------------------------------------------------------------------
def lstm_encoder_forward(X, taus, packed_params, latent_dims, *, slack=1e-5):
    # TODO(synk): `taus` is accepted but never used in the PyTorch forward; kept for signature parity.
    del taus
    B, T, D = X.shape
    assert B <= SUB and D <= DP

    # time-major, batch padded to one sublane tile, observed dims padded to 8;
    # (T, 8, 8) -> (T*8, 8) is tile-exact (no cross-tile regrouping).
    x = jnp.transpose(X.astype(jnp.float32), (1, 0, 2))               # (T, B, D)
    x = jnp.pad(x, ((0, 0), (0, SUB - B), (0, DP - D)))               # (T, 8, 8)
    x = x.reshape(T * SUB, DP)

    kernel = functools.partial(
        lstm_encoder_kernel, n_steps=T, latent=latent_dims, slack=slack)
    vmem = pl.BlockSpec(memory_space=pltpu.MemorySpace.VMEM)
    out = pl.pallas_call(
        kernel,
        out_shape=jax.ShapeDtypeStruct((T * SUB, LANE), jnp.float32),
        in_specs=[vmem, vmem],
        out_specs=vmem,
        scratch_shapes=[
            pltpu.VMEM((T * SUB, 4 * LANE), jnp.float32),   # xw scratch
            pltpu.VMEM((T * SUB, LANE), jnp.float32),       # LSTM-2 hidden states
        ],
    )(x, packed_params)

    out = out.reshape(T, SUB, LANE)[:, :B, :]                         # (T, B, 128)
    means = jnp.transpose(out[..., :latent_dims], (1, 0, 2))          # (B, T, L)
    sds_var = jnp.transpose(out[..., latent_dims : 2 * latent_dims], (1, 0, 2))

    # torch.diag_embed + permute(0,2,3,1):
    #   corr_sds[b, i, j, l] = delta_ij * (sds[b, i, l]**2 + slack)
    eye = jnp.eye(T, dtype=jnp.float32)[None, :, :, None]             # (1, T, T, 1)
    corr_sds = eye * sds_var[:, :, None, :]                           # (B, T, T, L)
    return means, corr_sds


# ----------------------------------------------------------------------------
# Deterministic parameter init (matching nn.LSTM / nn.Linear shapes)
# ----------------------------------------------------------------------------
def init_params(key, observed_dims, latent_dims, h1=10, h2=10):
    keys = jax.random.split(key, 13)

    def u(k, shape, fan):
        bound = 1.0 / (fan ** 0.5)
        return jax.random.uniform(k, shape, jnp.float32, -bound, bound)

    return dict(
        # LSTM(observed_dims -> h1), PyTorch gate order i, f, g, o
        w_ih1=u(keys[0], (4, observed_dims, h1), h1),
        w_hh1=u(keys[1], (4, h1, h1), h1),
        b1=u(keys[2], (4, 1, h1), h1) + u(keys[3], (4, 1, h1), h1),
        # Linear(h1 -> h2)
        w_l1=u(keys[4], (h1, h2), h1),
        b_l1=u(keys[5], (1, h2), h1),
        # LSTM(1 -> h2); weight_ih never used (inputs are zero)
        w_hh2=u(keys[6], (4, h2, h2), h2),
        b2=u(keys[7], (4, 1, h2), h2) + u(keys[8], (4, 1, h2), h2),
        # Linear(h2 -> 2*latent_dims), split into mean / sd halves
        w_mean=u(keys[9], (h2, latent_dims), h2),
        b_mean=u(keys[10], (1, latent_dims), h2),
        w_sd=u(keys[11], (h2, latent_dims), h2),
        b_sd=u(keys[12], (1, latent_dims), h2),
    )


# ----------------------------------------------------------------------------
# Pure-JAX reference (same math, no Pallas, per-gate weights) for correctness
# ----------------------------------------------------------------------------
def reference_forward(X, p, *, slack=1e-5):
    X = X.astype(jnp.float32)
    B, T, _ = X.shape
    H1 = p["w_hh1"].shape[-1]
    H2 = p["w_hh2"].shape[-1]

    h = jnp.zeros((B, H1), jnp.float32)
    c = jnp.zeros((B, H1), jnp.float32)
    for t in range(T):
        x_t = X[:, t, :]
        i = jax.nn.sigmoid(x_t @ p["w_ih1"][0] + h @ p["w_hh1"][0] + p["b1"][0])
        f = jax.nn.sigmoid(x_t @ p["w_ih1"][1] + h @ p["w_hh1"][1] + p["b1"][1])
        g = jnp.tanh(x_t @ p["w_ih1"][2] + h @ p["w_hh1"][2] + p["b1"][2])
        o = jax.nn.sigmoid(x_t @ p["w_ih1"][3] + h @ p["w_hh1"][3] + p["b1"][3])
        c = f * c + i * g
        h = o * jnp.tanh(c)

    h2 = h @ p["w_l1"] + p["b_l1"]
    c2 = jnp.zeros((B, H2), jnp.float32)
    means, sds_var = [], []
    for t in range(T):
        i = jax.nn.sigmoid(h2 @ p["w_hh2"][0] + p["b2"][0])
        f = jax.nn.sigmoid(h2 @ p["w_hh2"][1] + p["b2"][1])
        g = jnp.tanh(h2 @ p["w_hh2"][2] + p["b2"][2])
        o = jax.nn.sigmoid(h2 @ p["w_hh2"][3] + p["b2"][3])
        c2 = f * c2 + i * g
        h2 = o * jnp.tanh(c2)
        means.append(h2 @ p["w_mean"] + p["b_mean"])
        sd = h2 @ p["w_sd"] + p["b_sd"]
        sds_var.append(sd * sd + slack)
    means = jnp.stack(means, axis=1)                                   # (B, T, L)
    sds_var = jnp.stack(sds_var, axis=1)                               # (B, T, L)
    eye = jnp.eye(T, dtype=jnp.float32)[None, :, :, None]
    corr_sds = eye * sds_var[:, :, None, :]                            # (B, T, T, L)
    return means, corr_sds


if __name__ == "__main__":
    # Small shapes consistent with the module:
    B, T, D = 2, 8, 4          # batch, timesteps, observed_dims
    LATENT = 3                 # latent_dims
    H1, H2 = 10, 10            # data_to_init_hidden_state_size, hidden_state_to_posterior_size
    SLACK = 1e-5

    key = jax.random.PRNGKey(0)
    kx, kt, kp = jax.random.split(key, 3)
    X = jax.random.normal(kx, (B, T, D), jnp.float32)
    taus = jax.random.uniform(kt, (B, T), jnp.float32)                 # unused in forward
    params = init_params(kp, D, LATENT, H1, H2)

    # Fuse + pack parameters ONCE (hoisted out of the per-call path).
    packed = pack_params(params)

    means, corr_sds = lstm_encoder_forward(X, taus, packed, LATENT, slack=SLACK)
    means = jax.block_until_ready(means)
    corr_sds = jax.block_until_ready(corr_sds)

    assert means.shape == (B, T, LATENT), means.shape
    assert corr_sds.shape == (B, T, T, LATENT), corr_sds.shape

    ref_means, ref_corr = reference_forward(X, params, slack=SLACK)
    assert jnp.allclose(means, ref_means, atol=1e-3, rtol=1e-3)
    assert jnp.allclose(corr_sds, ref_corr, atol=1e-3, rtol=1e-3)

    print("KERNEL_OK")
</pallas_src>

<mosaic_0001>
module attributes {stable_mosaic.version = 11 : i64} {
  func.func @lstm_encoder_kernel(%arg0: memref<64x8xf32, #tpu.memory_space<vmem>>, %arg1: memref<400x512xf32, #tpu.memory_space<vmem>>, %arg2: memref<64x128xf32, #tpu.memory_space<vmem>>, %arg3: memref<64x512xf32, #tpu.memory_space<vmem>>, %arg4: memref<64x128xf32, #tpu.memory_space<vmem>>) attributes {dimension_semantics = [], scalar_prefetch = 0 : i64, scratch_operands = 2 : i64, tpu.core_type = #tpu.core_type<tc>} {
    %c0 = arith.constant 0 : index
    %c0_0 = arith.constant 0 : index
    %0 = vector.load %arg1[%c0, %c0_0] : memref<400x512xf32, #tpu.memory_space<vmem>>, vector<8x512xf32>
    %c8 = arith.constant 8 : index
    %c0_1 = arith.constant 0 : index
    %1 = vector.load %arg1[%c8, %c0_1] : memref<400x512xf32, #tpu.memory_space<vmem>>, vector<1x512xf32>
    %c9 = arith.constant 9 : index
    %c0_2 = arith.constant 0 : index
    %2 = vector.load %arg1[%c9, %c0_2] : memref<400x512xf32, #tpu.memory_space<vmem>>, vector<1x512xf32>
    %c10 = arith.constant 10 : index
    %c0_3 = arith.constant 0 : index
    %3 = vector.load %arg1[%c10, %c0_3] : memref<400x512xf32, #tpu.memory_space<vmem>>, vector<1x128xf32>
    %c10_4 = arith.constant 10 : index
    %c128 = arith.constant 128 : index
    %4 = vector.load %arg1[%c10_4, %c128] : memref<400x512xf32, #tpu.memory_space<vmem>>, vector<1x128xf32>
    %c16 = arith.constant 16 : index
    %c0_5 = arith.constant 0 : index
    %5 = vector.load %arg1[%c16, %c0_5] : memref<400x512xf32, #tpu.memory_space<vmem>>, vector<128x512xf32>
    %c144 = arith.constant 144 : index
    %c0_6 = arith.constant 0 : index
    %6 = vector.load %arg1[%c144, %c0_6] : memref<400x512xf32, #tpu.memory_space<vmem>>, vector<128x512xf32>
    %c272 = arith.constant 272 : index
    %c0_7 = arith.constant 0 : index
    %7 = vector.load %arg1[%c272, %c0_7] : memref<400x512xf32, #tpu.memory_space<vmem>>, vector<128x128xf32>
    %c272_8 = arith.constant 272 : index
    %c128_9 = arith.constant 128 : index
    %8 = vector.load %arg1[%c272_8, %c128_9] : memref<400x512xf32, #tpu.memory_space<vmem>>, vector<128x128xf32>
    %c0_10 = arith.constant 0 : index
    %c0_11 = arith.constant 0 : index
    %9 = vector.load %arg0[%c0_10, %c0_11] : memref<64x8xf32, #tpu.memory_space<vmem>>, vector<64x8xf32>
    %cst = arith.constant dense<0.000000e+00> : vector<64x512xf32>
    %10 = tpu.matmul %9, %0, %cst {dimension_numbers = #tpu.dot_dimension_numbers<[1], [0], [0], [1], [0, 0, 1, 1], [], []>} : vector<64x8xf32>, vector<8x512xf32>, vector<64x512xf32> -> vector<64x512xf32>
    %11 = vector.broadcast %1 : vector<1x512xf32> to vector<64x512xf32>
    %12 = arith.addf %10, %11 : vector<64x512xf32>
    %c0_12 = arith.constant 0 : index
    %c0_13 = arith.constant 0 : index
    %13 = vector.load %arg3[%c0_12, %c0_13] : memref<64x512xf32, #tpu.memory_space<vmem>>, vector<64x512xf32>
    tpu.vector_store %arg3[%c0_12, %c0_13], %12 {strides = array<i32>} : memref<64x512xf32, #tpu.memory_space<vmem>>, vector<64x512xf32>,
    %cst_14 = arith.constant 0.000000e+00 : f32
    %14 = vector.broadcast %cst_14 : f32 to vector<8x128xf32>
    %cst_15 = arith.constant 0.000000e+00 : f32
    %15 = vector.broadcast %cst_15 : f32 to vector<8x128xf32>
    %c0_16 = arith.constant 0 : index
    %c0_17 = arith.constant 0 : index
    %16 = vector.load %arg3[%c0_16, %c0_17] : memref<64x512xf32, #tpu.memory_space<vmem>>, vector<8x512xf32>
    %cst_18 = arith.constant dense<0.000000e+00> : vector<8x512xf32>
    %17 = tpu.matmul %14, %5, %cst_18 {dimension_numbers = #tpu.dot_dimension_numbers<[1], [0], [0], [1], [0, 0, 1, 1], [], []>} : vector<8x128xf32>, vector<128x512xf32>, vector<8x512xf32> -> vector<8x512xf32>
    %18 = arith.addf %16, %17 : vector<8x512xf32>
    %19 = vector.extract_strided_slice %18 {offsets = [0, 0], sizes = [8, 384], strides = [1, 1]} : vector<8x512xf32> to vector<8x384xf32>
    %20 = arith.negf %19 : vector<8x384xf32>
    %21 = math.exp %20 : vector<8x384xf32>
    %cst_19 = arith.constant 1.000000e+00 : f32
    %22 = vector.broadcast %cst_19 : f32 to vector<8x384xf32>
    %23 = arith.addf %22, %21 : vector<8x384xf32>
    %24 = arith.divf %22, %23 : vector<8x384xf32>
    %25 = vector.extract_strided_slice %24 {offsets = [0, 0], sizes = [8, 128], strides = [1, 1]} : vector<8x384xf32> to vector<8x128xf32>
    %26 = vector.extract_strided_slice %24 {offsets = [0, 128], sizes = [8, 128], strides = [1, 1]} : vector<8x384xf32> to vector<8x128xf32>
    %27 = vector.extract_strided_slice %24 {offsets = [0, 256], sizes = [8, 128], strides = [1, 1]} : vector<8x384xf32> to vector<8x128xf32>
    %28 = vector.extract_strided_slice %18 {offsets = [0, 384], sizes = [8, 128], strides = [1, 1]} : vector<8x512xf32> to vector<8x128xf32>
    %29 = math.tanh %28 : vector<8x128xf32>
    %30 = arith.mulf %26, %15 : vector<8x128xf32>
    %31 = arith.mulf %25, %29 : vector<8x128xf32>
    %32 = arith.addf %30, %31 : vector<8x128xf32>
    %33 = math.tanh %32 : vector<8x128xf32>
    %34 = arith.mulf %27, %33 : vector<8x128xf32>
    %c8_20 = arith.constant 8 : index
    %c0_21 = arith.constant 0 : index
    %35 = vector.load %arg3[%c8_20, %c0_21] : memref<64x512xf32, #tpu.memory_space<vmem>>, vector<8x512xf32>
    %cst_22 = arith.constant dense<0.000000e+00> : vector<8x512xf32>
    %36 = tpu.matmul %34, %5, %cst_22 {dimension_numbers = #tpu.dot_dimension_numbers<[1], [0], [0], [1], [0, 0, 1, 1], [], []>} : vector<8x128xf32>, vector<128x512xf32>, vector<8x512xf32> -> vector<8x512xf32>
    %37 = arith.addf %35, %36 : vector<8x512xf32>
    %38 = vector.extract_strided_slice %37 {offsets = [0, 0], sizes = [8, 384], strides = [1, 1]} : vector<8x512xf32> to vector<8x384xf32>
    %39 = arith.negf %38 : vector<8x384xf32>
    %40 = math.exp %39 : vector<8x384xf32>
    %cst_23 = arith.constant 1.000000e+00 : f32
    %41 = vector.broadcast %cst_23 : f32 to vector<8x384xf32>
    %42 = arith.addf %41, %40 : vector<8x384xf32>
    %43 = arith.divf %41, %42 : vector<8x384xf32>
    %44 = vector.extract_strided_slice %43 {offsets = [0, 0], sizes = [8, 128], strides = [1, 1]} : vector<8x384xf32> to vector<8x128xf32>
    %45 = vector.extract_strided_slice %43 {offsets = [0, 128], sizes = [8, 128], strides = [1, 1]} : vector<8x384xf32> to vector<8x128xf32>
    %46 = vector.extract_strided_slice %43 {offsets = [0, 256], sizes = [8, 128], strides = [1, 1]} : vector<8x384xf32> to vector<8x128xf32>
    %47 = vector.extract_strided_slice %37 {offsets = [0, 384], sizes = [8, 128], strides = [1, 1]} : vector<8x512xf32> to vector<8x128xf32>
    %48 = math.tanh %47 : vector<8x128xf32>
    %49 = arith.mulf %45, %32 : vector<8x128xf32>
    %50 = arith.mulf %44, %48 : vector<8x128xf32>
    %51 = arith.addf %49, %50 : vector<8x128xf32>
    %52 = math.tanh %51 : vector<8x128xf32>
    %53 = arith.mulf %46, %52 : vector<8x128xf32>
    %c16_24 = arith.constant 16 : index
    %c0_25 = arith.constant 0 : index
    %54 = vector.load %arg3[%c16_24, %c0_25] : memref<64x512xf32, #tpu.memory_space<vmem>>, vector<8x512xf32>
    %cst_26 = arith.constant dense<0.000000e+00> : vector<8x512xf32>
    %55 = tpu.matmul %53, %5, %cst_26 {dimension_numbers = #tpu.dot_dimension_numbers<[1], [0], [0], [1], [0, 0, 1, 1], [], []>} : vector<8x128xf32>, vector<128x512xf32>, vector<8x512xf32> -> vector<8x512xf32>
    %56 = arith.addf %54, %55 : vector<8x512xf32>
    %57 = vector.extract_strided_slice %56 {offsets = [0, 0], sizes = [8, 384], strides = [1, 1]} : vector<8x512xf32> to vector<8x384xf32>
    %58 = arith.negf %57 : vector<8x384xf32>
    %59 = math.exp %58 : vector<8x384xf32>
    %cst_27 = arith.constant 1.000000e+00 : f32
    %60 = vector.broadcast %cst_27 : f32 to vector<8x384xf32>
    %61 = arith.addf %60, %59 : vector<8x384xf32>
    %62 = arith.divf %60, %61 : vector<8x384xf32>
    %63 = vector.extract_strided_slice %62 {offsets = [0, 0], sizes = [8, 128], strides = [1, 1]} : vector<8x384xf32> to vector<8x128xf32>
    %64 = vector.extract_strided_slice %62 {offsets = [0, 128], sizes = [8, 128], strides = [1, 1]} : vector<8x384xf32> to vector<8x128xf32>
    %65 = vector.extract_strided_slice %62 {offsets = [0, 256], sizes = [8, 128], strides = [1, 1]} : vector<8x384xf32> to vector<8x128xf32>
    %66 = vector.extract_strided_slice %56 {offsets = [0, 384], sizes = [8, 128], strides = [1, 1]} : vector<8x512xf32> to vector<8x128xf32>
    %67 = math.tanh %66 : vector<8x128xf32>
    %68 = arith.mulf %64, %51 : vector<8x128xf32>
    %69 = arith.mulf %63, %67 : vector<8x128xf32>
    %70 = arith.addf %68, %69 : vector<8x128xf32>
    %71 = math.tanh %70 : vector<8x128xf32>
    %72 = arith.mulf %65, %71 : vector<8x128xf32>
    %c24 = arith.constant 24 : index
    %c0_28 = arith.constant 0 : index
    %73 = vector.load %arg3[%c24, %c0_28] : memref<64x512xf32, #tpu.memory_space<vmem>>, vector<8x512xf32>
    %cst_29 = arith.constant dense<0.000000e+00> : vector<8x512xf32>
    %74 = tpu.matmul %72, %5, %cst_29 {dimension_numbers = #tpu.dot_dimension_numbers<[1], [0], [0], [1], [0, 0, 1, 1], [], []>} : vector<8x128xf32>, vector<128x512xf32>, vector<8x512xf32> -> vector<8x512xf32>
    %75 = arith.addf %73, %74 : vector<8x512xf32>
    %76 = vector.extract_strided_slice %75 {offsets = [0, 0], sizes = [8, 384], strides = [1, 1]} : vector<8x512xf32> to vector<8x384xf32>
    %77 = arith.negf %76 : vector<8x384xf32>
    %78 = math.exp %77 : vector<8x384xf32>
    %cst_30 = arith.constant 1.000000e+00 : f32
    %79 = vector.broadcast %cst_30 : f32 to vector<8x384xf32>
    %80 = arith.addf %79, %78 : vector<8x384xf32>
    %81 = arith.divf %79, %80 : vector<8x384xf32>
    %82 = vector.extract_strided_slice %81 {offsets = [0, 0], sizes = [8, 128], strides = [1, 1]} : vector<8x384xf32> to vector<8x128xf32>
    %83 = vector.extract_strided_slice %81 {offsets = [0, 128], sizes = [8, 128], strides = [1, 1]} : vector<8x384xf32> to vector<8x128xf32>
    %84 = vector.extract_strided_slice %81 {offsets = [0, 256], sizes = [8, 128], strides = [1, 1]} : vector<8x384xf32> to vector<8x128xf32>
    %85 = vector.extract_strided_slice %75 {offsets = [0, 384], sizes = [8, 128], strides = [1, 1]} : vector<8x512xf32> to vector<8x128xf32>
    %86 = math.tanh %85 : vector<8x128xf32>
    %87 = arith.mulf %83, %70 : vector<8x128xf32>
    %88 = arith.mulf %82, %86 : vector<8x128xf32>
    %89 = arith.addf %87, %88 : vector<8x128xf32>
    %90 = math.tanh %89 : vector<8x128xf32>
    %91 = arith.mulf %84, %90 : vector<8x128xf32>
    %c32 = arith.constant 32 : index
    %c0_31 = arith.constant 0 : index
    %92 = vector.load %arg3[%c32, %c0_31] : memref<64x512xf32, #tpu.memory_space<vmem>>, vector<8x512xf32>
    %cst_32 = arith.constant dense<0.000000e+00> : vector<8x512xf32>
    %93 = tpu.matmul %91, %5, %cst_32 {dimension_numbers = #tpu.dot_dimension_numbers<[1], [0], [0], [1], [0, 0, 1, 1], [], []>} : vector<8x128xf32>, vector<128x512xf32>, vector<8x512xf32> -> vector<8x512xf32>
    %94 = arith.addf %92, %93 : vector<8x512xf32>
    %95 = vector.extract_strided_slice %94 {offsets = [0, 0], sizes = [8, 384], strides = [1, 1]} : vector<8x512xf32> to vector<8x384xf32>
    %96 = arith.negf %95 : vector<8x384xf32>
    %97 = math.exp %96 : vector<8x384xf32>
    %cst_33 = arith.constant 1.000000e+00 : f32
    %98 = vector.broadcast %cst_33 : f32 to vector<8x384xf32>
    %99 = arith.addf %98, %97 : vector<8x384xf32>
    %100 = arith.divf %98, %99 : vector<8x384xf32>
    %101 = vector.extract_strided_slice %100 {offsets = [0, 0], sizes = [8, 128], strides = [1, 1]} : vector<8x384xf32> to vector<8x128xf32>
    %102 = vector.extract_strided_slice %100 {offsets = [0, 128], sizes = [8, 128], strides = [1, 1]} : vector<8x384xf32> to vector<8x128xf32>
    %103 = vector.extract_strided_slice %100 {offsets = [0, 256], sizes = [8, 128], strides = [1, 1]} : vector<8x384xf32> to vector<8x128xf32>
    %104 = vector.extract_strided_slice %94 {offsets = [0, 384], sizes = [8, 128], strides = [1, 1]} : vector<8x512xf32> to vector<8x128xf32>
    %105 = math.tanh %104 : vector<8x128xf32>
    %106 = arith.mulf %102, %89 : vector<8x128xf32>
    %107 = arith.mulf %101, %105 : vector<8x128xf32>
    %108 = arith.addf %106, %107 : vector<8x128xf32>
    %109 = math.tanh %108 : vector<8x128xf32>
    %110 = arith.mulf %103, %109 : vector<8x128xf32>
    %c40 = arith.constant 40 : index
    %c0_34 = arith.constant 0 : index
    %111 = vector.load %arg3[%c40, %c0_34] : memref<64x512xf32, #tpu.memory_space<vmem>>, vector<8x512xf32>
    %cst_35 = arith.constant dense<0.000000e+00> : vector<8x512xf32>
    %112 = tpu.matmul %110, %5, %cst_35 {dimension_numbers = #tpu.dot_dimension_numbers<[1], [0], [0], [1], [0, 0, 1, 1], [], []>} : vector<8x128xf32>, vector<128x512xf32>, vector<8x512xf32> -> vector<8x512xf32>
    %113 = arith.addf %111, %112 : vector<8x512xf32>
    %114 = vector.extract_strided_slice %113 {offsets = [0, 0], sizes = [8, 384], strides = [1, 1]} : vector<8x512xf32> to vector<8x384xf32>
    %115 = arith.negf %114 : vector<8x384xf32>
    %116 = math.exp %115 : vector<8x384xf32>
    %cst_36 = arith.constant 1.000000e+00 : f32
    %117 = vector.broadcast %cst_36 : f32 to vector<8x384xf32>
    %118 = arith.addf %117, %116 : vector<8x384xf32>
    %119 = arith.divf %117, %118 : vector<8x384xf32>
    %120 = vector.extract_strided_slice %119 {offsets = [0, 0], sizes = [8, 128], strides = [1, 1]} : vector<8x384xf32> to vector<8x128xf32>
    %121 = vector.extract_strided_slice %119 {offsets = [0, 128], sizes = [8, 128], strides = [1, 1]} : vector<8x384xf32> to vector<8x128xf32>
    %122 = vector.extract_strided_slice %119 {offsets = [0, 256], sizes = [8, 128], strides = [1, 1]} : vector<8x384xf32> to vector<8x128xf32>
    %123 = vector.extract_strided_slice %113 {offsets = [0, 384], sizes = [8, 128], strides = [1, 1]} : vector<8x512xf32> to vector<8x128xf32>
    %124 = math.tanh %123 : vector<8x128xf32>
    %125 = arith.mulf %121, %108 : vector<8x128xf32>
    %126 = arith.mulf %120, %124 : vector<8x128xf32>
    %127 = arith.addf %125, %126 : vector<8x128xf32>
    %128 = math.tanh %127 : vector<8x128xf32>
    %129 = arith.mulf %122, %128 : vector<8x128xf32>
    %c48 = arith.constant 48 : index
    %c0_37 = arith.constant 0 : index
    %130 = vector.load %arg3[%c48, %c0_37] : memref<64x512xf32, #tpu.memory_space<vmem>>, vector<8x512xf32>
    %cst_38 = arith.constant dense<0.000000e+00> : vector<8x512xf32>
    %131 = tpu.matmul %129, %5, %cst_38 {dimension_numbers = #tpu.dot_dimension_numbers<[1], [0], [0], [1], [0, 0, 1, 1], [], []>} : vector<8x128xf32>, vector<128x512xf32>, vector<8x512xf32> -> vector<8x512xf32>
    %132 = arith.addf %130, %131 : vector<8x512xf32>
    %133 = vector.extract_strided_slice %132 {offsets = [0, 0], sizes = [8, 384], strides = [1, 1]} : vector<8x512xf32> to vector<8x384xf32>
    %134 = arith.negf %133 : vector<8x384xf32>
    %135 = math.exp %134 : vector<8x384xf32>
    %cst_39 = arith.constant 1.000000e+00 : f32
    %136 = vector.broadcast %cst_39 : f32 to vector<8x384xf32>
    %137 = arith.addf %136, %135 : vector<8x384xf32>
    %138 = arith.divf %136, %137 : vector<8x384xf32>
    %139 = vector.extract_strided_slice %138 {offsets = [0, 0], sizes = [8, 128], strides = [1, 1]} : vector<8x384xf32> to vector<8x128xf32>
    %140 = vector.extract_strided_slice %138 {offsets = [0, 128], sizes = [8, 128], strides = [1, 1]} : vector<8x384xf32> to vector<8x128xf32>
    %141 = vector.extract_strided_slice %138 {offsets = [0, 256], sizes = [8, 128], strides = [1, 1]} : vector<8x384xf32> to vector<8x128xf32>
    %142 = vector.extract_strided_slice %132 {offsets = [0, 384], sizes = [8, 128], strides = [1, 1]} : vector<8x512xf32> to vector<8x128xf32>
    %143 = math.tanh %142 : vector<8x128xf32>
    %144 = arith.mulf %140, %127 : vector<8x128xf32>
    %145 = arith.mulf %139, %143 : vector<8x128xf32>
    %146 = arith.addf %144, %145 : vector<8x128xf32>
    %147 = math.tanh %146 : vector<8x128xf32>
    %148 = arith.mulf %141, %147 : vector<8x128xf32>
    %c56 = arith.constant 56 : index
    %c0_40 = arith.constant 0 : index
    %149 = vector.load %arg3[%c56, %c0_40] : memref<64x512xf32, #tpu.memory_space<vmem>>, vector<8x512xf32>
    %cst_41 = arith.constant dense<0.000000e+00> : vector<8x512xf32>
    %150 = tpu.matmul %148, %5, %cst_41 {dimension_numbers = #tpu.dot_dimension_numbers<[1], [0], [0], [1], [0, 0, 1, 1], [], []>} : vector<8x128xf32>, vector<128x512xf32>, vector<8x512xf32> -> vector<8x512xf32>
    %151 = arith.addf %149, %150 : vector<8x512xf32>
    %152 = vector.extract_strided_slice %151 {offsets = [0, 0], sizes = [8, 384], strides = [1, 1]} : vector<8x512xf32> to vector<8x384xf32>
    %153 = arith.negf %152 : vector<8x384xf32>
    %154 = math.exp %153 : vector<8x384xf32>
    %cst_42 = arith.constant 1.000000e+00 : f32
    %155 = vector.broadcast %cst_42 : f32 to vector<8x384xf32>
    %156 = arith.addf %155, %154 : vector<8x384xf32>
    %157 = arith.divf %155, %156 : vector<8x384xf32>
    %158 = vector.extract_strided_slice %157 {offsets = [0, 0], sizes = [8, 128], strides = [1, 1]} : vector<8x384xf32> to vector<8x128xf32>
    %159 = vector.extract_strided_slice %157 {offsets = [0, 128], sizes = [8, 128], strides = [1, 1]} : vector<8x384xf32> to vector<8x128xf32>
    %160 = vector.extract_strided_slice %157 {offsets = [0, 256], sizes = [8, 128], strides = [1, 1]} : vector<8x384xf32> to vector<8x128xf32>
    %161 = vector.extract_strided_slice %151 {offsets = [0, 384], sizes = [8, 128], strides = [1, 1]} : vector<8x512xf32> to vector<8x128xf32>
    %162 = math.tanh %161 : vector<8x128xf32>
    %163 = arith.mulf %159, %146 : vector<8x128xf32>
    %164 = arith.mulf %158, %162 : vector<8x128xf32>
    %165 = arith.addf %163, %164 : vector<8x128xf32>
    %166 = math.tanh %165 : vector<8x128xf32>
    %167 = arith.mulf %160, %166 : vector<8x128xf32>
    %cst_43 = arith.constant dense<0.000000e+00> : vector<8x128xf32>
    %168 = tpu.matmul %167, %7, %cst_43 {dimension_numbers = #tpu.dot_dimension_numbers<[1], [0], [0], [1], [0, 0, 1, 1], [], []>} : vector<8x128xf32>, vector<128x128xf32>, vector<8x128xf32> -> vector<8x128xf32>
    %169 = vector.broadcast %3 : vector<1x128xf32> to vector<8x128xf32>
    %170 = arith.addf %168, %169 : vector<8x128xf32>
    %cst_44 = arith.constant 0.000000e+00 : f32
    %171 = vector.broadcast %cst_44 : f32 to vector<8x128xf32>
    %cst_45 = arith.constant dense<0.000000e+00> : vector<8x512xf32>
    %172 = tpu.matmul %170, %6, %cst_45 {dimension_numbers = #tpu.dot_dimension_numbers<[1], [0], [0], [1], [0, 0, 1, 1], [], []>} : vector<8x128xf32>, vector<128x512xf32>, vector<8x512xf32> -> vector<8x512xf32>
    %173 = vector.broadcast %2 : vector<1x512xf32> to vector<8x512xf32>
    %174 = arith.addf %172, %173 : vector<8x512xf32>
    %175 = vector.extract_strided_slice %174 {offsets = [0, 0], sizes = [8, 384], strides = [1, 1]} : vector<8x512xf32> to vector<8x384xf32>
    %176 = arith.negf %175 : vector<8x384xf32>
    %177 = math.exp %176 : vector<8x384xf32>
    %cst_46 = arith.constant 1.000000e+00 : f32
    %178 = vector.broadcast %cst_46 : f32 to vector<8x384xf32>
    %179 = arith.addf %178, %177 : vector<8x384xf32>
    %180 = arith.divf %178, %179 : vector<8x384xf32>
    %181 = vector.extract_strided_slice %180 {offsets = [0, 0], sizes = [8, 128], strides = [1, 1]} : vector<8x384xf32> to vector<8x128xf32>
    %182 = vector.extract_strided_slice %180 {offsets = [0, 128], sizes = [8, 128], strides = [1, 1]} : vector<8x384xf32> to vector<8x128xf32>
    %183 = vector.extract_strided_slice %180 {offsets = [0, 256], sizes = [8, 128], strides = [1, 1]} : vector<8x384xf32> to vector<8x128xf32>
    %184 = vector.extract_strided_slice %174 {offsets = [0, 384], sizes = [8, 128], strides = [1, 1]} : vector<8x512xf32> to vector<8x128xf32>
    %185 = math.tanh %184 : vector<8x128xf32>
    %186 = arith.mulf %182, %171 : vector<8x128xf32>
    %187 = arith.mulf %181, %185 : vector<8x128xf32>
    %188 = arith.addf %186, %187 : vector<8x128xf32>
    %189 = math.tanh %188 : vector<8x128xf32>
    %190 = arith.mulf %183, %189 : vector<8x128xf32>
    %c0_47 = arith.constant 0 : index
    %c0_48 = arith.constant 0 : index
    %191 = vector.load %arg4[%c0_47, %c0_48] : memref<64x128xf32, #tpu.memory_space<vmem>>, vector<8x128xf32>
    tpu.vector_store %arg4[%c0_47, %c0_48], %190 {strides = array<i32>} : memref<64x128xf32, #tpu.memory_space<vmem>>, vector<8x128xf32>,
    %cst_49 = arith.constant dense<0.000000e+00> : vector<8x512xf32>
    %192 = tpu.matmul %190, %6, %cst_49 {dimension_numbers = #tpu.dot_dimension_numbers<[1], [0], [0], [1], [0, 0, 1, 1], [], []>} : vector<8x128xf32>, vector<128x512xf32>, vector<8x512xf32> -> vector<8x512xf32>
    %193 = vector.broadcast %2 : vector<1x512xf32> to vector<8x512xf32>
    %194 = arith.addf %192, %193 : vector<8x512xf32>
    %195 = vector.extract_strided_slice %194 {offsets = [0, 0], sizes = [8, 384], strides = [1, 1]} : vector<8x512xf32> to vector<8x384xf32>
    %196 = arith.negf %195 : vector<8x384xf32>
    %197 = math.exp %196 : vector<8x384xf32>
    %cst_50 = arith.constant 1.000000e+00 : f32
    %198 = vector.broadcast %cst_50 : f32 to vector<8x384xf32>
    %199 = arith.addf %198, %197 : vector<8x384xf32>
    %200 = arith.divf %198, %199 : vector<8x384xf32>
    %201 = vector.extract_strided_slice %200 {offsets = [0, 0], sizes = [8, 128], strides = [1, 1]} : vector<8x384xf32> to vector<8x128xf32>
    %202 = vector.extract_strided_slice %200 {offsets = [0, 128], sizes = [8, 128], strides = [1, 1]} : vector<8x384xf32> to vector<8x128xf32>
    %203 = vector.extract_strided_slice %200 {offsets = [0, 256], sizes = [8, 128], strides = [1, 1]} : vector<8x384xf32> to vector<8x128xf32>
    %204 = vector.extract_strided_slice %194 {offsets = [0, 384], sizes = [8, 128], strides = [1, 1]} : vector<8x512xf32> to vector<8x128xf32>
    %205 = math.tanh %204 : vector<8x128xf32>
    %206 = arith.mulf %202, %188 : vector<8x128xf32>
    %207 = arith.mulf %201, %205 : vector<8x128xf32>
    %208 = arith.addf %206, %207 : vector<8x128xf32>
    %209 = math.tanh %208 : vector<8x128xf32>
    %210 = arith.mulf %203, %209 : vector<8x128xf32>
    %c8_51 = arith.constant 8 : index
    %c0_52 = arith.constant 0 : index
    %211 = vector.load %arg4[%c8_51, %c0_52] : memref<64x128xf32, #tpu.memory_space<vmem>>, vector<8x128xf32>
    tpu.vector_store %arg4[%c8_51, %c0_52], %210 {strides = array<i32>} : memref<64x128xf32, #tpu.memory_space<vmem>>, vector<8x128xf32>,
    %cst_53 = arith.constant dense<0.000000e+00> : vector<8x512xf32>
    %212 = tpu.matmul %210, %6, %cst_53 {dimension_numbers = #tpu.dot_dimension_numbers<[1], [0], [0], [1], [0, 0, 1, 1], [], []>} : vector<8x128xf32>, vector<128x512xf32>, vector<8x512xf32> -> vector<8x512xf32>
    %213 = vector.broadcast %2 : vector<1x512xf32> to vector<8x512xf32>
    %214 = arith.addf %212, %213 : vector<8x512xf32>
    %215 = vector.extract_strided_slice %214 {offsets = [0, 0], sizes = [8, 384], strides = [1, 1]} : vector<8x512xf32> to vector<8x384xf32>
    %216 = arith.negf %215 : vector<8x384xf32>
    %217 = math.exp %216 : vector<8x384xf32>
    %cst_54 = arith.constant 1.000000e+00 : f32
    %218 = vector.broadcast %cst_54 : f32 to vector<8x384xf32>
    %219 = arith.addf %218, %217 : vector<8x384xf32>
    %220 = arith.divf %218, %219 : vector<8x384xf32>
    %221 = vector.extract_strided_slice %220 {offsets = [0, 0], sizes = [8, 128], strides = [1, 1]} : vector<8x384xf32> to vector<8x128xf32>
    %222 = vector.extract_strided_slice %220 {offsets = [0, 128], sizes = [8, 128], strides = [1, 1]} : vector<8x384xf32> to vector<8x128xf32>
    %223 = vector.extract_strided_slice %220 {offsets = [0, 256], sizes = [8, 128], strides = [1, 1]} : vector<8x384xf32> to vector<8x128xf32>
    %224 = vector.extract_strided_slice %214 {offsets = [0, 384], sizes = [8, 128], strides = [1, 1]} : vector<8x512xf32> to vector<8x128xf32>
    %225 = math.tanh %224 : vector<8x128xf32>
    %226 = arith.mulf %222, %208 : vector<8x128xf32>
    %227 = arith.mulf %221, %225 : vector<8x128xf32>
    %228 = arith.addf %226, %227 : vector<8x128xf32>
    %229 = math.tanh %228 : vector<8x128xf32>
    %230 = arith.mulf %223, %229 : vector<8x128xf32>
    %c16_55 = arith.constant 16 : index
    %c0_56 = arith.constant 0 : index
    %231 = vector.load %arg4[%c16_55, %c0_56] : memref<64x128xf32, #tpu.memory_space<vmem>>, vector<8x128xf32>
    tpu.vector_store %arg4[%c16_55, %c0_56], %230 {strides = array<i32>} : memref<64x128xf32, #tpu.memory_space<vmem>>, vector<8x128xf32>,
    %cst_57 = arith.constant dense<0.000000e+00> : vector<8x512xf32>
    %232 = tpu.matmul %230, %6, %cst_57 {dimension_numbers = #tpu.dot_dimension_numbers<[1], [0], [0], [1], [0, 0, 1, 1], [], []>} : vector<8x128xf32>, vector<128x512xf32>, vector<8x512xf32> -> vector<8x512xf32>
    %233 = vector.broadcast %2 : vector<1x512xf32> to vector<8x512xf32>
    %234 = arith.addf %232, %233 : vector<8x512xf32>
    %235 = vector.extract_strided_slice %234 {offsets = [0, 0], sizes = [8, 384], strides = [1, 1]} : vector<8x512xf32> to vector<8x384xf32>
    %236 = arith.negf %235 : vector<8x384xf32>
    %237 = math.exp %236 : vector<8x384xf32>
    %cst_58 = arith.constant 1.000000e+00 : f32
    %238 = vector.broadcast %cst_58 : f32 to vector<8x384xf32>
    %239 = arith.addf %238, %237 : vector<8x384xf32>
    %240 = arith.divf %238, %239 : vector<8x384xf32>
    %241 = vector.extract_strided_slice %240 {offsets = [0, 0], sizes = [8, 128], strides = [1, 1]} : vector<8x384xf32> to vector<8x128xf32>
    %242 = vector.extract_strided_slice %240 {offsets = [0, 128], sizes = [8, 128], strides = [1, 1]} : vector<8x384xf32> to vector<8x128xf32>
    %243 = vector.extract_strided_slice %240 {offsets = [0, 256], sizes = [8, 128], strides = [1, 1]} : vector<8x384xf32> to vector<8x128xf32>
    %244 = vector.extract_strided_slice %234 {offsets = [0, 384], sizes = [8, 128], strides = [1, 1]} : vector<8x512xf32> to vector<8x128xf32>
    %245 = math.tanh %244 : vector<8x128xf32>
    %246 = arith.mulf %242, %228 : vector<8x128xf32>
    %247 = arith.mulf %241, %245 : vector<8x128xf32>
    %248 = arith.addf %246, %247 : vector<8x128xf32>
    %249 = math.tanh %248 : vector<8x128xf32>
    %250 = arith.mulf %243, %249 : vector<8x128xf32>
    %c24_59 = arith.constant 24 : index
    %c0_60 = arith.constant 0 : index
    %251 = vector.load %arg4[%c24_59, %c0_60] : memref<64x128xf32, #tpu.memory_space<vmem>>, vector<8x128xf32>
    tpu.vector_store %arg4[%c24_59, %c0_60], %250 {strides = array<i32>} : memref<64x128xf32, #tpu.memory_space<vmem>>, vector<8x128xf32>,
    %cst_61 = arith.constant dense<0.000000e+00> : vector<8x512xf32>
    %252 = tpu.matmul %250, %6, %cst_61 {dimension_numbers = #tpu.dot_dimension_numbers<[1], [0], [0], [1], [0, 0, 1, 1], [], []>} : vector<8x128xf32>, vector<128x512xf32>, vector<8x512xf32> -> vector<8x512xf32>
    %253 = vector.broadcast %2 : vector<1x512xf32> to vector<8x512xf32>
    %254 = arith.addf %252, %253 : vector<8x512xf32>
    %255 = vector.extract_strided_slice %254 {offsets = [0, 0], sizes = [8, 384], strides = [1, 1]} : vector<8x512xf32> to vector<8x384xf32>
    %256 = arith.negf %255 : vector<8x384xf32>
    %257 = math.exp %256 : vector<8x384xf32>
    %cst_62 = arith.constant 1.000000e+00 : f32
    %258 = vector.broadcast %cst_62 : f32 to vector<8x384xf32>
    %259 = arith.addf %258, %257 : vector<8x384xf32>
    %260 = arith.divf %258, %259 : vector<8x384xf32>
    %261 = vector.extract_strided_slice %260 {offsets = [0, 0], sizes = [8, 128], strides = [1, 1]} : vector<8x384xf32> to vector<8x128xf32>
    %262 = vector.extract_strided_slice %260 {offsets = [0, 128], sizes = [8, 128], strides = [1, 1]} : vector<8x384xf32> to vector<8x128xf32>
    %263 = vector.extract_strided_slice %260 {offsets = [0, 256], sizes = [8, 128], strides = [1, 1]} : vector<8x384xf32> to vector<8x128xf32>
    %264 = vector.extract_strided_slice %254 {offsets = [0, 384], sizes = [8, 128], strides = [1, 1]} : vector<8x512xf32> to vector<8x128xf32>
    %265 = math.tanh %264 : vector<8x128xf32>
    %266 = arith.mulf %262, %248 : vector<8x128xf32>
    %267 = arith.mulf %261, %265 : vector<8x128xf32>
    %268 = arith.addf %266, %267 : vector<8x128xf32>
    %269 = math.tanh %268 : vector<8x128xf32>
    %270 = arith.mulf %263, %269 : vector<8x128xf32>
    %c32_63 = arith.constant 32 : index
    %c0_64 = arith.constant 0 : index
    %271 = vector.load %arg4[%c32_63, %c0_64] : memref<64x128xf32, #tpu.memory_space<vmem>>, vector<8x128xf32>
    tpu.vector_store %arg4[%c32_63, %c0_64], %270 {strides = array<i32>} : memref<64x128xf32, #tpu.memory_space<vmem>>, vector<8x128xf32>,
    %cst_65 = arith.constant dense<0.000000e+00> : vector<8x512xf32>
    %272 = tpu.matmul %270, %6, %cst_65 {dimension_numbers = #tpu.dot_dimension_numbers<[1], [0], [0], [1], [0, 0, 1, 1], [], []>} : vector<8x128xf32>, vector<128x512xf32>, vector<8x512xf32> -> vector<8x512xf32>
    %273 = vector.broadcast %2 : vector<1x512xf32> to vector<8x512xf32>
    %274 = arith.addf %272, %273 : vector<8x512xf32>
    %275 = vector.extract_strided_slice %274 {offsets = [0, 0], sizes = [8, 384], strides = [1, 1]} : vector<8x512xf32> to vector<8x384xf32>
    %276 = arith.negf %275 : vector<8x384xf32>
    %277 = math.exp %276 : vector<8x384xf32>
    %cst_66 = arith.constant 1.000000e+00 : f32
    %278 = vector.broadcast %cst_66 : f32 to vector<8x384xf32>
    %279 = arith.addf %278, %277 : vector<8x384xf32>
    %280 = arith.divf %278, %279 : vector<8x384xf32>
    %281 = vector.extract_strided_slice %280 {offsets = [0, 0], sizes = [8, 128], strides = [1, 1]} : vector<8x384xf32> to vector<8x128xf32>
    %282 = vector.extract_strided_slice %280 {offsets = [0, 128], sizes = [8, 128], strides = [1, 1]} : vector<8x384xf32> to vector<8x128xf32>
    %283 = vector.extract_strided_slice %280 {offsets = [0, 256], sizes = [8, 128], strides = [1, 1]} : vector<8x384xf32> to vector<8x128xf32>
    %284 = vector.extract_strided_slice %274 {offsets = [0, 384], sizes = [8, 128], strides = [1, 1]} : vector<8x512xf32> to vector<8x128xf32>
    %285 = math.tanh %284 : vector<8x128xf32>
    %286 = arith.mulf %282, %268 : vector<8x128xf32>
    %287 = arith.mulf %281, %285 : vector<8x128xf32>
    %288 = arith.addf %286, %287 : vector<8x128xf32>
    %289 = math.tanh %288 : vector<8x128xf32>
    %290 = arith.mulf %283, %289 : vector<8x128xf32>
    %c40_67 = arith.constant 40 : index
    %c0_68 = arith.constant 0 : index
    %291 = vector.load %arg4[%c40_67, %c0_68] : memref<64x128xf32, #tpu.memory_space<vmem>>, vector<8x128xf32>
    tpu.vector_store %arg4[%c40_67, %c0_68], %290 {strides = array<i32>} : memref<64x128xf32, #tpu.memory_space<vmem>>, vector<8x128xf32>,
    %cst_69 = arith.constant dense<0.000000e+00> : vector<8x512xf32>
    %292 = tpu.matmul %290, %6, %cst_69 {dimension_numbers = #tpu.dot_dimension_numbers<[1], [0], [0], [1], [0, 0, 1, 1], [], []>} : vector<8x128xf32>, vector<128x512xf32>, vector<8x512xf32> -> vector<8x512xf32>
    %293 = vector.broadcast %2 : vector<1x512xf32> to vector<8x512xf32>
    %294 = arith.addf %292, %293 : vector<8x512xf32>
    %295 = vector.extract_strided_slice %294 {offsets = [0, 0], sizes = [8, 384], strides = [1, 1]} : vector<8x512xf32> to vector<8x384xf32>
    %296 = arith.negf %295 : vector<8x384xf32>
    %297 = math.exp %296 : vector<8x384xf32>
    %cst_70 = arith.constant 1.000000e+00 : f32
    %298 = vector.broadcast %cst_70 : f32 to vector<8x384xf32>
    %299 = arith.addf %298, %297 : vector<8x384xf32>
    %300 = arith.divf %298, %299 : vector<8x384xf32>
    %301 = vector.extract_strided_slice %300 {offsets = [0, 0], sizes = [8, 128], strides = [1, 1]} : vector<8x384xf32> to vector<8x128xf32>
    %302 = vector.extract_strided_slice %300 {offsets = [0, 128], sizes = [8, 128], strides = [1, 1]} : vector<8x384xf32> to vector<8x128xf32>
    %303 = vector.extract_strided_slice %300 {offsets = [0, 256], sizes = [8, 128], strides = [1, 1]} : vector<8x384xf32> to vector<8x128xf32>
    %304 = vector.extract_strided_slice %294 {offsets = [0, 384], sizes = [8, 128], strides = [1, 1]} : vector<8x512xf32> to vector<8x128xf32>
    %305 = math.tanh %304 : vector<8x128xf32>
    %306 = arith.mulf %302, %288 : vector<8x128xf32>
    %307 = arith.mulf %301, %305 : vector<8x128xf32>
    %308 = arith.addf %306, %307 : vector<8x128xf32>
    %309 = math.tanh %308 : vector<8x128xf32>
    %310 = arith.mulf %303, %309 : vector<8x128xf32>
    %c48_71 = arith.constant 48 : index
    %c0_72 = arith.constant 0 : index
    %311 = vector.load %arg4[%c48_71, %c0_72] : memref<64x128xf32, #tpu.memory_space<vmem>>, vector<8x128xf32>
    tpu.vector_store %arg4[%c48_71, %c0_72], %310 {strides = array<i32>} : memref<64x128xf32, #tpu.memory_space<vmem>>, vector<8x128xf32>,
    %cst_73 = arith.constant dense<0.000000e+00> : vector<8x512xf32>
    %312 = tpu.matmul %310, %6, %cst_73 {dimension_numbers = #tpu.dot_dimension_numbers<[1], [0], [0], [1], [0, 0, 1, 1], [], []>} : vector<8x128xf32>, vector<128x512xf32>, vector<8x512xf32> -> vector<8x512xf32>
    %313 = vector.broadcast %2 : vector<1x512xf32> to vector<8x512xf32>
    %314 = arith.addf %312, %313 : vector<8x512xf32>
    %315 = vector.extract_strided_slice %314 {offsets = [0, 0], sizes = [8, 384], strides = [1, 1]} : vector<8x512xf32> to vector<8x384xf32>
    %316 = arith.negf %315 : vector<8x384xf32>
    %317 = math.exp %316 : vector<8x384xf32>
    %cst_74 = arith.constant 1.000000e+00 : f32
    %318 = vector.broadcast %cst_74 : f32 to vector<8x384xf32>
    %319 = arith.addf %318, %317 : vector<8x384xf32>
    %320 = arith.divf %318, %319 : vector<8x384xf32>
    %321 = vector.extract_strided_slice %320 {offsets = [0, 0], sizes = [8, 128], strides = [1, 1]} : vector<8x384xf32> to vector<8x128xf32>
    %322 = vector.extract_strided_slice %320 {offsets = [0, 128], sizes = [8, 128], strides = [1, 1]} : vector<8x384xf32> to vector<8x128xf32>
    %323 = vector.extract_strided_slice %320 {offsets = [0, 256], sizes = [8, 128], strides = [1, 1]} : vector<8x384xf32> to vector<8x128xf32>
    %324 = vector.extract_strided_slice %314 {offsets = [0, 384], sizes = [8, 128], strides = [1, 1]} : vector<8x512xf32> to vector<8x128xf32>
    %325 = math.tanh %324 : vector<8x128xf32>
    %326 = arith.mulf %322, %308 : vector<8x128xf32>
    %327 = arith.mulf %321, %325 : vector<8x128xf32>
    %328 = arith.addf %326, %327 : vector<8x128xf32>
    %329 = math.tanh %328 : vector<8x128xf32>
    %330 = arith.mulf %323, %329 : vector<8x128xf32>
    %c56_75 = arith.constant 56 : index
    %c0_76 = arith.constant 0 : index
    %331 = vector.load %arg4[%c56_75, %c0_76] : memref<64x128xf32, #tpu.memory_space<vmem>>, vector<8x128xf32>
    tpu.vector_store %arg4[%c56_75, %c0_76], %330 {strides = array<i32>} : memref<64x128xf32, #tpu.memory_space<vmem>>, vector<8x128xf32>,
    %c0_77 = arith.constant 0 : index
    %c0_78 = arith.constant 0 : index
    %332 = vector.load %arg4[%c0_77, %c0_78] : memref<64x128xf32, #tpu.memory_space<vmem>>, vector<64x128xf32>
    %cst_79 = arith.constant dense<0.000000e+00> : vector<64x128xf32>
    %333 = tpu.matmul %332, %8, %cst_79 {dimension_numbers = #tpu.dot_dimension_numbers<[1], [0], [0], [1], [0, 0, 1, 1], [], []>} : vector<64x128xf32>, vector<128x128xf32>, vector<64x128xf32> -> vector<64x128xf32>
    %334 = vector.broadcast %4 : vector<1x128xf32> to vector<64x128xf32>
    %335 = arith.addf %333, %334 : vector<64x128xf32>
    %336 = tpu.iota {dimensions = array<i32: 1>} : vector<64x128xi32>
    %c3_i32 = arith.constant 3 : i32
    %337 = vector.broadcast %c3_i32 : i32 to vector<64x128xi32>
    %338 = arith.cmpi sge, %336, %337 : vector<64x128xi32>
    %c6_i32 = arith.constant 6 : i32
    %339 = vector.broadcast %c6_i32 : i32 to vector<64x128xi32>
    %340 = arith.cmpi slt, %336, %339 : vector<64x128xi32>
    %341 = arith.andi %338, %340 : vector<64x128xi1>
    %342 = arith.mulf %335, %335 : vector<64x128xf32>
    %cst_80 = arith.constant 9.99999974E-6 : f32
    %343 = vector.broadcast %cst_80 : f32 to vector<64x128xf32>
    %344 = arith.addf %342, %343 : vector<64x128xf32>
    %345 = arith.select %341, %344, %335 : vector<64x128xi1>, vector<64x128xf32>
    %c0_81 = arith.constant 0 : index
    %c0_82 = arith.constant 0 : index
    %346 = vector.load %arg2[%c0_81, %c0_82] : memref<64x128xf32, #tpu.memory_space<vmem>>, vector<64x128xf32>
    tpu.vector_store %arg2[%c0_81, %c0_82], %345 {strides = array<i32>} : memref<64x128xf32, #tpu.memory_space<vmem>>, vector<64x128xf32>,
    return
  }
}

</mosaic_0001>

<bundles_post_ra>
// kernel: tpu_custom_call.1
= control target key start
LH: loop header
LB: loop body
LE: loop exit
PB: predicated region body
PF: predicated region fallthrough
CT: control target
= control target key end

     0   :  { %7 = vsyncpa [#allocation5], 0  ;;  %s6124_s0 = inlined_call_operand.vmem [shape: f32[64,8], index: 0, kind: input, shape index: {}]   ;;  %s6125_s1 = inlined_call_operand.hbm [shape: f32[400,512], index: 1, kind: input, shape index: {}]   ;;  %s6126_s2 = inlined_call_operand.hbm [shape: f32[64,128], index: 2, kind: output, shape index: {}]  }
   0x1   :  { %8 = vsyncpa [#allocation6], 0  ;;  %s5135_s9 = smov [#allocation4]   ;;  %s5087_s13 = scalar_lea.hbm %s6125_s1, 25600 }
   0x2   :  { %s16_s10 = sshll.u32 %s5135_s9, 4  ;;  %p5088_p0 = scmp.ne.s32.totalorder %s6125_s1, %s5087_s13  ;;  %s17_s10 = int_to_ptr.vmem [resolvable:$true] %s16_s10 }
   0x3   :  { %p5091_p1 = scmp.lt.u32.totalorder %s5087_s13, %s6125_s1 }
   0x5   :  { %p5093_p2 = pnand %p5091_p1, %p5088_p0 }
   0x7   :  { %5096 = shalt.err (!%p5093_p2)
}
   0x8   :  { %s5097_s18 = scalar_lea.vmem %s17_s10, 25600  ;;  %p5102_p4 = scmp.lt.s32.totalorder %s17_s10, %s17_s10 }
   0x9   :  { %p5098_p3 = scmp.ne.s32.totalorder %s17_s10, %s5097_s18  ;;  %p5103_p5 = scmp.lt.s32.totalorder %s5097_s18, %s5097_s18 }
   0xb   :  { %p5104_p6 = por %p5103_p5, %p5102_p4 }
   0xd   :  { %p5105_p7 = pnand %p5104_p6, %p5098_p3 }
   0xf   :  { %5108 = shalt.err (!%p5105_p7)
}
  0x10   :  { %s5136_s19 = smov 512   ;;  %s5137_s20 = smov 32  }
  0x11   :  { %22 = dma.hbm_to_vmem [thread:$0]  %s6125_s1, 25600, %s17_s10, [#allocation5], %s5136_s19, %s5136_s19, %s5137_s20  }
  0x12   :  { %5131 = dma.done.wait [#allocation5], 25600  }
  0x13   :  { %5132 = vsyncadd [#allocation5], 4294941696  ;;  %v5138_v0 = vmov 0.0   ;;  %v27_v1 = vld [vmem:[#allocation4 + $0x8] sm:$0xff]  ;;  %v29_v2 = vld [vmem:[#allocation4 + $0x18] sm:$0xff]  ;;  %vm225_vm0 = vcmask 64512  }
  0x14   :  { %314 = vmatprep.mubr.f32.mxu0 %v5138_v0  ;;  %427 = vmatprep.mubr.f32.mxu1 %v5138_v0  ;;  %v26_v3 = vld [vmem:[#allocation4] sm:$0xff]  ;;  %v28_v4 = vld [vmem:[#allocation4 + $0x10] sm:$0xff]  ;;  %v37_v6 = vld [vmem:[#allocation4 + $0x48] sm:$0xff]  ;;  %vm5140_vm1 = vmmov 0  }
  0x15   :  { %250 = vmatprep.subr.mxu0 %v27_v1  ;;  %363 = vmatprep.subr.mxu1 %v29_v2  ;;  %v196_v5 = vld [vmem:[%s6124_s0] sm:$0xff]  ;;  %v41_v7 = vld [vmem:[#allocation4 + $0x68] sm:$0xff]  ;;  %v39_v8 = vld [vmem:[#allocation4 + $0x58] sm:$0xff] }
  0x16   :  { %251 = vmatpush1.msra.mxu0 %v26_v3  ;;  %364 = vmatpush1.msra.mxu1 %v28_v4  ;;  %v43_v9 = vld [vmem:[#allocation4 + $0x78] sm:$0xff]  ;;  %v5178_v10 = vpack.c.bf16 %v41_v7, %v37_v6  ;;  %v36_v12 = vld [vmem:[#allocation4 + $0x40] sm:$0xff]  ;;  %v38_v14 = vld [vmem:[#allocation4 + $0x50] sm:$0xff] }
  0x17   :  { %3494 = vmatmul.mubr.msk.f32.vlgmr.msra.gmra.mrb[0].mxu0 %vm225_vm0, %v196_v5  ;;  %3502 = vmatmul.mubr.msk.f32.vlgmr.msra.gmra.mrb[0].mxu1 %vm225_vm0, %v196_v5  ;;  %v5180_v11 = vpack.c.bf16 %v43_v9, %v39_v8  ;;  %v40_v13 = vld [vmem:[#allocation4 + $0x60] sm:$0xff]  ;;  %v42_v16 = vld [vmem:[#allocation4 + $0x70] sm:$0xff]  ;;  %v197_v17 = vld [vmem:[%s6124_s0 + $0x8] sm:$0xff] }
  0x18   :  { %v5182_v15 = vpack.c.bf16 %v40_v13, %v36_v12  ;;  %320 = vmatprep.mubr.f32.mxu0 %v5138_v0  ;;  %433 = vmatprep.mubr.f32.mxu1 %v5138_v0  ;;  %v45_v18 = vld [vmem:[#allocation4 + $0x88] sm:$0xff]  ;;  %v5191_v19 = vpack.c.bf16 %v42_v16, %v38_v14  ;;  %v47_v21 = vld [vmem:[#allocation4 + $0x98] sm:$0xff]  ;;  %v44_v25 = vld [vmem:[#allocation4 + $0x80] sm:$0xff] }
  0x19   :  { %3679 = vmatprep.subr.bf16.mxu0 %v5178_v10  ;;  %3711 = vmatprep.subr.bf16.mxu1 %v5180_v11  ;;  %v49_v20 = vld [vmem:[#allocation4 + $0xa8] sm:$0xff]  ;;  %v51_v22 = vld [vmem:[#allocation4 + $0xb8] sm:$0xff]  ;;  %v48_v26 = vld [vmem:[#allocation4 + $0xa0] sm:$0xff] }
  0x1a   :  { %3681 = vmatpush1.bf16.msra.mxu0 %v5182_v15  ;;  %v5194_v23 = vpack.c.bf16 %v49_v20, %v45_v18  ;;  %v5196_v24 = vpack.c.bf16 %v51_v22, %v47_v21  ;;  %v46_v27 = vld [vmem:[#allocation4 + $0x90] sm:$0xff]  ;;  %3713 = vmatpush1.bf16.msra.mxu1 %v5191_v19  ;;  %v5200_v28 = vpack.c.bf16 %v48_v26, %v44_v25  ;;  %v53_v31 = vld [vmem:[#allocation4 + $0xc8] sm:$0xff]  ;;  %v55_v34 = vld [vmem:[#allocation4 + $0xd8] sm:$0xff] }
  0x1b   :  { %3495 = vmatmul.mubr.msk.f32.gmra.mrb[2].mxu0 %vm225_vm0, %v197_v17  ;;  %v50_v29 = vld [vmem:[#allocation4 + $0xb0] sm:$0xff]  ;;  %3503 = vmatmul.mubr.msk.f32.gmra.mrb[2].mxu1 %vm225_vm0, %v197_v17  ;;  %v57_v33 = vld [vmem:[#allocation4 + $0xe8] sm:$0xff]  ;;  %v59_v35 = vld [vmem:[#allocation4 + $0xf8] sm:$0xff] }
  0x1c   :  { %v198_v30 = vld [vmem:[%s6124_s0 + $0x10] sm:$0xff]  ;;  %3683 = vmatprep.subr.bf16.mxu0 %v5194_v23  ;;  %v5207_v32 = vpack.c.bf16 %v50_v29, %v46_v27  ;;  %3715 = vmatprep.subr.bf16.mxu1 %v5196_v24  ;;  %v5211_v36 = vpack.c.bf16 %v57_v33, %v53_v31  ;;  %v5213_v37 = vpack.c.bf16 %v59_v35, %v55_v34  ;;  %v52_v38 = vld [vmem:[#allocation4 + $0xc0] sm:$0xff]  ;;  %v199_v43 = vld [vmem:[%s6124_s0 + $0x18] sm:$0xff] }
  0x1d   :  { %326 = vmatprep.mubr.f32.mxu0 %v5138_v0  ;;  %v56_v39 = vld [vmem:[#allocation4 + $0xe0] sm:$0xff]  ;;  %v54_v40 = vld [vmem:[#allocation4 + $0xd0] sm:$0xff]  ;;  %439 = vmatprep.mubr.f32.mxu1 %v5138_v0  ;;  %v61_v44 = vld [vmem:[#allocation4 + $0x108] sm:$0xff] }
  0x1e   :  { %3685 = vmatpush1.bf16.msra.mxu0 %v5200_v28  ;;  %v5217_v41 = vpack.c.bf16 %v56_v39, %v52_v38  ;;  %v58_v42 = vld [vmem:[#allocation4 + $0xf0] sm:$0xff]  ;;  %3717 = vmatpush1.bf16.msra.mxu1 %v5207_v32  ;;  %v65_v46 = vld [vmem:[#allocation4 + $0x128] sm:$0xff]  ;;  %v63_v47 = vld [vmem:[#allocation4 + $0x118] sm:$0xff] }
  0x1f   :  { %3496 = vmatmul.mubr.msk.f32.gmra.mrb[4].mxu0 %vm225_vm0, %v198_v30  ;;  %v5224_v45 = vpack.c.bf16 %v58_v42, %v54_v40  ;;  %v67_v48 = vld [vmem:[#allocation4 + $0x138] sm:$0xff]  ;;  %3504 = vmatmul.mubr.msk.f32.gmra.mrb[4].mxu1 %vm225_vm0, %v198_v30  ;;  %v5228_v49 = vpack.c.bf16 %v65_v46, %v61_v44  ;;  %v60_v50 = vld [vmem:[#allocation4 + $0x100] sm:$0xff]  ;;  %v62_v52 = vld [vmem:[#allocation4 + $0x110] sm:$0xff] }
  0x20   :  { %3687 = vmatprep.subr.bf16.mxu0 %v5211_v36  ;;  %v64_v51 = vld [vmem:[#allocation4 + $0x120] sm:$0xff]  ;;  %3719 = vmatprep.subr.bf16.mxu1 %v5213_v37  ;;  %v5232_v53 = vpack.c.bf16 %v67_v48, %v63_v47  ;;  %v66_v54 = vld [vmem:[#allocation4 + $0x130] sm:$0xff]  ;;  %v69_v55 = vld [vmem:[#allocation4 + $0x148] sm:$0xff] }
  0x21   :  { %332 = vmatprep.mubr.f32.mxu0 %v5138_v0  ;;  %445 = vmatprep.mubr.f32.mxu1 %v5138_v0  ;;  %v5236_v56 = vpack.c.bf16 %v64_v51, %v60_v50  ;;  %v73_v57 = vld [vmem:[#allocation4 + $0x168] sm:$0xff]  ;;  %v71_v58 = vld [vmem:[#allocation4 + $0x158] sm:$0xff]  ;;  %v5240_v60 = vpack.c.bf16 %v66_v54, %v62_v52  ;;  %v68_v61 = vld [vmem:[#allocation4 + $0x140] sm:$0xff] }
  0x22   :  { %3689 = vmatpush1.bf16.msra.mxu0 %v5217_v41  ;;  %v75_v59 = vld [vmem:[#allocation4 + $0x178] sm:$0xff]  ;;  %3721 = vmatpush1.bf16.msra.mxu1 %v5224_v45  ;;  %v72_v62 = vld [vmem:[#allocation4 + $0x160] sm:$0xff]  ;;  %v5247_v1 = vpack.c.bf16 %v73_v57, %v69_v55  ;;  %v70_v2 = vld [vmem:[#allocation4 + $0x150] sm:$0xff] }
  0x23   :  { %3497 = vmatmul.mubr.msk.f32.gmra.mrb[6].mxu0 %vm225_vm0, %v199_v43  ;;  %3505 = vmatmul.mubr.msk.f32.gmra.mrb[6].mxu1 %vm225_vm0, %v199_v43  ;;  %v200_v63 = vld [vmem:[%s6124_s0 + $0x20] sm:$0xff]  ;;  %v74_v3 = vld [vmem:[#allocation4 + $0x170] sm:$0xff]  ;;  %v5251_v4 = vpack.c.bf16 %v75_v59, %v71_v58  ;;  %v77_v5 = vld [vmem:[#allocation4 + $0x188] sm:$0xff]  ;;  %v5255_v7 = vpack.c.bf16 %v72_v62, %v68_v61  ;;  %v205_v62 = vlaneseq }
  0x24   :  { %3691 = vmatprep.subr.bf16.mxu0 %v5228_v49  ;;  %3723 = vmatprep.subr.bf16.mxu1 %v5232_v53  ;;  %v81_v6 = vld [vmem:[#allocation4 + $0x1a8] sm:$0xff]  ;;  %v79_v8 = vld [vmem:[#allocation4 + $0x198] sm:$0xff]  ;;  %v5259_v12 = vpack.c.bf16 %v74_v3, %v70_v2  ;;  %v76_v13 = vld [vmem:[#allocation4 + $0x180] sm:$0xff] }
  0x25   :  { %338 = vmatprep.mubr.f32.mxu0 %v5138_v0  ;;  %451 = vmatprep.mubr.f32.mxu1 %v5138_v0  ;;  %v83_v9 = vld [vmem:[#allocation4 + $0x1b8] sm:$0xff]  ;;  %v80_v14 = vld [vmem:[#allocation4 + $0x1a0] sm:$0xff]  ;;  %v201_v16 = vld [vmem:[%s6124_s0 + $0x28] sm:$0xff]  ;;  %v5266_v17 = vpack.c.bf16 %v81_v6, %v77_v5 }
  0x26   :  { %3693 = vmatpush1.bf16.msra.mxu0 %v5236_v56  ;;  %3725 = vmatpush1.bf16.msra.mxu1 %v5240_v60  ;;  %v78_v18 = vld [vmem:[#allocation4 + $0x190] sm:$0xff]  ;;  %v5270_v21 = vpack.c.bf16 %v83_v9, %v79_v8  ;;  %v85_v22 = vld [vmem:[#allocation4 + $0x1c8] sm:$0xff]  ;;  %v5274_v26 = vpack.c.bf16 %v80_v14, %v76_v13  ;;  %v87_v27 = vld [vmem:[#allocation4 + $0x1d8] sm:$0xff] }
  0x27   :  { %3498 = vmatmul.mubr.msk.f32.gmra.mrb[8].mxu0 %vm225_vm0, %v200_v63  ;;  %3506 = vmatmul.mubr.msk.f32.gmra.mrb[8].mxu1 %vm225_vm0, %v200_v63  ;;  %v82_v20 = vld [vmem:[#allocation4 + $0x1b0] sm:$0xff]  ;;  %v89_v25 = vld [vmem:[#allocation4 + $0x1e8] sm:$0xff]  ;;  %v91_v29 = vld [vmem:[#allocation4 + $0x1f8] sm:$0xff]  ;;  %v5364_v63 = vshrl.u32 %v205_v62, 7 }
  0x28   :  { %3695 = vmatprep.subr.bf16.mxu0 %v5247_v1  ;;  %3727 = vmatprep.subr.bf16.mxu1 %v5251_v4  ;;  %v5278_v30 = vpack.c.bf16 %v82_v20, %v78_v18  ;;  %v84_v31 = vld [vmem:[#allocation4 + $0x1c0] sm:$0xff]  ;;  %v202_v34 = vld [vmem:[%s6124_s0 + $0x30] sm:$0xff]  ;;  %v5285_v35 = vpack.c.bf16 %v89_v25, %v85_v22  ;;  %v5289_v40 = vpack.c.bf16 %v91_v29, %v87_v27  ;;  %v93_v42 = vld [vmem:[#allocation4 + $0x208] sm:$0xff] }
  0x29   :  { %344 = vmatprep.mubr.f32.mxu0 %v5138_v0  ;;  %457 = vmatprep.mubr.f32.mxu1 %v5138_v0  ;;  %v88_v33 = vld [vmem:[#allocation4 + $0x1e0] sm:$0xff]  ;;  %v86_v38 = vld [vmem:[#allocation4 + $0x1d0] sm:$0xff]  ;;  %v97_v43 = vld [vmem:[#allocation4 + $0x228] sm:$0xff]  ;;  %v207_v2 = vsub.s32 0, %v5364_v63  ;;  %v211_v5 = vsub.s32 1, %v5364_v63  ;;  %v215_v13 = vsub.s32 2, %v5364_v63 }
  0x2a   :  { %3697 = vmatpush1.bf16.msra.mxu0 %v5255_v7  ;;  %3729 = vmatpush1.bf16.msra.mxu1 %v5259_v12  ;;  %v90_v39 = vld [vmem:[#allocation4 + $0x1f0] sm:$0xff]  ;;  %v5293_v44 = vpack.c.bf16 %v88_v33, %v84_v31  ;;  %v95_v46 = vld [vmem:[#allocation4 + $0x218] sm:$0xff]  ;;  %v92_v50 = vld [vmem:[#allocation4 + $0x200] sm:$0xff]  ;;  %v5304_v54 = vpack.c.bf16 %v97_v43, %v93_v42  ;;  %v219_v31 = vsub.s32 3, %v5364_v63 }
  0x2b   :  { %3499 = vmatmul.mubr.msk.f32.gmra.mrb[10].mxu0 %vm225_vm0, %v201_v16  ;;  %3507 = vmatmul.mubr.msk.f32.gmra.mrb[10].mxu1 %vm225_vm0, %v201_v16  ;;  %v99_v47 = vld [vmem:[#allocation4 + $0x238] sm:$0xff]  ;;  %v5297_v48 = vpack.c.bf16 %v90_v39, %v86_v38  ;;  %v96_v51 = vld [vmem:[#allocation4 + $0x220] sm:$0xff]  ;;  %v94_v55 = vld [vmem:[#allocation4 + $0x210] sm:$0xff] }
  0x2c   :  { %3699 = vmatprep.subr.bf16.mxu0 %v5266_v17  ;;  %3731 = vmatprep.subr.bf16.mxu1 %v5270_v21  ;;  %v203_v52 = vld [vmem:[%s6124_s0 + $0x38] sm:$0xff]  ;;  %v98_v57 = vld [vmem:[#allocation4 + $0x230] sm:$0xff]  ;;  %v5308_v58 = vpack.c.bf16 %v99_v47, %v95_v46  ;;  %v5312_v59 = vpack.c.bf16 %v96_v51, %v92_v50  ;;  %s5141_s0 = smov [#allocation7]  }
  0x2d   :  { %350 = vmatprep.mubr.f32.mxu0 %v5138_v0  ;;  %463 = vmatprep.mubr.f32.mxu1 %v5138_v0  ;;  %v5316_v61 = vpack.c.bf16 %v98_v57, %v94_v55  ;;  %v31_v3 = vld [vmem:[#allocation4 + $0x20] ss:$8 sm:$0xf]  ;;  %s3482_s10 = sshll.u32 %s5141_s0, 4  ;;  %s3483_s10 = int_to_ptr.vmem [resolvable:$true] %s3482_s10 }
  0x2e   :  { %3701 = vmatpush1.bf16.msra.mxu0 %v5274_v26  ;;  %3733 = vmatpush1.bf16.msra.mxu1 %v5278_v30  ;;  %v5370_v6 = vrot.slane %v31_v3, %v207_v2  ;;  %v5374_v8 = vrot.slane %v31_v3, %v211_v5  ;;  %v5381_v27 = vrot.slane %v31_v3, %v215_v13  ;;  %s5109_s11 = scalar_lea.vmem %s3483_s10, 1024  ;;  %p5114_p9 = scmp.lt.s32.totalorder %s3483_s10, %s3483_s10 }
  0x2f   :  { %3500 = vmatmul.mubr.msk.f32.gmra.mrb[12].mxu0 %vm225_vm0, %v202_v34  ;;  %3508 = vmatmul.mubr.msk.f32.gmra.mrb[12].mxu1 %vm225_vm0, %v202_v34  ;;  %v5387_v34 = vrot.slane %v31_v3, %v219_v31  ;;  %p5110_p8 = scmp.ne.s32.totalorder %s3483_s10, %s5109_s11  ;;  %p5115_p10 = scmp.lt.s32.totalorder %s5109_s11, %s5109_s11 }
  0x30   :  { %3703 = vmatprep.subr.bf16.mxu0 %v5285_v35  ;;  %3735 = vmatprep.subr.bf16.mxu1 %v5289_v40 }
  0x31   :  { %356 = vmatprep.mubr.f32.mxu0 %v5138_v0  ;;  %469 = vmatprep.mubr.f32.mxu1 %v5138_v0  ;;  %p5116_p11 = por %p5115_p10, %p5114_p9 }
  0x32   :  { %3705 = vmatpush1.bf16.msra.mxu0 %v5293_v44  ;;  %3737 = vmatpush1.bf16.msra.mxu1 %v5297_v48 }
  0x33   :  { %3501 = vmatmul.mubr.msk.f32.gmra.mrb[14].mxu0 %vm225_vm0, %v203_v52  ;;  %3509 = vmatmul.mubr.msk.f32.gmra.mrb[14].mxu1 %vm225_vm0, %v203_v52  ;;  %p5117_p12 = pnand %p5116_p11, %p5110_p8 }
  0x34   :  { %3707 = vmatprep.subr.bf16.mxu0 %v5304_v54  ;;  %3739 = vmatprep.subr.bf16.mxu1 %v5308_v58 }
  0x35   :  { %576 = vmatprep.mubr.f32.mxu0 %v5138_v0  ;;  %647 = vmatprep.mubr.f32.mxu1 %v5138_v0 }
  0x36   :  { %3709 = vmatpush1.bf16.msra.mxu0 %v5312_v59  ;;  %3741 = vmatpush1.bf16.msra.mxu1 %v5316_v61 }
  0x37   :  { %3743 = vmatprep.subr.bf16.mxu0 %v5178_v10  ;;  %3775 = vmatprep.subr.bf16.mxu1 %v5180_v11 }
  0x39   :  { %577 = vmatmul.mubr.f32.vlgmr.msra.gmra.mrb[0].mxu0 %v5138_v0  ;;  %648 = vmatmul.mubr.f32.vlgmr.msra.gmra.mrb[0].mxu1 %v5138_v0 }
  0x3a   :  { %3745 = vmatpush1.bf16.msra.mxu0 %v5182_v15  ;;  %3777 = vmatpush1.bf16.msra.mxu1 %v5191_v19 }
  0x3b   :  { %3747 = vmatprep.subr.bf16.mxu0 %v5194_v23  ;;  %3779 = vmatprep.subr.bf16.mxu1 %v5196_v24 }
  0x3c   :  { %750 = vmatprep.mubr.f32.mxu0 %v5138_v0  ;;  %821 = vmatprep.mubr.f32.mxu1 %v5138_v0 }
  0x3e   :  { %3749 = vmatpush1.bf16.msra.mxu0 %v5200_v28  ;;  %3781 = vmatpush1.bf16.msra.mxu1 %v5207_v32 }
  0x3f   :  { %3751 = vmatprep.subr.bf16.mxu0 %v5211_v36  ;;  %3783 = vmatprep.subr.bf16.mxu1 %v5213_v37 }
  0x42   :  { %3753 = vmatpush1.bf16.msra.mxu0 %v5217_v41  ;;  %3785 = vmatpush1.bf16.msra.mxu1 %v5224_v45 }
  0x43   :  { %3755 = vmatprep.subr.bf16.mxu0 %v5228_v49  ;;  %3787 = vmatprep.subr.bf16.mxu1 %v5232_v53 }
  0x46   :  { %3757 = vmatpush1.bf16.msra.mxu0 %v5236_v56  ;;  %3789 = vmatpush1.bf16.msra.mxu1 %v5240_v60 }
  0x47   :  { %3759 = vmatprep.subr.bf16.mxu0 %v5247_v1  ;;  %3791 = vmatprep.subr.bf16.mxu1 %v5251_v4 }
  0x4a   :  { %3761 = vmatpush1.bf16.msra.mxu0 %v5255_v7  ;;  %3793 = vmatpush1.bf16.msra.mxu1 %v5259_v12 }
  0x4b   :  { %3763 = vmatprep.subr.bf16.mxu0 %v5266_v17  ;;  %3795 = vmatprep.subr.bf16.mxu1 %v5270_v21 }
  0x4e   :  { %3765 = vmatpush1.bf16.msra.mxu0 %v5274_v26  ;;  %3797 = vmatpush1.bf16.msra.mxu1 %v5278_v30 }
  0x4f   :  { %3767 = vmatprep.subr.bf16.mxu0 %v5285_v35  ;;  %3799 = vmatprep.subr.bf16.mxu1 %v5289_v40 }
  0x52   :  { %3769 = vmatpush1.bf16.msra.mxu0 %v5293_v44  ;;  %3801 = vmatpush1.bf16.msra.mxu1 %v5297_v48 }
  0x53   :  { %3771 = vmatprep.subr.bf16.mxu0 %v5304_v54  ;;  %3803 = vmatprep.subr.bf16.mxu1 %v5308_v58 }
  0x56   :  { %3773 = vmatpush1.bf16.msra.mxu0 %v5312_v59  ;;  %3805 = vmatpush1.bf16.msra.mxu1 %v5316_v61 }
  0x57   :  { %3807 = vmatprep.subr.bf16.mxu0 %v5178_v10  ;;  %3839 = vmatprep.subr.bf16.mxu1 %v5180_v11 }
 0x10c   :  { %v578_v9 = vpop.f32.mrb[0].mxu0  ;;  %v649_v16 = vpop.f32.mrb[0].mxu1 }
 0x10d   :  { %v4758_v14 = vadd.f32 %v578_v9, %v5370_v6  ;;  %v580_v18 = vpop.f32.mrb[1].mxu0  ;;  %v651_v22 = vpop.f32.mrb[1].mxu1  ;;  %v4774_v33 = vadd.f32 %v649_v16, %v5381_v27 }
 0x10e   :  { %v4759_v20 = vadd.f32 %v580_v18, %v5374_v8  ;;  %v4775_v39 = vadd.f32 %v651_v22, %v5387_v34 }
 0x10f   :  { %v3510_v25 = vmul.f32 -1.442695, %v4758_v14  ;;  %v3512_v38 = vmul.f32 -1.442695, %v4774_v33 }
 0x110   :  { %v3511_v29 = vmul.f32 -1.442695, %v4759_v20 }
 0x111   :  { %4831 = vpow2.f32 %v3510_v25 }
 0x112   :  { %4833 = vpow2.f32 %v3511_v29 }
 0x113   :  { %4835 = vpow2.f32 %v3512_v38 }
 0x114   :  { %4837 = vtanh.f32 %v4775_v39 }
 0x11b   :  { %v4832_v42 = vpop.eup %4831 }
 0x11c   :  { %v667_v43 = vadd.f32 1.0, %v4832_v42  ;;  %v4834_v46 = vpop.eup %4833 }
 0x11d   :  { %v668_v47 = vadd.f32 1.0, %v4834_v46  ;;  %v4836_v50 = vpop.eup %4835 }
 0x11e   :  { %4839 = vrcp.f32 %v667_v43  ;;  %v4838_v51 = vpop.eup %4837  ;;  %v669_v9 = vadd.f32 1.0, %v4836_v50 }
 0x11f   :  { %4841 = vrcp.f32 %v668_v47 }
 0x120   :  { %4843 = vrcp.f32 %v669_v9 }
 0x128   :  { %v4840_v52 = vpop.eup %4839 }
 0x129   :  { %v678_v55 = vmul.f32 %v4840_v52, %v4838_v51  ;;  %v4842_v57 = vpop.eup %4841 }
 0x12a   :  { %v677_v14 = vmul.f32 0.0, %v4842_v57  ;;  %v4844_v16 = vpop.eup %4843 }
 0x12c   :  { %v5390_v3 = vadd.f32 %v678_v55, %v677_v14 }
 0x12e   :  { %4845 = vtanh.f32 %v5390_v3 }
 0x138   :  { %v4846_v18 = vpop.eup %4845 }
 0x139   :  { %v681_v20 = vmul.f32 %v4846_v18, %v4844_v16 }
 0x13b   :  { %751 = vmatmul.mubr.f32.vlgmr.msra.gmra.mrb[2].mxu0 %v681_v20  ;;  %822 = vmatmul.mubr.f32.vlgmr.msra.gmra.mrb[2].mxu1 %v681_v20 }
 0x13c   :  { %3809 = vmatpush1.bf16.msra.mxu0 %v5182_v15  ;;  %3841 = vmatpush1.bf16.msra.mxu1 %v5191_v19 }
 0x13d   :  { %3811 = vmatprep.subr.bf16.mxu0 %v5194_v23  ;;  %3843 = vmatprep.subr.bf16.mxu1 %v5196_v24 }
 0x13e   :  { %924 = vmatprep.mubr.f32.mxu0 %v5138_v0  ;;  %995 = vmatprep.mubr.f32.mxu1 %v5138_v0 }
 0x140   :  { %3813 = vmatpush1.bf16.msra.mxu0 %v5200_v28  ;;  %3845 = vmatpush1.bf16.msra.mxu1 %v5207_v32 }
 0x141   :  { %3815 = vmatprep.subr.bf16.mxu0 %v5211_v36  ;;  %3847 = vmatprep.subr.bf16.mxu1 %v5213_v37 }
 0x144   :  { %3817 = vmatpush1.bf16.msra.mxu0 %v5217_v41  ;;  %3849 = vmatpush1.bf16.msra.mxu1 %v5224_v45 }
 0x145   :  { %3819 = vmatprep.subr.bf16.mxu0 %v5228_v49  ;;  %3851 = vmatprep.subr.bf16.mxu1 %v5232_v53 }
 0x148   :  { %3821 = vmatpush1.bf16.msra.mxu0 %v5236_v56  ;;  %3853 = vmatpush1.bf16.msra.mxu1 %v5240_v60 }
 0x149   :  { %3823 = vmatprep.subr.bf16.mxu0 %v5247_v1  ;;  %3855 = vmatprep.subr.bf16.mxu1 %v5251_v4 }
 0x14c   :  { %3825 = vmatpush1.bf16.msra.mxu0 %v5255_v7  ;;  %3857 = vmatpush1.bf16.msra.mxu1 %v5259_v12 }
 0x14d   :  { %3827 = vmatprep.subr.bf16.mxu0 %v5266_v17  ;;  %3859 = vmatprep.subr.bf16.mxu1 %v5270_v21 }
 0x150   :  { %3829 = vmatpush1.bf16.msra.mxu0 %v5274_v26  ;;  %3861 = vmatpush1.bf16.msra.mxu1 %v5278_v30 }
 0x151   :  { %3831 = vmatprep.subr.bf16.mxu0 %v5285_v35  ;;  %3863 = vmatprep.subr.bf16.mxu1 %v5289_v40 }
 0x154   :  { %3833 = vmatpush1.bf16.msra.mxu0 %v5293_v44  ;;  %3865 = vmatpush1.bf16.msra.mxu1 %v5297_v48 }
 0x155   :  { %3835 = vmatprep.subr.bf16.mxu0 %v5304_v54  ;;  %3867 = vmatprep.subr.bf16.mxu1 %v5308_v58 }
 0x158   :  { %3837 = vmatpush1.bf16.msra.mxu0 %v5312_v59  ;;  %3869 = vmatpush1.bf16.msra.mxu1 %v5316_v61 }
 0x159   :  { %3871 = vmatprep.subr.bf16.mxu0 %v5178_v10  ;;  %3903 = vmatprep.subr.bf16.mxu1 %v5180_v11 }
 0x20e   :  { %v752_v22 = vpop.f32.mrb[2].mxu0  ;;  %v823_v25 = vpop.f32.mrb[2].mxu1 }
 0x20f   :  { %v4760_v29 = vadd.f32 %v752_v22, %v5370_v6  ;;  %v754_v33 = vpop.f32.mrb[3].mxu0  ;;  %v825_v38 = vpop.f32.mrb[3].mxu1  ;;  %v4776_v46 = vadd.f32 %v823_v25, %v5381_v27 }
 0x210   :  { %v4761_v39 = vadd.f32 %v754_v33, %v5374_v8  ;;  %v4777_v47 = vadd.f32 %v825_v38, %v5387_v34 }
 0x211   :  { %v3513_v42 = vmul.f32 -1.442695, %v4760_v29  ;;  %v3515_v50 = vmul.f32 -1.442695, %v4776_v46 }
 0x212   :  { %v3514_v43 = vmul.f32 -1.442695, %v4761_v39 }
 0x213   :  { %4847 = vpow2.f32 %v3513_v42 }
 0x214   :  { %4849 = vpow2.f32 %v3514_v43 }
 0x215   :  { %4851 = vtanh.f32 %v4777_v47 }
 0x216   :  { %4853 = vpow2.f32 %v3515_v50 }
 0x21d   :  { %v4848_v51 = vpop.eup %4847 }
 0x21e   :  { %v841_v52 = vadd.f32 1.0, %v4848_v51  ;;  %v4850_v55 = vpop.eup %4849 }
 0x21f   :  { %v842_v57 = vadd.f32 1.0, %v4850_v55  ;;  %v4852_v9 = vpop.eup %4851 }
 0x220   :  { %4855 = vrcp.f32 %v841_v52  ;;  %v4854_v14 = vpop.eup %4853 }
 0x221   :  { %4857 = vrcp.f32 %v842_v57  ;;  %v843_v22 = vadd.f32 1.0, %v4854_v14 }
 0x223   :  { %4859 = vrcp.f32 %v843_v22 }
 0x22a   :  { %v4856_v16 = vpop.eup %4855 }
 0x22b   :  { %v852_v18 = vmul.f32 %v4856_v16, %v4852_v9  ;;  %v4858_v20 = vpop.eup %4857 }
 0x22c   :  { %v851_v29 = vmul.f32 %v4858_v20, %v5390_v3 }
 0x22d   :  { %v4860_v33 = vpop.eup %4859 }
 0x22e   :  { %v5432_v25 = vadd.f32 %v852_v18, %v851_v29 }
 0x230   :  { %4861 = vtanh.f32 %v5432_v25 }
 0x23a   :  { %v4862_v38 = vpop.eup %4861 }
 0x23b   :  { %v855_v39 = vmul.f32 %v4862_v38, %v4860_v33 }
 0x23d   :  { %925 = vmatmul.mubr.f32.vlgmr.msra.gmra.mrb[4].mxu0 %v855_v39  ;;  %996 = vmatmul.mubr.f32.vlgmr.msra.gmra.mrb[4].mxu1 %v855_v39 }
 0x23e   :  { %3873 = vmatpush1.bf16.msra.mxu0 %v5182_v15  ;;  %3905 = vmatpush1.bf16.msra.mxu1 %v5191_v19 }
 0x23f   :  { %3875 = vmatprep.subr.bf16.mxu0 %v5194_v23  ;;  %3907 = vmatprep.subr.bf16.mxu1 %v5196_v24 }
 0x240   :  { %1098 = vmatprep.mubr.f32.mxu0 %v5138_v0  ;;  %1169 = vmatprep.mubr.f32.mxu1 %v5138_v0 }
 0x242   :  { %3877 = vmatpush1.bf16.msra.mxu0 %v5200_v28  ;;  %3909 = vmatpush1.bf16.msra.mxu1 %v5207_v32 }
 0x243   :  { %3879 = vmatprep.subr.bf16.mxu0 %v5211_v36  ;;  %3911 = vmatprep.subr.bf16.mxu1 %v5213_v37 }
 0x246   :  { %3881 = vmatpush1.bf16.msra.mxu0 %v5217_v41  ;;  %3913 = vmatpush1.bf16.msra.mxu1 %v5224_v45 }
 0x247   :  { %3883 = vmatprep.subr.bf16.mxu0 %v5228_v49  ;;  %3915 = vmatprep.subr.bf16.mxu1 %v5232_v53 }
 0x24a   :  { %3885 = vmatpush1.bf16.msra.mxu0 %v5236_v56  ;;  %3917 = vmatpush1.bf16.msra.mxu1 %v5240_v60 }
 0x24b   :  { %3887 = vmatprep.subr.bf16.mxu0 %v5247_v1  ;;  %3919 = vmatprep.subr.bf16.mxu1 %v5251_v4 }
 0x24e   :  { %3889 = vmatpush1.bf16.msra.mxu0 %v5255_v7  ;;  %3921 = vmatpush1.bf16.msra.mxu1 %v5259_v12 }
 0x24f   :  { %3891 = vmatprep.subr.bf16.mxu0 %v5266_v17  ;;  %3923 = vmatprep.subr.bf16.mxu1 %v5270_v21 }
 0x252   :  { %3893 = vmatpush1.bf16.msra.mxu0 %v5274_v26  ;;  %3925 = vmatpush1.bf16.msra.mxu1 %v5278_v30 }
 0x253   :  { %3895 = vmatprep.subr.bf16.mxu0 %v5285_v35  ;;  %3927 = vmatprep.subr.bf16.mxu1 %v5289_v40 }
 0x256   :  { %3897 = vmatpush1.bf16.msra.mxu0 %v5293_v44  ;;  %3929 = vmatpush1.bf16.msra.mxu1 %v5297_v48 }
 0x257   :  { %3899 = vmatprep.subr.bf16.mxu0 %v5304_v54  ;;  %3931 = vmatprep.subr.bf16.mxu1 %v5308_v58 }
 0x25a   :  { %3901 = vmatpush1.bf16.msra.mxu0 %v5312_v59  ;;  %3933 = vmatpush1.bf16.msra.mxu1 %v5316_v61 }
 0x25b   :  { %3935 = vmatprep.subr.bf16.mxu0 %v5178_v10  ;;  %3967 = vmatprep.subr.bf16.mxu1 %v5180_v11 }
 0x310   :  { %v926_v3 = vpop.f32.mrb[4].mxu0  ;;  %v997_v42 = vpop.f32.mrb[4].mxu1 }
 0x311   :  { %v4762_v43 = vadd.f32 %v926_v3, %v5370_v6  ;;  %v928_v46 = vpop.f32.mrb[5].mxu0  ;;  %v999_v47 = vpop.f32.mrb[5].mxu1  ;;  %v4778_v55 = vadd.f32 %v997_v42, %v5381_v27 }
 0x312   :  { %v4763_v50 = vadd.f32 %v928_v46, %v5374_v8  ;;  %v4779_v57 = vadd.f32 %v999_v47, %v5387_v34 }
 0x313   :  { %v3516_v51 = vmul.f32 -1.442695, %v4762_v43  ;;  %v3518_v9 = vmul.f32 -1.442695, %v4778_v55 }
 0x314   :  { %v3517_v52 = vmul.f32 -1.442695, %v4763_v50 }
 0x315   :  { %4863 = vpow2.f32 %v3516_v51 }
 0x316   :  { %4865 = vpow2.f32 %v3517_v52 }
 0x317   :  { %4867 = vtanh.f32 %v4779_v57 }
 0x318   :  { %4869 = vpow2.f32 %v3518_v9 }
 0x31f   :  { %v4864_v14 = vpop.eup %4863 }
 0x320   :  { %v1015_v16 = vadd.f32 1.0, %v4864_v14  ;;  %v4866_v18 = vpop.eup %4865 }
 0x321   :  { %v1016_v20 = vadd.f32 1.0, %v4866_v18  ;;  %v4868_v22 = vpop.eup %4867 }
 0x322   :  { %4871 = vrcp.f32 %v1015_v16  ;;  %v4870_v29 = vpop.eup %4869 }
 0x323   :  { %4873 = vrcp.f32 %v1016_v20  ;;  %v1017_v3 = vadd.f32 1.0, %v4870_v29 }
 0x325   :  { %4875 = vrcp.f32 %v1017_v3 }
 0x32c   :  { %v4872_v33 = vpop.eup %4871 }
 0x32d   :  { %v1026_v38 = vmul.f32 %v4872_v33, %v4868_v22  ;;  %v4874_v39 = vpop.eup %4873 }
 0x32e   :  { %v1025_v43 = vmul.f32 %v4874_v39, %v5432_v25 }
 0x32f   :  { %v4876_v46 = vpop.eup %4875 }
 0x330   :  { %v5474_v42 = vadd.f32 %v1026_v38, %v1025_v43 }
 0x332   :  { %4877 = vtanh.f32 %v5474_v42 }
 0x33c   :  { %v4878_v47 = vpop.eup %4877 }
 0x33d   :  { %v1029_v50 = vmul.f32 %v4878_v47, %v4876_v46 }
 0x33f   :  { %1099 = vmatmul.mubr.f32.vlgmr.msra.gmra.mrb[6].mxu0 %v1029_v50  ;;  %1170 = vmatmul.mubr.f32.vlgmr.msra.gmra.mrb[6].mxu1 %v1029_v50 }
 0x340   :  { %3937 = vmatpush1.bf16.msra.mxu0 %v5182_v15  ;;  %3969 = vmatpush1.bf16.msra.mxu1 %v5191_v19 }
 0x341   :  { %3939 = vmatprep.subr.bf16.mxu0 %v5194_v23  ;;  %3971 = vmatprep.subr.bf16.mxu1 %v5196_v24 }
 0x342   :  { %1272 = vmatprep.mubr.f32.mxu0 %v5138_v0  ;;  %1343 = vmatprep.mubr.f32.mxu1 %v5138_v0 }
 0x344   :  { %3941 = vmatpush1.bf16.msra.mxu0 %v5200_v28  ;;  %3973 = vmatpush1.bf16.msra.mxu1 %v5207_v32 }
 0x345   :  { %3943 = vmatprep.subr.bf16.mxu0 %v5211_v36  ;;  %3975 = vmatprep.subr.bf16.mxu1 %v5213_v37 }
 0x348   :  { %3945 = vmatpush1.bf16.msra.mxu0 %v5217_v41  ;;  %3977 = vmatpush1.bf16.msra.mxu1 %v5224_v45 }
 0x349   :  { %3947 = vmatprep.subr.bf16.mxu0 %v5228_v49  ;;  %3979 = vmatprep.subr.bf16.mxu1 %v5232_v53 }
 0x34c   :  { %3949 = vmatpush1.bf16.msra.mxu0 %v5236_v56  ;;  %3981 = vmatpush1.bf16.msra.mxu1 %v5240_v60 }
 0x34d   :  { %3951 = vmatprep.subr.bf16.mxu0 %v5247_v1  ;;  %3983 = vmatprep.subr.bf16.mxu1 %v5251_v4 }
 0x350   :  { %3953 = vmatpush1.bf16.msra.mxu0 %v5255_v7  ;;  %3985 = vmatpush1.bf16.msra.mxu1 %v5259_v12 }
 0x351   :  { %3955 = vmatprep.subr.bf16.mxu0 %v5266_v17  ;;  %3987 = vmatprep.subr.bf16.mxu1 %v5270_v21 }
 0x354   :  { %3957 = vmatpush1.bf16.msra.mxu0 %v5274_v26  ;;  %3989 = vmatpush1.bf16.msra.mxu1 %v5278_v30 }
 0x355   :  { %3959 = vmatprep.subr.bf16.mxu0 %v5285_v35  ;;  %3991 = vmatprep.subr.bf16.mxu1 %v5289_v40 }
 0x358   :  { %3961 = vmatpush1.bf16.msra.mxu0 %v5293_v44  ;;  %3993 = vmatpush1.bf16.msra.mxu1 %v5297_v48 }
 0x359   :  { %3963 = vmatprep.subr.bf16.mxu0 %v5304_v54  ;;  %3995 = vmatprep.subr.bf16.mxu1 %v5308_v58 }
 0x35c   :  { %3965 = vmatpush1.bf16.msra.mxu0 %v5312_v59  ;;  %3997 = vmatpush1.bf16.msra.mxu1 %v5316_v61 }
 0x35d   :  { %3999 = vmatprep.subr.bf16.mxu0 %v5178_v10  ;;  %4031 = vmatprep.subr.bf16.mxu1 %v5180_v11 }
 0x412   :  { %v1100_v25 = vpop.f32.mrb[6].mxu0  ;;  %v1171_v51 = vpop.f32.mrb[6].mxu1 }
 0x413   :  { %v4764_v52 = vadd.f32 %v1100_v25, %v5370_v6  ;;  %v1102_v55 = vpop.f32.mrb[7].mxu0  ;;  %v1173_v57 = vpop.f32.mrb[7].mxu1  ;;  %v4780_v18 = vadd.f32 %v1171_v51, %v5381_v27 }
 0x414   :  { %v4765_v9 = vadd.f32 %v1102_v55, %v5374_v8  ;;  %v4781_v20 = vadd.f32 %v1173_v57, %v5387_v34 }
 0x415   :  { %v3519_v14 = vmul.f32 -1.442695, %v4764_v52  ;;  %v3521_v22 = vmul.f32 -1.442695, %v4780_v18 }
 0x416   :  { %v3520_v16 = vmul.f32 -1.442695, %v4765_v9 }
 0x417   :  { %4879 = vpow2.f32 %v3519_v14 }
 0x418   :  { %4881 = vpow2.f32 %v3520_v16 }
 0x419   :  { %4883 = vtanh.f32 %v4781_v20 }
 0x41a   :  { %4885 = vpow2.f32 %v3521_v22 }
 0x421   :  { %v4880_v29 = vpop.eup %4879 }
 0x422   :  { %v1189_v33 = vadd.f32 1.0, %v4880_v29  ;;  %v4882_v38 = vpop.eup %4881 }
 0x423   :  { %v1190_v39 = vadd.f32 1.0, %v4882_v38  ;;  %v4884_v3 = vpop.eup %4883 }
 0x424   :  { %4887 = vrcp.f32 %v1189_v33  ;;  %v4886_v43 = vpop.eup %4885 }
 0x425   :  { %4889 = vrcp.f32 %v1190_v39  ;;  %v1191_v25 = vadd.f32 1.0, %v4886_v43 }
 0x427   :  { %4891 = vrcp.f32 %v1191_v25 }
 0x42e   :  { %v4888_v46 = vpop.eup %4887 }
 0x42f   :  { %v1200_v47 = vmul.f32 %v4888_v46, %v4884_v3  ;;  %v4890_v50 = vpop.eup %4889 }
 0x430   :  { %v1199_v52 = vmul.f32 %v4890_v50, %v5474_v42 }
 0x431   :  { %v4892_v55 = vpop.eup %4891 }
 0x432   :  { %v5516_v51 = vadd.f32 %v1200_v47, %v1199_v52 }
 0x434   :  { %4893 = vtanh.f32 %v5516_v51 }
 0x43e   :  { %v4894_v57 = vpop.eup %4893 }
 0x43f   :  { %v1203_v9 = vmul.f32 %v4894_v57, %v4892_v55 }
 0x441   :  { %1273 = vmatmul.mubr.f32.vlgmr.msra.gmra.mrb[8].mxu0 %v1203_v9  ;;  %1344 = vmatmul.mubr.f32.vlgmr.msra.gmra.mrb[8].mxu1 %v1203_v9 }
 0x442   :  { %4001 = vmatpush1.bf16.msra.mxu0 %v5182_v15  ;;  %4033 = vmatpush1.bf16.msra.mxu1 %v5191_v19 }
 0x443   :  { %4003 = vmatprep.subr.bf16.mxu0 %v5194_v23  ;;  %4035 = vmatprep.subr.bf16.mxu1 %v5196_v24 }
 0x444   :  { %1446 = vmatprep.mubr.f32.mxu0 %v5138_v0  ;;  %1517 = vmatprep.mubr.f32.mxu1 %v5138_v0 }
 0x446   :  { %4005 = vmatpush1.bf16.msra.mxu0 %v5200_v28  ;;  %4037 = vmatpush1.bf16.msra.mxu1 %v5207_v32 }
 0x447   :  { %4007 = vmatprep.subr.bf16.mxu0 %v5211_v36  ;;  %4039 = vmatprep.subr.bf16.mxu1 %v5213_v37 }
 0x44a   :  { %4009 = vmatpush1.bf16.msra.mxu0 %v5217_v41  ;;  %4041 = vmatpush1.bf16.msra.mxu1 %v5224_v45 }
 0x44b   :  { %4011 = vmatprep.subr.bf16.mxu0 %v5228_v49  ;;  %4043 = vmatprep.subr.bf16.mxu1 %v5232_v53 }
 0x44e   :  { %4013 = vmatpush1.bf16.msra.mxu0 %v5236_v56  ;;  %4045 = vmatpush1.bf16.msra.mxu1 %v5240_v60 }
 0x44f   :  { %4015 = vmatprep.subr.bf16.mxu0 %v5247_v1  ;;  %4047 = vmatprep.subr.bf16.mxu1 %v5251_v4 }
 0x452   :  { %4017 = vmatpush1.bf16.msra.mxu0 %v5255_v7  ;;  %4049 = vmatpush1.bf16.msra.mxu1 %v5259_v12 }
 0x453   :  { %4019 = vmatprep.subr.bf16.mxu0 %v5266_v17  ;;  %4051 = vmatprep.subr.bf16.mxu1 %v5270_v21 }
 0x456   :  { %4021 = vmatpush1.bf16.msra.mxu0 %v5274_v26  ;;  %4053 = vmatpush1.bf16.msra.mxu1 %v5278_v30 }
 0x457   :  { %4023 = vmatprep.subr.bf16.mxu0 %v5285_v35  ;;  %4055 = vmatprep.subr.bf16.mxu1 %v5289_v40 }
 0x45a   :  { %4025 = vmatpush1.bf16.msra.mxu0 %v5293_v44  ;;  %4057 = vmatpush1.bf16.msra.mxu1 %v5297_v48 }
 0x45b   :  { %4027 = vmatprep.subr.bf16.mxu0 %v5304_v54  ;;  %4059 = vmatprep.subr.bf16.mxu1 %v5308_v58 }
 0x45e   :  { %4029 = vmatpush1.bf16.msra.mxu0 %v5312_v59  ;;  %4061 = vmatpush1.bf16.msra.mxu1 %v5316_v61 }
 0x45f   :  { %4063 = vmatprep.subr.bf16.mxu0 %v5178_v10  ;;  %4095 = vmatprep.subr.bf16.mxu1 %v5180_v11 }
 0x514   :  { %v1274_v42 = vpop.f32.mrb[8].mxu0  ;;  %v1345_v14 = vpop.f32.mrb[8].mxu1 }
 0x515   :  { %v4766_v16 = vadd.f32 %v1274_v42, %v5370_v6  ;;  %v1276_v18 = vpop.f32.mrb[9].mxu0  ;;  %v1347_v20 = vpop.f32.mrb[9].mxu1  ;;  %v4782_v38 = vadd.f32 %v1345_v14, %v5381_v27 }
 0x516   :  { %v4767_v22 = vadd.f32 %v1276_v18, %v5374_v8  ;;  %v4783_v39 = vadd.f32 %v1347_v20, %v5387_v34 }
 0x517   :  { %v3522_v29 = vmul.f32 -1.442695, %v4766_v16  ;;  %v3524_v3 = vmul.f32 -1.442695, %v4782_v38 }
 0x518   :  { %v3523_v33 = vmul.f32 -1.442695, %v4767_v22 }
 0x519   :  { %4895 = vpow2.f32 %v3522_v29 }
 0x51a   :  { %4897 = vpow2.f32 %v3523_v33 }
 0x51b   :  { %4899 = vtanh.f32 %v4783_v39 }
 0x51c   :  { %4901 = vpow2.f32 %v3524_v3 }
 0x523   :  { %v4896_v43 = vpop.eup %4895 }
 0x524   :  { %v1363_v46 = vadd.f32 1.0, %v4896_v43  ;;  %v4898_v47 = vpop.eup %4897 }
 0x525   :  { %v1364_v50 = vadd.f32 1.0, %v4898_v47  ;;  %v4900_v25 = vpop.eup %4899 }
 0x526   :  { %4903 = vrcp.f32 %v1363_v46  ;;  %v4902_v52 = vpop.eup %4901 }
 0x527   :  { %4905 = vrcp.f32 %v1364_v50  ;;  %v1365_v42 = vadd.f32 1.0, %v4902_v52 }
 0x529   :  { %4907 = vrcp.f32 %v1365_v42 }
 0x530   :  { %v4904_v55 = vpop.eup %4903 }
 0x531   :  { %v1374_v57 = vmul.f32 %v4904_v55, %v4900_v25  ;;  %v4906_v9 = vpop.eup %4905 }
 0x532   :  { %v1373_v16 = vmul.f32 %v4906_v9, %v5516_v51 }
 0x533   :  { %v4908_v18 = vpop.eup %4907 }
 0x534   :  { %v5558_v14 = vadd.f32 %v1374_v57, %v1373_v16 }
 0x536   :  { %4909 = vtanh.f32 %v5558_v14 }
 0x540   :  { %v4910_v20 = vpop.eup %4909 }
 0x541   :  { %v1377_v22 = vmul.f32 %v4910_v20, %v4908_v18 }
 0x543   :  { %1447 = vmatmul.mubr.f32.vlgmr.msra.gmra.mrb[10].mxu0 %v1377_v22  ;;  %1518 = vmatmul.mubr.f32.vlgmr.msra.gmra.mrb[10].mxu1 %v1377_v22 }
 0x544   :  { %4065 = vmatpush1.bf16.msra.mxu0 %v5182_v15  ;;  %4097 = vmatpush1.bf16.msra.mxu1 %v5191_v19 }
 0x545   :  { %4067 = vmatprep.subr.bf16.mxu0 %v5194_v23  ;;  %4099 = vmatprep.subr.bf16.mxu1 %v5196_v24 }
 0x546   :  { %1620 = vmatprep.mubr.f32.mxu0 %v5138_v0  ;;  %1691 = vmatprep.mubr.f32.mxu1 %v5138_v0 }
 0x548   :  { %4069 = vmatpush1.bf16.msra.mxu0 %v5200_v28  ;;  %4101 = vmatpush1.bf16.msra.mxu1 %v5207_v32 }
 0x549   :  { %4071 = vmatprep.subr.bf16.mxu0 %v5211_v36  ;;  %4103 = vmatprep.subr.bf16.mxu1 %v5213_v37 }
 0x54c   :  { %4073 = vmatpush1.bf16.msra.mxu0 %v5217_v41  ;;  %4105 = vmatpush1.bf16.msra.mxu1 %v5224_v45 }
 0x54d   :  { %4075 = vmatprep.subr.bf16.mxu0 %v5228_v49  ;;  %4107 = vmatprep.subr.bf16.mxu1 %v5232_v53 }
 0x550   :  { %4077 = vmatpush1.bf16.msra.mxu0 %v5236_v56  ;;  %4109 = vmatpush1.bf16.msra.mxu1 %v5240_v60 }
 0x551   :  { %4079 = vmatprep.subr.bf16.mxu0 %v5247_v1  ;;  %4111 = vmatprep.subr.bf16.mxu1 %v5251_v4 }
 0x554   :  { %4081 = vmatpush1.bf16.msra.mxu0 %v5255_v7  ;;  %4113 = vmatpush1.bf16.msra.mxu1 %v5259_v12 }
 0x555   :  { %4083 = vmatprep.subr.bf16.mxu0 %v5266_v17  ;;  %4115 = vmatprep.subr.bf16.mxu1 %v5270_v21 }
 0x558   :  { %4085 = vmatpush1.bf16.msra.mxu0 %v5274_v26  ;;  %4117 = vmatpush1.bf16.msra.mxu1 %v5278_v30 }
 0x559   :  { %4087 = vmatprep.subr.bf16.mxu0 %v5285_v35  ;;  %4119 = vmatprep.subr.bf16.mxu1 %v5289_v40 }
 0x55c   :  { %4089 = vmatpush1.bf16.msra.mxu0 %v5293_v44  ;;  %4121 = vmatpush1.bf16.msra.mxu1 %v5297_v48 }
 0x55d   :  { %4091 = vmatprep.subr.bf16.mxu0 %v5304_v54  ;;  %4123 = vmatprep.subr.bf16.mxu1 %v5308_v58 }
 0x560   :  { %4093 = vmatpush1.bf16.msra.mxu0 %v5312_v59  ;;  %4125 = vmatpush1.bf16.msra.mxu1 %v5316_v61 }
 0x561   :  { %4127 = vmatprep.subr.bf16.mxu0 %v5178_v10  ;;  %4159 = vmatprep.subr.bf16.mxu1 %v5180_v11 }
 0x616   :  { %v1448_v51 = vpop.f32.mrb[10].mxu0  ;;  %v1519_v29 = vpop.f32.mrb[10].mxu1 }
 0x617   :  { %v4768_v33 = vadd.f32 %v1448_v51, %v5370_v6  ;;  %v1450_v38 = vpop.f32.mrb[11].mxu0  ;;  %v1521_v39 = vpop.f32.mrb[11].mxu1  ;;  %v4784_v47 = vadd.f32 %v1519_v29, %v5381_v27 }
 0x618   :  { %v4769_v3 = vadd.f32 %v1450_v38, %v5374_v8  ;;  %v4785_v50 = vadd.f32 %v1521_v39, %v5387_v34  ;;  %v167_v39 = vld [vmem:[#allocation4 + $0x4a0] sm:$0xff] }
 0x619   :  { %v3525_v43 = vmul.f32 -1.442695, %v4768_v33  ;;  %v3527_v25 = vmul.f32 -1.442695, %v4784_v47 }
 0x61a   :  { %v3526_v46 = vmul.f32 -1.442695, %v4769_v3 }
 0x61b   :  { %4911 = vpow2.f32 %v3525_v43  ;;  %v168_v43 = vld [vmem:[#allocation4 + $0x4c0] sm:$0xff] }
 0x61c   :  { %4913 = vpow2.f32 %v3526_v46  ;;  %v169_v46 = vld [vmem:[#allocation4 + $0x4e0] sm:$0xff] }
 0x61d   :  { %4915 = vtanh.f32 %v4785_v50  ;;  %v4197_v47 = vpack.c.bf16 %v169_v46, %v168_v43  ;;  %v170_v50 = vld [vmem:[#allocation4 + $0x500] sm:$0xff]  ;;  %v145_v43 = vld [vmem:[#allocation4 + $0x3a8] sm:$0xff] }
 0x61e   :  { %4917 = vpow2.f32 %v3527_v25  ;;  %v171_v25 = vld [vmem:[#allocation4 + $0x520] sm:$0xff] }
 0x625   :  { %v4912_v10 = vpop.eup %4911 }
 0x626   :  { %v1537_v52 = vadd.f32 1.0, %v4912_v10  ;;  %v4914_v11 = vpop.eup %4913  ;;  %v4200_v10 = vpack.c.bf16 %v171_v25, %v170_v50  ;;  %v144_v50 = vld [vmem:[#allocation4 + $0x3a0] sm:$0xff] }
 0x627   :  { %v1538_v55 = vadd.f32 1.0, %v4914_v11  ;;  %v4916_v57 = vpop.eup %4915  ;;  %v173_v11 = vld [vmem:[#allocation4 + $0x560] sm:$0xff] }
 0x628   :  { %4919 = vrcp.f32 %v1537_v52  ;;  %v4918_v9 = vpop.eup %4917  ;;  %v172_v52 = vld [vmem:[#allocation4 + $0x540] sm:$0xff] }
 0x629   :  { %4921 = vrcp.f32 %v1538_v55  ;;  %v1539_v20 = vadd.f32 1.0, %v4918_v9  ;;  %v4203_v55 = vpack.c.bf16 %v173_v11, %v172_v52  ;;  %v175_v9 = vld [vmem:[#allocation4 + $0x5a0] sm:$0xff]  ;;  %v153_v52 = vld [vmem:[#allocation4 + $0x3e8] sm:$0xff] }
 0x62b   :  { %4923 = vrcp.f32 %v1539_v20 }
 0x632   :  { %v4920_v42 = vpop.eup %4919 }
 0x633   :  { %v1548_v16 = vmul.f32 %v4920_v42, %v4916_v57  ;;  %v4922_v18 = vpop.eup %4921  ;;  %v174_v57 = vld [vmem:[#allocation4 + $0x580] sm:$0xff] }
 0x634   :  { %v1547_v22 = vmul.f32 %v4922_v18, %v5558_v14  ;;  %v166_v14 = vld [vmem:[#allocation4 + $0x480] sm:$0xff]  ;;  %v4206_v42 = vpack.c.bf16 %v175_v9, %v174_v57 }
 0x635   :  { %v4924_v29 = vpop.eup %4923  ;;  %v4194_v3 = vpack.c.bf16 %v167_v39, %v166_v14  ;;  %v177_v18 = vld [vmem:[#allocation4 + $0x5e0] sm:$0xff] }
 0x636   :  { %v5600_v51 = vadd.f32 %v1548_v16, %v1547_v22  ;;  %v176_v16 = vld [vmem:[#allocation4 + $0x5c0] sm:$0xff] }
 0x637   :  { %v4209_v20 = vpack.c.bf16 %v177_v18, %v176_v16  ;;  %v178_v22 = vld [vmem:[#allocation4 + $0x600] sm:$0xff]  ;;  %v161_v16 = vld [vmem:[#allocation4 + $0x428] sm:$0xff] }
 0x638   :  { %4925 = vtanh.f32 %v5600_v51  ;;  %v136_v14 = vld [vmem:[#allocation4 + $0x360] sm:$0xff] }
 0x639   :  { %v152_v57 = vld [vmem:[#allocation4 + $0x3e0] sm:$0xff] }
 0x642   :  { %v4926_v33 = vpop.eup %4925 }
 0x643   :  { %v1551_v38 = vmul.f32 %v4926_v33, %v4924_v29  ;;  %v101_v33 = vld [vmem:[#allocation4 + $0x248] sm:$0xff] }
 0x645   :  { %1621 = vmatmul.mubr.f32.vlgmr.msra.gmra.mrb[12].mxu0 %v1551_v38  ;;  %1692 = vmatmul.mubr.f32.vlgmr.msra.gmra.mrb[12].mxu1 %v1551_v38  ;;  %v105_v38 = vld [vmem:[#allocation4 + $0x268] sm:$0xff] }
 0x646   :  { %4129 = vmatpush1.bf16.msra.mxu0 %v5182_v15  ;;  %4161 = vmatpush1.bf16.msra.mxu1 %v5191_v19 }
 0x647   :  { %4131 = vmatprep.subr.bf16.mxu0 %v5194_v23  ;;  %4163 = vmatprep.subr.bf16.mxu1 %v5196_v24 }
 0x648   :  { %1794 = vmatprep.mubr.f32.mxu0 %v5138_v0  ;;  %1865 = vmatprep.mubr.f32.mxu1 %v5138_v0 }
 0x64a   :  { %4133 = vmatpush1.bf16.msra.mxu0 %v5200_v28  ;;  %4165 = vmatpush1.bf16.msra.mxu1 %v5207_v32 }
 0x64b   :  { %4135 = vmatprep.subr.bf16.mxu0 %v5211_v36  ;;  %4167 = vmatprep.subr.bf16.mxu1 %v5213_v37 }
 0x64e   :  { %4137 = vmatpush1.bf16.msra.mxu0 %v5217_v41  ;;  %4169 = vmatpush1.bf16.msra.mxu1 %v5224_v45 }
 0x64f   :  { %4139 = vmatprep.subr.bf16.mxu0 %v5228_v49  ;;  %4171 = vmatprep.subr.bf16.mxu1 %v5232_v53 }
 0x652   :  { %4141 = vmatpush1.bf16.msra.mxu0 %v5236_v56  ;;  %4173 = vmatpush1.bf16.msra.mxu1 %v5240_v60 }
 0x653   :  { %4143 = vmatprep.subr.bf16.mxu0 %v5247_v1  ;;  %4175 = vmatprep.subr.bf16.mxu1 %v5251_v4 }
 0x656   :  { %4145 = vmatpush1.bf16.msra.mxu0 %v5255_v7  ;;  %4177 = vmatpush1.bf16.msra.mxu1 %v5259_v12 }
 0x657   :  { %4147 = vmatprep.subr.bf16.mxu0 %v5266_v17  ;;  %4179 = vmatprep.subr.bf16.mxu1 %v5270_v21 }
 0x65a   :  { %4149 = vmatpush1.bf16.msra.mxu0 %v5274_v26  ;;  %4181 = vmatpush1.bf16.msra.mxu1 %v5278_v30 }
 0x65b   :  { %4151 = vmatprep.subr.bf16.mxu0 %v5285_v35  ;;  %4183 = vmatprep.subr.bf16.mxu1 %v5289_v40 }
 0x65e   :  { %4153 = vmatpush1.bf16.msra.mxu0 %v5293_v44  ;;  %4185 = vmatpush1.bf16.msra.mxu1 %v5297_v48 }
 0x65f   :  { %4155 = vmatprep.subr.bf16.mxu0 %v5304_v54  ;;  %4187 = vmatprep.subr.bf16.mxu1 %v5308_v58  ;;  %v164_v54 = vld [vmem:[#allocation4 + $0x440] sm:$0xff] }
 0x660   :  { %v165_v58 = vld [vmem:[#allocation4 + $0x460] sm:$0xff] }
 0x662   :  { %4157 = vmatpush1.bf16.msra.mxu0 %v5312_v59  ;;  %4189 = vmatpush1.bf16.msra.mxu1 %v5316_v61  ;;  %v4191_v59 = vpack.c.bf16 %v165_v58, %v164_v54  ;;  %v5139_v61 = vmov 0.0|0.0   ;;  %v133_v54 = vld [vmem:[#allocation4 + $0x348] sm:$0xff] }
 0x663   :  { %4190 = vmatprep.subr.bf16.mxu0 %v5139_v61  ;;  %v137_v58 = vld [vmem:[#allocation4 + $0x368] sm:$0xff] }
 0x718   :  { %v1622_v15 = vpop.f32.mrb[12].mxu0  ;;  %v1693_v19 = vpop.f32.mrb[12].mxu1 }
 0x719   :  { %v4770_v23 = vadd.f32 %v1622_v15, %v5370_v6  ;;  %v1624_v24 = vpop.f32.mrb[13].mxu0  ;;  %v1695_v28 = vpop.f32.mrb[13].mxu1  ;;  %v4786_v41 = vadd.f32 %v1693_v19, %v5381_v27  ;;  %v103_v15 = vld [vmem:[#allocation4 + $0x258] sm:$0xff]  ;;  %v5645_v19 = vpack.c.bf16 %v105_v38, %v101_v33 }
 0x71a   :  { %v4771_v32 = vadd.f32 %v1624_v24, %v5374_v8  ;;  %v4787_v45 = vadd.f32 %v1695_v28, %v5387_v34  ;;  %v100_v24 = vld [vmem:[#allocation4 + $0x240] sm:$0xff] }
 0x71b   :  { %v3528_v36 = vmul.f32 -1.442695, %v4770_v23  ;;  %v3530_v49 = vmul.f32 -1.442695, %v4786_v41  ;;  %v107_v23 = vld [vmem:[#allocation4 + $0x278] sm:$0xff]  ;;  %v104_v28 = vld [vmem:[#allocation4 + $0x260] sm:$0xff]  ;;  %4215 = vmatprep.subr.bf16.mxu1 %v5645_v19 }
 0x71c   :  { %v3529_v37 = vmul.f32 -1.442695, %v4771_v32  ;;  %v5647_v32 = vpack.c.bf16 %v107_v23, %v103_v15  ;;  %v113_v41 = vld [vmem:[#allocation4 + $0x2a8] sm:$0xff] }
 0x71d   :  { %4927 = vpow2.f32 %v3528_v36  ;;  %v5649_v36 = vpack.c.bf16 %v104_v28, %v100_v24 }
 0x71e   :  { %4929 = vpow2.f32 %v3529_v37  ;;  %v109_v37 = vld [vmem:[#allocation4 + $0x288] sm:$0xff] }
 0x71f   :  { %4931 = vtanh.f32 %v4787_v45  ;;  %v5654_v45 = vpack.c.bf16 %v113_v41, %v109_v37 }
 0x720   :  { %4933 = vpow2.f32 %v3530_v49  ;;  %v108_v49 = vld [vmem:[#allocation4 + $0x280] sm:$0xff] }
 0x727   :  { %v4928_v53 = vpop.eup %4927 }
 0x728   :  { %v1711_v56 = vadd.f32 1.0, %v4928_v53  ;;  %v4930_v60 = vpop.eup %4929  ;;  %v112_v53 = vld [vmem:[#allocation4 + $0x2a0] sm:$0xff] }
 0x729   :  { %v1712_v1 = vadd.f32 1.0, %v4930_v60  ;;  %v4932_v4 = vpop.eup %4931  ;;  %v117_v60 = vld [vmem:[#allocation4 + $0x2c8] sm:$0xff] }
 0x72a   :  { %4935 = vrcp.f32 %v1711_v56  ;;  %v4934_v7 = vpop.eup %4933  ;;  %v5656_v56 = vpack.c.bf16 %v112_v53, %v108_v49 }
 0x72b   :  { %4937 = vrcp.f32 %v1712_v1  ;;  %v1713_v26 = vadd.f32 1.0, %v4934_v7  ;;  %v121_v1 = vld [vmem:[#allocation4 + $0x2e8] sm:$0xff]  ;;  %v116_v7 = vld [vmem:[#allocation4 + $0x2c0] sm:$0xff] }
 0x72d   :  { %4939 = vrcp.f32 %v1713_v26  ;;  %v129_v26 = vld [vmem:[#allocation4 + $0x328] sm:$0xff] }
 0x734   :  { %v4936_v12 = vpop.eup %4935 }
 0x735   :  { %v1722_v17 = vmul.f32 %v4936_v12, %v4932_v4  ;;  %v4938_v21 = vpop.eup %4937  ;;  %v5659_v4 = vpack.c.bf16 %v121_v1, %v117_v60  ;;  %v120_v12 = vld [vmem:[#allocation4 + $0x2e0] sm:$0xff] }
 0x736   :  { %v1721_v30 = vmul.f32 %v4938_v21, %v5600_v51  ;;  %v179_v51 = vld [vmem:[#allocation4 + $0x620] sm:$0xff]  ;;  %v125_v21 = vld [vmem:[#allocation4 + $0x308] sm:$0xff] }
 0x737   :  { %v4940_v40 = vpop.eup %4939  ;;  %v4212_v29 = vpack.c.bf16 %v179_v51, %v178_v22 }
 0x738   :  { %v5640_v35 = vadd.f32 %v1722_v17, %v1721_v30  ;;  %v5662_v17 = vpack.c.bf16 %v120_v12, %v116_v7  ;;  %v5665_v30 = vpack.c.bf16 %v129_v26, %v125_v21 }
 0x73a   :  { %4941 = vtanh.f32 %v5640_v35 }
 0x744   :  { %v4942_v44 = vpop.eup %4941 }
 0x745   :  { %v1725_v48 = vmul.f32 %v4942_v44, %v4940_v40  ;;  %v124_v40 = vld [vmem:[#allocation4 + $0x300] sm:$0xff] }
 0x746   :  { %v128_v44 = vld [vmem:[#allocation4 + $0x320] sm:$0xff] }
 0x747   :  { %1795 = vmatmul.mubr.f32.vlgmr.msra.gmra.mrb[14].mxu0 %v1725_v48  ;;  %1866 = vmatmul.mubr.f32.vlgmr.msra.gmra.mrb[14].mxu1 %v1725_v48  ;;  %v5668_v48 = vpack.c.bf16 %v128_v44, %v124_v40  ;;  %v106_v40 = vld [vmem:[#allocation4 + $0x270] sm:$0xff]  ;;  %v111_v44 = vld [vmem:[#allocation4 + $0x298] sm:$0xff] }
 0x748   :  { %2055 = vmatprep.mubr.f32.mxu1 %v5138_v0  ;;  %4192 = vmatpush3.bf16.msra.mxu0 %v4191_v59  ;;  %v5671_v59 = vpack.c.bf16 %v137_v58, %v133_v54  ;;  %v115_v54 = vld [vmem:[#allocation4 + $0x2b8] sm:$0xff] }
 0x749   :  { %4193 = vmatprep.subr.bf16.mxu0 %v5139_v61  ;;  %3631 = vmatprep.mubr.msk.f32.mxu0 %vm5140_vm1, %v5138_v0 }
 0x74a   :  { %4217 = vmatpush1.bf16.msra.mxu1 %v5649_v36 }
 0x74b   :  { %4219 = vmatprep.subr.bf16.mxu1 %v5654_v45 }
 0x74c   :  { %4195 = vmatpush3.bf16.msra.mxu0 %v4194_v3  ;;  %v141_v3 = vld [vmem:[#allocation4 + $0x388] sm:$0xff] }
 0x74d   :  { %4196 = vmatprep.subr.bf16.mxu0 %v5139_v61  ;;  %v5677_v46 = vpack.c.bf16 %v145_v43, %v141_v3  ;;  %v5700_v43 = vpack.c.bf16 %v115_v54, %v111_v44 }
 0x74e   :  { %4221 = vmatpush1.bf16.msra.mxu1 %v5656_v56 }
 0x74f   :  { %4223 = vmatprep.subr.bf16.mxu1 %v5659_v4 }
 0x750   :  { %4198 = vmatpush3.bf16.msra.mxu0 %v4197_v47  ;;  %v140_v47 = vld [vmem:[#allocation4 + $0x380] sm:$0xff] }
 0x751   :  { %4199 = vmatprep.subr.bf16.mxu0 %v5139_v61  ;;  %v5680_v25 = vpack.c.bf16 %v144_v50, %v140_v47  ;;  %v110_v47 = vld [vmem:[#allocation4 + $0x290] sm:$0xff] }
 0x752   :  { %4225 = vmatpush1.bf16.msra.mxu1 %v5662_v17  ;;  %v114_v50 = vld [vmem:[#allocation4 + $0x2b0] sm:$0xff] }
 0x753   :  { %4227 = vmatprep.subr.bf16.mxu1 %v5665_v30 }
 0x754   :  { %4201 = vmatpush3.bf16.msra.mxu0 %v4200_v10  ;;  %v149_v10 = vld [vmem:[#allocation4 + $0x3c8] sm:$0xff] }
 0x755   :  { %4202 = vmatprep.subr.bf16.mxu0 %v5139_v61  ;;  %v5683_v11 = vpack.c.bf16 %v153_v52, %v149_v10  ;;  %v119_v10 = vld [vmem:[#allocation4 + $0x2d8] sm:$0xff] }
 0x756   :  { %4229 = vmatpush1.bf16.msra.mxu1 %v5668_v48  ;;  %v123_v52 = vld [vmem:[#allocation4 + $0x2f8] sm:$0xff] }
 0x757   :  { %4231 = vmatprep.subr.bf16.mxu1 %v5671_v59 }
 0x758   :  { %4204 = vmatpush3.bf16.msra.mxu0 %v4203_v55  ;;  %v148_v55 = vld [vmem:[#allocation4 + $0x3c0] sm:$0xff] }
 0x759   :  { %4205 = vmatprep.subr.bf16.mxu0 %v5139_v61  ;;  %v5686_v9 = vpack.c.bf16 %v152_v57, %v148_v55  ;;  %v5707_v55 = vpack.c.bf16 %v123_v52, %v119_v10  ;;  %v118_v57 = vld [vmem:[#allocation4 + $0x2d0] sm:$0xff]  ;;  %v34_v52 = vld [vmem:[#allocation4 + $0x22] ss:$0 sm:$0xff] }
 0x75c   :  { %4207 = vmatpush3.bf16.msra.mxu0 %v4206_v42  ;;  %v157_v42 = vld [vmem:[#allocation4 + $0x408] sm:$0xff] }
 0x75d   :  { %4208 = vmatprep.subr.bf16.mxu0 %v5139_v61  ;;  %v5689_v18 = vpack.c.bf16 %v161_v16, %v157_v42  ;;  %v122_v42 = vld [vmem:[#allocation4 + $0x2f0] sm:$0xff]  ;;  %v127_v16 = vld [vmem:[#allocation4 + $0x318] sm:$0xff] }
 0x760   :  { %4210 = vmatpush3.bf16.msra.mxu0 %v4209_v20 }
 0x761   :  { %4211 = vmatprep.subr.bf16.mxu0 %v5139_v61  ;;  %v132_v61 = vld [vmem:[#allocation4 + $0x340] sm:$0xff] }
 0x762   :  { %v5674_v39 = vpack.c.bf16 %v136_v14, %v132_v61 }
 0x764   :  { %4213 = vmatpush3.bf16.msra.mxu0 %v4212_v29  ;;  %4233 = vmatpush1.bf16.msra.mxu1 %v5674_v39 }
 0x765   :  { %4247 = vmatprep.subr.bf16.mxu0 %v5647_v32  ;;  %4235 = vmatprep.subr.bf16.mxu1 %v5677_v46 }
 0x768   :  { %4237 = vmatpush1.bf16.msra.mxu1 %v5680_v25 }
 0x769   :  { %4239 = vmatprep.subr.bf16.mxu1 %v5683_v11 }
 0x76c   :  { %4241 = vmatpush1.bf16.msra.mxu1 %v5686_v9 }
 0x76d   :  { %4243 = vmatprep.subr.bf16.mxu1 %v5689_v18 }
 0x81a   :  { %v1796_v20 = vpop.f32.mrb[14].mxu0  ;;  %v1867_v22 = vpop.f32.mrb[14].mxu1 }
 0x81b   :  { %v4772_v51 = vadd.f32 %v1796_v20, %v5370_v6  ;;  %v1798_v29 = vpop.f32.mrb[15].mxu0  ;;  %v1869_v33 = vpop.f32.mrb[15].mxu1  ;;  %v4788_v24 = vadd.f32 %v1867_v22, %v5381_v27  ;;  %v131_v20 = vld [vmem:[#allocation4 + $0x338] sm:$0xff]  ;;  %v5710_v22 = vpack.c.bf16 %v122_v42, %v118_v57 }
 0x81c   :  { %v4773_v38 = vadd.f32 %v1798_v29, %v5374_v8  ;;  %v4789_v28 = vadd.f32 %v1869_v33, %v5387_v34  ;;  %v102_v34 = vld [vmem:[#allocation4 + $0x250] sm:$0xff] }
 0x81d   :  { %v3531_v15 = vmul.f32 -1.442695, %v4772_v51  ;;  %v3533_v37 = vmul.f32 -1.442695, %v4788_v24  ;;  %v5698_v14 = vpack.c.bf16 %v106_v40, %v102_v34  ;;  %v5713_v51 = vpack.c.bf16 %v131_v20, %v127_v16  ;;  %v126_v29 = vld [vmem:[#allocation4 + $0x310] sm:$0xff]  ;;  %v159_v34 = vld [vmem:[#allocation4 + $0x418] sm:$0xff] }
 0x81e   :  { %v3532_v23 = vmul.f32 -1.442695, %v4773_v38  ;;  %v130_v33 = vld [vmem:[#allocation4 + $0x330] sm:$0xff]  ;;  %v135_v38 = vld [vmem:[#allocation4 + $0x358] sm:$0xff] }
 0x81f   :  { %4943 = vpow2.f32 %v3531_v15  ;;  %v139_v15 = vld [vmem:[#allocation4 + $0x378] sm:$0xff] }
 0x820   :  { %4945 = vpow2.f32 %v3532_v23  ;;  %v5716_v23 = vpack.c.bf16 %v130_v33, %v126_v29  ;;  %v5719_v24 = vpack.c.bf16 %v139_v15, %v135_v38  ;;  %v163_v40 = vld [vmem:[#allocation4 + $0x438] sm:$0xff] }
 0x821   :  { %4947 = vtanh.f32 %v4789_v28  ;;  %v134_v28 = vld [vmem:[#allocation4 + $0x350] sm:$0xff]  ;;  %v5737_v54 = vpack.c.bf16 %v163_v40, %v159_v34 }
 0x822   :  { %4949 = vpow2.f32 %v3533_v37  ;;  %v138_v37 = vld [vmem:[#allocation4 + $0x370] sm:$0xff] }
 0x823   :  { %v33_v20 = vld [vmem:[#allocation4 + $0x21] ss:$8 sm:$0xf] }
 0x824   :  { %v5785_v29 = vrot.slane %v33_v20, %v207_v2  ;;  %v5789_v33 = vrot.slane %v33_v20, %v211_v5  ;;  %v5799_v2 = vrot.slane %v33_v20, %v219_v31 }
 0x829   :  { %v4944_v41 = vpop.eup %4943 }
 0x82a   :  { %v1885_v49 = vadd.f32 1.0, %v4944_v41  ;;  %v4946_v53 = vpop.eup %4945  ;;  %v143_v41 = vld [vmem:[#allocation4 + $0x398] sm:$0xff] }
 0x82b   :  { %v1886_v6 = vadd.f32 1.0, %v4946_v53  ;;  %v4948_v60 = vpop.eup %4947  ;;  %v5722_v53 = vpack.c.bf16 %v138_v37, %v134_v28 }
 0x82c   :  { %4951 = vrcp.f32 %v1885_v49  ;;  %v4950_v1 = vpop.eup %4949  ;;  %v147_v49 = vld [vmem:[#allocation4 + $0x3b8] sm:$0xff] }
 0x82d   :  { %4953 = vrcp.f32 %v1886_v6  ;;  %v1887_v21 = vadd.f32 1.0, %v4950_v1  ;;  %v5725_v6 = vpack.c.bf16 %v147_v49, %v143_v41  ;;  %v146_v1 = vld [vmem:[#allocation4 + $0x3b0] sm:$0xff] }
 0x82f   :  { %4955 = vrcp.f32 %v1887_v21 }
 0x836   :  { %v4952_v8 = vpop.eup %4951 }
 0x837   :  { %v1896_v7 = vmul.f32 %v4952_v8, %v4948_v60  ;;  %v4954_v12 = vpop.eup %4953  ;;  %v142_v60 = vld [vmem:[#allocation4 + $0x390] sm:$0xff]  ;;  %v151_v8 = vld [vmem:[#allocation4 + $0x3d8] sm:$0xff] }
 0x838   :  { %v1895_v26 = vmul.f32 %v4954_v12, %v5640_v35  ;;  %v5703_v35 = vpack.c.bf16 %v114_v50, %v110_v47  ;;  %v5728_v12 = vpack.c.bf16 %v146_v1, %v142_v60  ;;  %v162_v50 = vld [vmem:[#allocation4 + $0x430] sm:$0xff] }
 0x839   :  { %v4956_v58 = vpop.eup %4955 }
 0x83a   :  { %v1897_v27 = vadd.f32 %v1896_v7, %v1895_v26  ;;  %v155_v7 = vld [vmem:[#allocation4 + $0x3f8] sm:$0xff]  ;;  %v150_v26 = vld [vmem:[#allocation4 + $0x3d0] sm:$0xff] }
 0x83b   :  { %v5731_v21 = vpack.c.bf16 %v155_v7, %v151_v8  ;;  %v5795_v8 = vrot.slane %v33_v20, %v215_v13 }
 0x83c   :  { %4957 = vtanh.f32 %v1897_v27  ;;  %v154_v27 = vld [vmem:[#allocation4 + $0x3f0] sm:$0xff] }
 0x83d   :  { %v5734_v44 = vpack.c.bf16 %v154_v27, %v150_v26 }
 0x846   :  { %v4958_v61 = vpop.eup %4957 }
 0x847   :  { %v1899_v3 = vmul.f32 %v4958_v61, %v4956_v58  ;;  %v156_v58 = vld [vmem:[#allocation4 + $0x400] sm:$0xff] }
 0x848   :  { %v160_v61 = vld [vmem:[#allocation4 + $0x420] sm:$0xff] }
 0x849   :  { %3632 = vmatmul.mubr.f32.vlgmr.msra.gmra.mrb[16].mxu0 %v1899_v3  ;;  %v158_v3 = vld [vmem:[#allocation4 + $0x410] sm:$0xff]  ;;  %v5741_v47 = vpack.c.bf16 %v160_v61, %v156_v58 }
 0x84a   :  { %4249 = vmatpush1.bf16.msra.mxu0 %v5698_v14  ;;  %2126 = vmatprep.mubr.f32.mxu0 %v5138_v0  ;;  %v5743_v10 = vpack.c.bf16 %v162_v50, %v158_v3 }
 0x84b   :  { %4251 = vmatprep.subr.bf16.mxu0 %v5700_v43  ;;  %4245 = vmatpush1.bf16.msra.mxu1 %v5741_v47 }
 0x84c   :  { %4279 = vmatprep.subr.bf16.mxu1 %v5645_v19 }
 0x84e   :  { %4253 = vmatpush1.bf16.msra.mxu0 %v5703_v35 }
 0x84f   :  { %4255 = vmatprep.subr.bf16.mxu0 %v5707_v55 }
 0x852   :  { %4257 = vmatpush1.bf16.msra.mxu0 %v5710_v22 }
 0x853   :  { %4259 = vmatprep.subr.bf16.mxu0 %v5713_v51 }
 0x856   :  { %4261 = vmatpush1.bf16.msra.mxu0 %v5716_v23 }
 0x857   :  { %4263 = vmatprep.subr.bf16.mxu0 %v5719_v24 }
 0x85a   :  { %4265 = vmatpush1.bf16.msra.mxu0 %v5722_v53 }
 0x85b   :  { %4267 = vmatprep.subr.bf16.mxu0 %v5725_v6 }
 0x85e   :  { %4269 = vmatpush1.bf16.msra.mxu0 %v5728_v12 }
 0x85f   :  { %4271 = vmatprep.subr.bf16.mxu0 %v5731_v21 }
 0x862   :  { %4273 = vmatpush1.bf16.msra.mxu0 %v5734_v44 }
 0x863   :  { %4275 = vmatprep.subr.bf16.mxu0 %v5737_v54 }
 0x866   :  { %4277 = vmatpush1.bf16.msra.mxu0 %v5743_v10 }
 0x867   :  { %4311 = vmatprep.subr.bf16.mxu0 %v5647_v32 }
 0x91c   :  { %v1966_v57 = vpop.f32.mrb[16].mxu0 }
 0x91d   :  { %v1967_v42 = vadd.f32 %v1966_v57, %v34_v52  ;;  %v3633_v16 = vpop.f32.mrb[17].mxu0 }
 0x91f   :  { %2056 = vmatmul.mubr.f32.vlgmr.msra.gmra.mrb[16].mxu1 %v1967_v42  ;;  %2127 = vmatmul.mubr.f32.vlgmr.msra.gmra.mrb[18].mxu0 %v1967_v42 }
 0x920   :  { %4281 = vmatpush1.bf16.msra.mxu1 %v5649_v36  ;;  %4313 = vmatpush1.bf16.msra.mxu0 %v5698_v14 }
 0x921   :  { %4283 = vmatprep.subr.bf16.mxu1 %v5654_v45  ;;  %4315 = vmatprep.subr.bf16.mxu0 %v5700_v43 }
 0x922   :  { %2222 = vmatprep.mubr.f32.mxu1 %v5138_v0  ;;  %2293 = vmatprep.mubr.f32.mxu0 %v5138_v0 }
 0x924   :  { %4285 = vmatpush1.bf16.msra.mxu1 %v5656_v56  ;;  %4317 = vmatpush1.bf16.msra.mxu0 %v5703_v35 }
 0x925   :  { %4287 = vmatprep.subr.bf16.mxu1 %v5659_v4  ;;  %4319 = vmatprep.subr.bf16.mxu0 %v5707_v55 }
 0x928   :  { %4289 = vmatpush1.bf16.msra.mxu1 %v5662_v17  ;;  %4321 = vmatpush1.bf16.msra.mxu0 %v5710_v22 }
 0x929   :  { %4291 = vmatprep.subr.bf16.mxu1 %v5665_v30  ;;  %4323 = vmatprep.subr.bf16.mxu0 %v5713_v51 }
 0x92c   :  { %4293 = vmatpush1.bf16.msra.mxu1 %v5668_v48  ;;  %4325 = vmatpush1.bf16.msra.mxu0 %v5716_v23 }
 0x92d   :  { %4295 = vmatprep.subr.bf16.mxu1 %v5671_v59  ;;  %4327 = vmatprep.subr.bf16.mxu0 %v5719_v24 }
 0x930   :  { %4297 = vmatpush1.bf16.msra.mxu1 %v5674_v39  ;;  %4329 = vmatpush1.bf16.msra.mxu0 %v5722_v53 }
 0x931   :  { %4299 = vmatprep.subr.bf16.mxu1 %v5677_v46  ;;  %4331 = vmatprep.subr.bf16.mxu0 %v5725_v6 }
 0x934   :  { %4301 = vmatpush1.bf16.msra.mxu1 %v5680_v25  ;;  %4333 = vmatpush1.bf16.msra.mxu0 %v5728_v12 }
 0x935   :  { %4303 = vmatprep.subr.bf16.mxu1 %v5683_v11  ;;  %4335 = vmatprep.subr.bf16.mxu0 %v5731_v21 }
 0x938   :  { %4305 = vmatpush1.bf16.msra.mxu1 %v5686_v9  ;;  %4337 = vmatpush1.bf16.msra.mxu0 %v5734_v44 }
 0x939   :  { %4307 = vmatprep.subr.bf16.mxu1 %v5689_v18  ;;  %4339 = vmatprep.subr.bf16.mxu0 %v5737_v54 }
 0x93c   :  { %4309 = vmatpush1.bf16.msra.mxu1 %v5741_v47  ;;  %4341 = vmatpush1.bf16.msra.mxu0 %v5743_v10 }
 0x93d   :  { %4343 = vmatprep.subr.bf16.mxu1 %v5645_v19  ;;  %4375 = vmatprep.subr.bf16.mxu0 %v5647_v32 }
 0x9f2   :  { %v2057_v38 = vpop.f32.mrb[16].mxu1  ;;  %v2128_v15 = vpop.f32.mrb[18].mxu0 }
 0x9f3   :  { %v2058_v28 = vadd.f32 %v2057_v38, %v5785_v29  ;;  %v2059_v37 = vpop.f32.mrb[17].mxu1  ;;  %v2130_v41 = vpop.f32.mrb[19].mxu0  ;;  %v2129_v5 = vadd.f32 %v2128_v15, %v5795_v8 }
 0x9f4   :  { %v2060_v49 = vadd.f32 %v2059_v37, %v5789_v33  ;;  %v2131_v7 = vadd.f32 %v2130_v41, %v5799_v2 }
 0x9f5   :  { %v3534_v60 = vmul.f32 -1.442695, %v2058_v28  ;;  %v3536_v26 = vmul.f32 -1.442695, %v2129_v5 }
 0x9f6   :  { %v3535_v1 = vmul.f32 -1.442695, %v2060_v49 }
 0x9f7   :  { %4959 = vpow2.f32 %v3534_v60 }
 0x9f8   :  { %4961 = vpow2.f32 %v3535_v1 }
 0x9f9   :  { %4963 = vtanh.f32 %v2131_v7 }
 0x9fa   :  { %4965 = vpow2.f32 %v3536_v26 }
 0xa01   :  { %v4960_v27 = vpop.eup %4959 }
 0xa02   :  { %v2142_v34 = vadd.f32 1.0, %v4960_v27  ;;  %v4962_v40 = vpop.eup %4961 }
 0xa03   :  { %v2143_v58 = vadd.f32 1.0, %v4962_v40  ;;  %v4964_v13 = vpop.eup %4963 }
 0xa04   :  { %4967 = vrcp.f32 %v2142_v34  ;;  %v4966_v61 = vpop.eup %4965 }
 0xa05   :  { %4969 = vrcp.f32 %v2143_v58  ;;  %v2144_v31 = vadd.f32 1.0, %v4966_v61 }
 0xa07   :  { %4971 = vrcp.f32 %v2144_v31 }
 0xa0e   :  { %v4968_v3 = vpop.eup %4967 }
 0xa0f   :  { %v2153_v50 = vmul.f32 %v4968_v3, %v4964_v13  ;;  %v4970_v63 = vpop.eup %4969 }
 0xa10   :  { %v2152_v52 = vmul.f32 0.0, %v4970_v63 }
 0xa11   :  { %v4972_v42 = vpop.eup %4971 }
 0xa12   :  { %v5803_v57 = vadd.f32 %v2153_v50, %v2152_v52 }
 0xa14   :  { %4973 = vtanh.f32 %v5803_v57 }
 0xa1e   :  { %v4974_v16 = vpop.eup %4973 }
 0xa1f   :  { %v5806_v20 = vmul.f32 %v4974_v16, %v4972_v42 }
 0xa21   :  { %2223 = vmatmul.mubr.f32.vlgmr.msra.gmra.mrb[18].mxu1 %v5806_v20  ;;  %2294 = vmatmul.mubr.f32.vlgmr.msra.gmra.mrb[20].mxu0 %v5806_v20 }
 0xa22   :  { %4345 = vmatpush1.bf16.msra.mxu1 %v5649_v36  ;;  %4377 = vmatpush1.bf16.msra.mxu0 %v5698_v14 }
 0xa23   :  { %4347 = vmatprep.subr.bf16.mxu1 %v5654_v45  ;;  %4379 = vmatprep.subr.bf16.mxu0 %v5700_v43 }
 0xa24   :  { %2389 = vmatprep.mubr.f32.mxu1 %v5138_v0  ;;  %2460 = vmatprep.mubr.f32.mxu0 %v5138_v0 }
 0xa26   :  { %4349 = vmatpush1.bf16.msra.mxu1 %v5656_v56  ;;  %4381 = vmatpush1.bf16.msra.mxu0 %v5703_v35 }
 0xa27   :  { %4351 = vmatprep.subr.bf16.mxu1 %v5659_v4  ;;  %4383 = vmatprep.subr.bf16.mxu0 %v5707_v55 }
 0xa2a   :  { %4353 = vmatpush1.bf16.msra.mxu1 %v5662_v17  ;;  %4385 = vmatpush1.bf16.msra.mxu0 %v5710_v22 }
 0xa2b   :  { %4355 = vmatprep.subr.bf16.mxu1 %v5665_v30  ;;  %4387 = vmatprep.subr.bf16.mxu0 %v5713_v51 }
 0xa2e   :  { %4357 = vmatpush1.bf16.msra.mxu1 %v5668_v48  ;;  %4389 = vmatpush1.bf16.msra.mxu0 %v5716_v23 }
 0xa2f   :  { %4359 = vmatprep.subr.bf16.mxu1 %v5671_v59  ;;  %4391 = vmatprep.subr.bf16.mxu0 %v5719_v24 }
 0xa32   :  { %4361 = vmatpush1.bf16.msra.mxu1 %v5674_v39  ;;  %4393 = vmatpush1.bf16.msra.mxu0 %v5722_v53 }
 0xa33   :  { %4363 = vmatprep.subr.bf16.mxu1 %v5677_v46  ;;  %4395 = vmatprep.subr.bf16.mxu0 %v5725_v6 }
 0xa36   :  { %4365 = vmatpush1.bf16.msra.mxu1 %v5680_v25  ;;  %4397 = vmatpush1.bf16.msra.mxu0 %v5728_v12 }
 0xa37   :  { %4367 = vmatprep.subr.bf16.mxu1 %v5683_v11  ;;  %4399 = vmatprep.subr.bf16.mxu0 %v5731_v21 }
 0xa3a   :  { %4369 = vmatpush1.bf16.msra.mxu1 %v5686_v9  ;;  %4401 = vmatpush1.bf16.msra.mxu0 %v5734_v44 }
 0xa3b   :  { %4371 = vmatprep.subr.bf16.mxu1 %v5689_v18  ;;  %4403 = vmatprep.subr.bf16.mxu0 %v5737_v54 }
 0xa3e   :  { %4373 = vmatpush1.bf16.msra.mxu1 %v5741_v47  ;;  %4405 = vmatpush1.bf16.msra.mxu0 %v5743_v10 }
 0xa3f   :  { %4407 = vmatprep.subr.bf16.mxu1 %v5645_v19  ;;  %4439 = vmatprep.subr.bf16.mxu0 %v5647_v32 }
 0xaf4   :  { %v2224_v38 = vpop.f32.mrb[18].mxu1  ;;  %v2295_v15 = vpop.f32.mrb[20].mxu0 }
 0xaf5   :  { %v2225_v28 = vadd.f32 %v2224_v38, %v5785_v29  ;;  %v2226_v37 = vpop.f32.mrb[19].mxu1  ;;  %v2297_v41 = vpop.f32.mrb[21].mxu0  ;;  %v2296_v5 = vadd.f32 %v2295_v15, %v5795_v8 }
 0xaf6   :  { %v2227_v49 = vadd.f32 %v2226_v37, %v5789_v33  ;;  %v2298_v7 = vadd.f32 %v2297_v41, %v5799_v2 }
 0xaf7   :  { %v3537_v60 = vmul.f32 -1.442695, %v2225_v28  ;;  %v3539_v26 = vmul.f32 -1.442695, %v2296_v5 }
 0xaf8   :  { %v3538_v1 = vmul.f32 -1.442695, %v2227_v49 }
 0xaf9   :  { %4975 = vpow2.f32 %v3537_v60 }
 0xafa   :  { %4977 = vpow2.f32 %v3538_v1 }
 0xafb   :  { %4979 = vtanh.f32 %v2298_v7 }
 0xafc   :  { %4981 = vpow2.f32 %v3539_v26 }
 0xb03   :  { %v4976_v27 = vpop.eup %4975 }
 0xb04   :  { %v2309_v34 = vadd.f32 1.0, %v4976_v27  ;;  %v4978_v40 = vpop.eup %4977 }
 0xb05   :  { %v2310_v58 = vadd.f32 1.0, %v4978_v40  ;;  %v4980_v13 = vpop.eup %4979 }
 0xb06   :  { %4983 = vrcp.f32 %v2309_v34  ;;  %v4982_v61 = vpop.eup %4981 }
 0xb07   :  { %4985 = vrcp.f32 %v2310_v58  ;;  %v2311_v31 = vadd.f32 1.0, %v4982_v61 }
 0xb09   :  { %4987 = vrcp.f32 %v2311_v31 }
 0xb10   :  { %v4984_v3 = vpop.eup %4983 }
 0xb11   :  { %v2320_v50 = vmul.f32 %v4984_v3, %v4980_v13  ;;  %v4986_v63 = vpop.eup %4985 }
 0xb12   :  { %v2319_v52 = vmul.f32 %v4986_v63, %v5803_v57 }
 0xb13   :  { %v4988_v16 = vpop.eup %4987 }
 0xb14   :  { %v5849_v42 = vadd.f32 %v2320_v50, %v2319_v52 }
 0xb16   :  { %4989 = vtanh.f32 %v5849_v42 }
 0xb20   :  { %v4990_v38 = vpop.eup %4989 }
 0xb21   :  { %v5852_v15 = vmul.f32 %v4990_v38, %v4988_v16 }
 0xb23   :  { %2390 = vmatmul.mubr.f32.vlgmr.msra.gmra.mrb[20].mxu1 %v5852_v15  ;;  %2461 = vmatmul.mubr.f32.vlgmr.msra.gmra.mrb[22].mxu0 %v5852_v15 }
 0xb24   :  { %4409 = vmatpush1.bf16.msra.mxu1 %v5649_v36  ;;  %4441 = vmatpush1.bf16.msra.mxu0 %v5698_v14 }
 0xb25   :  { %4411 = vmatprep.subr.bf16.mxu1 %v5654_v45  ;;  %4443 = vmatprep.subr.bf16.mxu0 %v5700_v43 }
 0xb26   :  { %2556 = vmatprep.mubr.f32.mxu1 %v5138_v0  ;;  %2627 = vmatprep.mubr.f32.mxu0 %v5138_v0 }
 0xb28   :  { %4413 = vmatpush1.bf16.msra.mxu1 %v5656_v56  ;;  %4445 = vmatpush1.bf16.msra.mxu0 %v5703_v35 }
 0xb29   :  { %4415 = vmatprep.subr.bf16.mxu1 %v5659_v4  ;;  %4447 = vmatprep.subr.bf16.mxu0 %v5707_v55 }
 0xb2c   :  { %4417 = vmatpush1.bf16.msra.mxu1 %v5662_v17  ;;  %4449 = vmatpush1.bf16.msra.mxu0 %v5710_v22 }
 0xb2d   :  { %4419 = vmatprep.subr.bf16.mxu1 %v5665_v30  ;;  %4451 = vmatprep.subr.bf16.mxu0 %v5713_v51 }
 0xb30   :  { %4421 = vmatpush1.bf16.msra.mxu1 %v5668_v48  ;;  %4453 = vmatpush1.bf16.msra.mxu0 %v5716_v23 }
 0xb31   :  { %4423 = vmatprep.subr.bf16.mxu1 %v5671_v59  ;;  %4455 = vmatprep.subr.bf16.mxu0 %v5719_v24 }
 0xb34   :  { %4425 = vmatpush1.bf16.msra.mxu1 %v5674_v39  ;;  %4457 = vmatpush1.bf16.msra.mxu0 %v5722_v53 }
 0xb35   :  { %4427 = vmatprep.subr.bf16.mxu1 %v5677_v46  ;;  %4459 = vmatprep.subr.bf16.mxu0 %v5725_v6 }
 0xb38   :  { %4429 = vmatpush1.bf16.msra.mxu1 %v5680_v25  ;;  %4461 = vmatpush1.bf16.msra.mxu0 %v5728_v12 }
 0xb39   :  { %4431 = vmatprep.subr.bf16.mxu1 %v5683_v11  ;;  %4463 = vmatprep.subr.bf16.mxu0 %v5731_v21 }
 0xb3c   :  { %4433 = vmatpush1.bf16.msra.mxu1 %v5686_v9  ;;  %4465 = vmatpush1.bf16.msra.mxu0 %v5734_v44 }
 0xb3d   :  { %4435 = vmatprep.subr.bf16.mxu1 %v5689_v18  ;;  %4467 = vmatprep.subr.bf16.mxu0 %v5737_v54 }
 0xb40   :  { %4437 = vmatpush1.bf16.msra.mxu1 %v5741_v47  ;;  %4469 = vmatpush1.bf16.msra.mxu0 %v5743_v10 }
 0xb41   :  { %4471 = vmatprep.subr.bf16.mxu1 %v5645_v19  ;;  %4503 = vmatprep.subr.bf16.mxu0 %v5647_v32 }
 0xbf6   :  { %v2391_v57 = vpop.f32.mrb[20].mxu1  ;;  %v2462_v28 = vpop.f32.mrb[22].mxu0 }
 0xbf7   :  { %v2392_v37 = vadd.f32 %v2391_v57, %v5785_v29  ;;  %v2393_v41 = vpop.f32.mrb[21].mxu1  ;;  %v2464_v49 = vpop.f32.mrb[23].mxu0  ;;  %v2463_v7 = vadd.f32 %v2462_v28, %v5795_v8 }
 0xbf8   :  { %v2394_v60 = vadd.f32 %v2393_v41, %v5789_v33  ;;  %v2465_v26 = vadd.f32 %v2464_v49, %v5799_v2 }
 0xbf9   :  { %v3540_v1 = vmul.f32 -1.442695, %v2392_v37  ;;  %v3542_v27 = vmul.f32 -1.442695, %v2463_v7 }
 0xbfa   :  { %v3541_v5 = vmul.f32 -1.442695, %v2394_v60 }
 0xbfb   :  { %4991 = vpow2.f32 %v3540_v1 }
 0xbfc   :  { %4993 = vpow2.f32 %v3541_v5 }
 0xbfd   :  { %4995 = vtanh.f32 %v2465_v26 }
 0xbfe   :  { %4997 = vpow2.f32 %v3542_v27 }
 0xc05   :  { %v4992_v34 = vpop.eup %4991 }
 0xc06   :  { %v2476_v40 = vadd.f32 1.0, %v4992_v34  ;;  %v4994_v58 = vpop.eup %4993 }
 0xc07   :  { %v2477_v13 = vadd.f32 1.0, %v4994_v58  ;;  %v4996_v61 = vpop.eup %4995 }
 0xc08   :  { %4999 = vrcp.f32 %v2476_v40  ;;  %v4998_v3 = vpop.eup %4997 }
 0xc09   :  { %5001 = vrcp.f32 %v2477_v13  ;;  %v2478_v52 = vadd.f32 1.0, %v4998_v3 }
 0xc0b   :  { %5003 = vrcp.f32 %v2478_v52 }
 0xc12   :  { %v5000_v50 = vpop.eup %4999 }
 0xc13   :  { %v2487_v63 = vmul.f32 %v5000_v50, %v4996_v61  ;;  %v5002_v31 = vpop.eup %5001 }
 0xc14   :  { %v2486_v16 = vmul.f32 %v5002_v31, %v5849_v42 }
 0xc15   :  { %v5004_v57 = vpop.eup %5003 }
 0xc16   :  { %v5895_v38 = vadd.f32 %v2487_v63, %v2486_v16 }
 0xc18   :  { %5005 = vtanh.f32 %v5895_v38 }
 0xc22   :  { %v5006_v28 = vpop.eup %5005 }
 0xc23   :  { %v5898_v37 = vmul.f32 %v5006_v28, %v5004_v57 }
 0xc25   :  { %2557 = vmatmul.mubr.f32.vlgmr.msra.gmra.mrb[22].mxu1 %v5898_v37  ;;  %2628 = vmatmul.mubr.f32.vlgmr.msra.gmra.mrb[24].mxu0 %v5898_v37 }
 0xc26   :  { %4473 = vmatpush1.bf16.msra.mxu1 %v5649_v36  ;;  %4505 = vmatpush1.bf16.msra.mxu0 %v5698_v14 }
 0xc27   :  { %4475 = vmatprep.subr.bf16.mxu1 %v5654_v45  ;;  %4507 = vmatprep.subr.bf16.mxu0 %v5700_v43 }
 0xc28   :  { %2723 = vmatprep.mubr.f32.mxu1 %v5138_v0  ;;  %2794 = vmatprep.mubr.f32.mxu0 %v5138_v0 }
 0xc2a   :  { %4477 = vmatpush1.bf16.msra.mxu1 %v5656_v56  ;;  %4509 = vmatpush1.bf16.msra.mxu0 %v5703_v35 }
 0xc2b   :  { %4479 = vmatprep.subr.bf16.mxu1 %v5659_v4  ;;  %4511 = vmatprep.subr.bf16.mxu0 %v5707_v55 }
 0xc2e   :  { %4481 = vmatpush1.bf16.msra.mxu1 %v5662_v17  ;;  %4513 = vmatpush1.bf16.msra.mxu0 %v5710_v22 }
 0xc2f   :  { %4483 = vmatprep.subr.bf16.mxu1 %v5665_v30  ;;  %4515 = vmatprep.subr.bf16.mxu0 %v5713_v51 }
 0xc32   :  { %4485 = vmatpush1.bf16.msra.mxu1 %v5668_v48  ;;  %4517 = vmatpush1.bf16.msra.mxu0 %v5716_v23 }
 0xc33   :  { %4487 = vmatprep.subr.bf16.mxu1 %v5671_v59  ;;  %4519 = vmatprep.subr.bf16.mxu0 %v5719_v24 }
 0xc36   :  { %4489 = vmatpush1.bf16.msra.mxu1 %v5674_v39  ;;  %4521 = vmatpush1.bf16.msra.mxu0 %v5722_v53 }
 0xc37   :  { %4491 = vmatprep.subr.bf16.mxu1 %v5677_v46  ;;  %4523 = vmatprep.subr.bf16.mxu0 %v5725_v6 }
 0xc3a   :  { %4493 = vmatpush1.bf16.msra.mxu1 %v5680_v25  ;;  %4525 = vmatpush1.bf16.msra.mxu0 %v5728_v12 }
 0xc3b   :  { %4495 = vmatprep.subr.bf16.mxu1 %v5683_v11  ;;  %4527 = vmatprep.subr.bf16.mxu0 %v5731_v21 }
 0xc3e   :  { %4497 = vmatpush1.bf16.msra.mxu1 %v5686_v9  ;;  %4529 = vmatpush1.bf16.msra.mxu0 %v5734_v44 }
 0xc3f   :  { %4499 = vmatprep.subr.bf16.mxu1 %v5689_v18  ;;  %4531 = vmatprep.subr.bf16.mxu0 %v5737_v54 }
 0xc42   :  { %4501 = vmatpush1.bf16.msra.mxu1 %v5741_v47  ;;  %4533 = vmatpush1.bf16.msra.mxu0 %v5743_v10 }
 0xc43   :  { %4535 = vmatprep.subr.bf16.mxu1 %v5645_v19  ;;  %4567 = vmatprep.subr.bf16.mxu0 %v5647_v32 }
 0xcf8   :  { %v2558_v42 = vpop.f32.mrb[22].mxu1  ;;  %v2629_v41 = vpop.f32.mrb[24].mxu0 }
 0xcf9   :  { %v2559_v49 = vadd.f32 %v2558_v42, %v5785_v29  ;;  %v2560_v60 = vpop.f32.mrb[23].mxu1  ;;  %v2631_v1 = vpop.f32.mrb[25].mxu0  ;;  %v2630_v27 = vadd.f32 %v2629_v41, %v5795_v8 }
 0xcfa   :  { %v2561_v5 = vadd.f32 %v2560_v60, %v5789_v33  ;;  %v2632_v34 = vadd.f32 %v2631_v1, %v5799_v2 }
 0xcfb   :  { %v3543_v7 = vmul.f32 -1.442695, %v2559_v49  ;;  %v3545_v40 = vmul.f32 -1.442695, %v2630_v27 }
 0xcfc   :  { %v3544_v26 = vmul.f32 -1.442695, %v2561_v5 }
 0xcfd   :  { %5007 = vpow2.f32 %v3543_v7 }
 0xcfe   :  { %5009 = vpow2.f32 %v3544_v26 }
 0xcff   :  { %5011 = vtanh.f32 %v2632_v34 }
 0xd00   :  { %5013 = vpow2.f32 %v3545_v40 }
 0xd07   :  { %v5008_v58 = vpop.eup %5007 }
 0xd08   :  { %v2643_v13 = vadd.f32 1.0, %v5008_v58  ;;  %v5010_v61 = vpop.eup %5009 }
 0xd09   :  { %v2644_v3 = vadd.f32 1.0, %v5010_v61  ;;  %v5012_v50 = vpop.eup %5011 }
 0xd0a   :  { %5015 = vrcp.f32 %v2643_v13  ;;  %v5014_v63 = vpop.eup %5013 }
 0xd0b   :  { %5017 = vrcp.f32 %v2644_v3  ;;  %v2645_v57 = vadd.f32 1.0, %v5014_v63 }
 0xd0d   :  { %5019 = vrcp.f32 %v2645_v57 }
 0xd14   :  { %v5016_v31 = vpop.eup %5015 }
 0xd15   :  { %v2654_v52 = vmul.f32 %v5016_v31, %v5012_v50  ;;  %v5018_v16 = vpop.eup %5017 }
 0xd16   :  { %v2653_v28 = vmul.f32 %v5018_v16, %v5895_v38 }
 0xd17   :  { %v5020_v41 = vpop.eup %5019 }
 0xd18   :  { %v5941_v42 = vadd.f32 %v2654_v52, %v2653_v28 }
 0xd1a   :  { %5021 = vtanh.f32 %v5941_v42 }
 0xd24   :  { %v5022_v49 = vpop.eup %5021 }
 0xd25   :  { %v5944_v60 = vmul.f32 %v5022_v49, %v5020_v41 }
 0xd27   :  { %2724 = vmatmul.mubr.f32.vlgmr.msra.gmra.mrb[24].mxu1 %v5944_v60  ;;  %2795 = vmatmul.mubr.f32.vlgmr.msra.gmra.mrb[26].mxu0 %v5944_v60 }
 0xd28   :  { %4537 = vmatpush1.bf16.msra.mxu1 %v5649_v36  ;;  %4569 = vmatpush1.bf16.msra.mxu0 %v5698_v14 }
 0xd29   :  { %4539 = vmatprep.subr.bf16.mxu1 %v5654_v45  ;;  %4571 = vmatprep.subr.bf16.mxu0 %v5700_v43 }
 0xd2a   :  { %2890 = vmatprep.mubr.f32.mxu1 %v5138_v0  ;;  %2961 = vmatprep.mubr.f32.mxu0 %v5138_v0 }
 0xd2c   :  { %4541 = vmatpush1.bf16.msra.mxu1 %v5656_v56  ;;  %4573 = vmatpush1.bf16.msra.mxu0 %v5703_v35 }
 0xd2d   :  { %4543 = vmatprep.subr.bf16.mxu1 %v5659_v4  ;;  %4575 = vmatprep.subr.bf16.mxu0 %v5707_v55 }
 0xd30   :  { %4545 = vmatpush1.bf16.msra.mxu1 %v5662_v17  ;;  %4577 = vmatpush1.bf16.msra.mxu0 %v5710_v22 }
 0xd31   :  { %4547 = vmatprep.subr.bf16.mxu1 %v5665_v30  ;;  %4579 = vmatprep.subr.bf16.mxu0 %v5713_v51 }
 0xd34   :  { %4549 = vmatpush1.bf16.msra.mxu1 %v5668_v48  ;;  %4581 = vmatpush1.bf16.msra.mxu0 %v5716_v23 }
 0xd35   :  { %4551 = vmatprep.subr.bf16.mxu1 %v5671_v59  ;;  %4583 = vmatprep.subr.bf16.mxu0 %v5719_v24 }
 0xd38   :  { %4553 = vmatpush1.bf16.msra.mxu1 %v5674_v39  ;;  %4585 = vmatpush1.bf16.msra.mxu0 %v5722_v53 }
 0xd39   :  { %4555 = vmatprep.subr.bf16.mxu1 %v5677_v46  ;;  %4587 = vmatprep.subr.bf16.mxu0 %v5725_v6 }
 0xd3c   :  { %4557 = vmatpush1.bf16.msra.mxu1 %v5680_v25  ;;  %4589 = vmatpush1.bf16.msra.mxu0 %v5728_v12 }
 0xd3d   :  { %4559 = vmatprep.subr.bf16.mxu1 %v5683_v11  ;;  %4591 = vmatprep.subr.bf16.mxu0 %v5731_v21 }
 0xd40   :  { %4561 = vmatpush1.bf16.msra.mxu1 %v5686_v9  ;;  %4593 = vmatpush1.bf16.msra.mxu0 %v5734_v44 }
 0xd41   :  { %4563 = vmatprep.subr.bf16.mxu1 %v5689_v18  ;;  %4595 = vmatprep.subr.bf16.mxu0 %v5737_v54 }
 0xd44   :  { %4565 = vmatpush1.bf16.msra.mxu1 %v5741_v47  ;;  %4597 = vmatpush1.bf16.msra.mxu0 %v5743_v10 }
 0xd45   :  { %4599 = vmatprep.subr.bf16.mxu1 %v5645_v19  ;;  %4631 = vmatprep.subr.bf16.mxu0 %v5647_v32 }
 0xdfa   :  { %v2725_v38 = vpop.f32.mrb[24].mxu1  ;;  %v2796_v1 = vpop.f32.mrb[26].mxu0 }
 0xdfb   :  { %v2726_v5 = vadd.f32 %v2725_v38, %v5785_v29  ;;  %v2727_v7 = vpop.f32.mrb[25].mxu1  ;;  %v2798_v26 = vpop.f32.mrb[27].mxu0  ;;  %v2797_v58 = vadd.f32 %v2796_v1, %v5795_v8 }
 0xdfc   :  { %v2728_v27 = vadd.f32 %v2727_v7, %v5789_v33  ;;  %v2799_v13 = vadd.f32 %v2798_v26, %v5799_v2 }
 0xdfd   :  { %v3546_v34 = vmul.f32 -1.442695, %v2726_v5  ;;  %v3548_v61 = vmul.f32 -1.442695, %v2797_v58 }
 0xdfe   :  { %v3547_v40 = vmul.f32 -1.442695, %v2728_v27 }
 0xdff   :  { %5023 = vpow2.f32 %v3546_v34 }
 0xe00   :  { %5025 = vpow2.f32 %v3547_v40 }
 0xe01   :  { %5027 = vtanh.f32 %v2799_v13 }
 0xe02   :  { %5029 = vpow2.f32 %v3548_v61 }
 0xe09   :  { %v5024_v3 = vpop.eup %5023 }
 0xe0a   :  { %v2810_v50 = vadd.f32 1.0, %v5024_v3  ;;  %v5026_v63 = vpop.eup %5025 }
 0xe0b   :  { %v2811_v31 = vadd.f32 1.0, %v5026_v63  ;;  %v5028_v52 = vpop.eup %5027 }
 0xe0c   :  { %5031 = vrcp.f32 %v2810_v50  ;;  %v5030_v16 = vpop.eup %5029 }
 0xe0d   :  { %5033 = vrcp.f32 %v2811_v31  ;;  %v2812_v49 = vadd.f32 1.0, %v5030_v16 }
 0xe0f   :  { %5035 = vrcp.f32 %v2812_v49 }
 0xe16   :  { %v5032_v57 = vpop.eup %5031 }
 0xe17   :  { %v2821_v28 = vmul.f32 %v5032_v57, %v5028_v52  ;;  %v5034_v41 = vpop.eup %5033 }
 0xe18   :  { %v2820_v38 = vmul.f32 %v5034_v41, %v5941_v42 }
 0xe19   :  { %v5036_v5 = vpop.eup %5035 }
 0xe1a   :  { %v5987_v1 = vadd.f32 %v2821_v28, %v2820_v38 }
 0xe1c   :  { %5037 = vtanh.f32 %v5987_v1 }
 0xe26   :  { %v5038_v7 = vpop.eup %5037 }
 0xe27   :  { %v5990_v26 = vmul.f32 %v5038_v7, %v5036_v5 }
 0xe29   :  { %2891 = vmatmul.mubr.f32.vlgmr.msra.gmra.mrb[26].mxu1 %v5990_v26  ;;  %2962 = vmatmul.mubr.f32.vlgmr.msra.gmra.mrb[28].mxu0 %v5990_v26 }
 0xe2a   :  { %4601 = vmatpush1.bf16.msra.mxu1 %v5649_v36  ;;  %4633 = vmatpush1.bf16.msra.mxu0 %v5698_v14 }
 0xe2b   :  { %4603 = vmatprep.subr.bf16.mxu1 %v5654_v45  ;;  %4635 = vmatprep.subr.bf16.mxu0 %v5700_v43 }
 0xe2c   :  { %3057 = vmatprep.mubr.f32.mxu1 %v5138_v0  ;;  %3128 = vmatprep.mubr.f32.mxu0 %v5138_v0 }
 0xe2e   :  { %4605 = vmatpush1.bf16.msra.mxu1 %v5656_v56  ;;  %4637 = vmatpush1.bf16.msra.mxu0 %v5703_v35 }
 0xe2f   :  { %4607 = vmatprep.subr.bf16.mxu1 %v5659_v4  ;;  %4639 = vmatprep.subr.bf16.mxu0 %v5707_v55 }
 0xe32   :  { %4609 = vmatpush1.bf16.msra.mxu1 %v5662_v17  ;;  %4641 = vmatpush1.bf16.msra.mxu0 %v5710_v22 }
 0xe33   :  { %4611 = vmatprep.subr.bf16.mxu1 %v5665_v30  ;;  %4643 = vmatprep.subr.bf16.mxu0 %v5713_v51 }
 0xe36   :  { %4613 = vmatpush1.bf16.msra.mxu1 %v5668_v48  ;;  %4645 = vmatpush1.bf16.msra.mxu0 %v5716_v23 }
 0xe37   :  { %4615 = vmatprep.subr.bf16.mxu1 %v5671_v59  ;;  %4647 = vmatprep.subr.bf16.mxu0 %v5719_v24 }
 0xe3a   :  { %4617 = vmatpush1.bf16.msra.mxu1 %v5674_v39  ;;  %4649 = vmatpush1.bf16.msra.mxu0 %v5722_v53 }
 0xe3b   :  { %4619 = vmatprep.subr.bf16.mxu1 %v5677_v46  ;;  %4651 = vmatprep.subr.bf16.mxu0 %v5725_v6 }
 0xe3e   :  { %4621 = vmatpush1.bf16.msra.mxu1 %v5680_v25  ;;  %4653 = vmatpush1.bf16.msra.mxu0 %v5728_v12 }
 0xe3f   :  { %4623 = vmatprep.subr.bf16.mxu1 %v5683_v11  ;;  %4655 = vmatprep.subr.bf16.mxu0 %v5731_v21 }
 0xe42   :  { %4625 = vmatpush1.bf16.msra.mxu1 %v5686_v9  ;;  %4657 = vmatpush1.bf16.msra.mxu0 %v5734_v44 }
 0xe43   :  { %4627 = vmatprep.subr.bf16.mxu1 %v5689_v18  ;;  %4659 = vmatprep.subr.bf16.mxu0 %v5737_v54 }
 0xe46   :  { %4629 = vmatpush1.bf16.msra.mxu1 %v5741_v47  ;;  %4661 = vmatpush1.bf16.msra.mxu0 %v5743_v10 }
 0xe47   :  { %4663 = vmatprep.subr.bf16.mxu1 %v5645_v19  ;;  %4695 = vmatprep.subr.bf16.mxu0 %v5647_v32 }
 0xefc   :  { %v2892_v42 = vpop.f32.mrb[26].mxu1  ;;  %v2963_v27 = vpop.f32.mrb[28].mxu0 }
 0xefd   :  { %v2893_v34 = vadd.f32 %v2892_v42, %v5785_v29  ;;  %v2894_v40 = vpop.f32.mrb[27].mxu1  ;;  %v2965_v58 = vpop.f32.mrb[29].mxu0  ;;  %v2964_v50 = vadd.f32 %v2963_v27, %v5795_v8 }
 0xefe   :  { %v2895_v13 = vadd.f32 %v2894_v40, %v5789_v33  ;;  %v2966_v63 = vadd.f32 %v2965_v58, %v5799_v2  ;;  %v184_v58 = vld [vmem:[#allocation4 + $0x4c8] sm:$0xff] }
 0xeff   :  { %v3549_v61 = vmul.f32 -1.442695, %v2893_v34  ;;  %v3551_v31 = vmul.f32 -1.442695, %v2964_v50  ;;  %v187_v50 = vld [vmem:[#allocation4 + $0x528] sm:$0xff] }
 0xf00   :  { %v3550_v3 = vmul.f32 -1.442695, %v2895_v13  ;;  %v185_v13 = vld [vmem:[#allocation4 + $0x4e8] sm:$0xff] }
 0xf01   :  { %5039 = vpow2.f32 %v3549_v61  ;;  %v4734_v61 = vpack.c.bf16 %v185_v13, %v184_v58 }
 0xf02   :  { %5041 = vpow2.f32 %v3550_v3  ;;  %v186_v3 = vld [vmem:[#allocation4 + $0x508] sm:$0xff] }
 0xf03   :  { %5043 = vtanh.f32 %v2966_v63  ;;  %v4738_v63 = vpack.c.bf16 %v187_v50, %v186_v3 }
 0xf04   :  { %5045 = vpow2.f32 %v3551_v31  ;;  %v188_v31 = vld [vmem:[#allocation4 + $0x548] sm:$0xff] }
 0xf0b   :  { %v5040_v19 = vpop.eup %5039 }
 0xf0c   :  { %v2977_v52 = vadd.f32 1.0, %v5040_v19  ;;  %v5042_v32 = vpop.eup %5041  ;;  %v189_v19 = vld [vmem:[#allocation4 + $0x568] sm:$0xff] }
 0xf0d   :  { %v2978_v16 = vadd.f32 1.0, %v5042_v32  ;;  %v5044_v57 = vpop.eup %5043  ;;  %v190_v32 = vld [vmem:[#allocation4 + $0x588] sm:$0xff] }
 0xf0e   :  { %5047 = vrcp.f32 %v2977_v52  ;;  %v5046_v28 = vpop.eup %5045  ;;  %v4742_v52 = vpack.c.bf16 %v189_v19, %v188_v31 }
 0xf0f   :  { %5049 = vrcp.f32 %v2978_v16  ;;  %v2979_v5 = vadd.f32 1.0, %v5046_v28  ;;  %v191_v16 = vld [vmem:[#allocation4 + $0x5a8] sm:$0xff] }
 0xf10   :  { %v192_v28 = vld [vmem:[#allocation4 + $0x5c8] sm:$0xff] }
 0xf11   :  { %5051 = vrcp.f32 %v2979_v5 }
 0xf18   :  { %v5048_v41 = vpop.eup %5047 }
 0xf19   :  { %v2988_v49 = vmul.f32 %v5048_v41, %v5044_v57  ;;  %v5050_v38 = vpop.eup %5049  ;;  %v4746_v57 = vpack.c.bf16 %v191_v16, %v190_v32  ;;  %v193_v41 = vld [vmem:[#allocation4 + $0x5e8] sm:$0xff] }
 0xf1a   :  { %v2987_v7 = vmul.f32 %v5050_v38, %v5987_v1  ;;  %v195_v38 = vld [vmem:[#allocation4 + $0x628] sm:$0xff] }
 0xf1b   :  { %v5052_v27 = vpop.eup %5051 }
 0xf1c   :  { %v6033_v42 = vadd.f32 %v2988_v49, %v2987_v7  ;;  %v194_v49 = vld [vmem:[#allocation4 + $0x608] sm:$0xff] }
 0xf1d   :  { %v4754_v5 = vpack.c.bf16 %v195_v38, %v194_v49 }
 0xf1e   :  { %5053 = vtanh.f32 %v6033_v42 }
 0xf28   :  { %v5054_v34 = vpop.eup %5053 }
 0xf29   :  { %v6036_v40 = vmul.f32 %v5054_v34, %v5052_v27 }
 0xf2b   :  { %3058 = vmatmul.mubr.f32.vlgmr.msra.gmra.mrb[28].mxu1 %v6036_v40  ;;  %3129 = vmatmul.mubr.f32.vlgmr.msra.gmra.mrb[30].mxu0 %v6036_v40 }
 0xf2c   :  { %4665 = vmatpush1.bf16.msra.mxu1 %v5649_v36  ;;  %4697 = vmatpush1.bf16.msra.mxu0 %v5698_v14  ;;  %v181_v36 = vld [vmem:[#allocation4 + $0x468] sm:$0xff] }
 0xf2d   :  { %4667 = vmatprep.subr.bf16.mxu1 %v5654_v45  ;;  %4699 = vmatprep.subr.bf16.mxu0 %v5700_v43 }
 0xf2e   :  { %3224 = vmatprep.mubr.f32.mxu1 %v5138_v0  ;;  %3295 = vmatprep.mubr.f32.mxu0 %v5138_v0  ;;  %v180_v0 = vld [vmem:[#allocation4 + $0x448] sm:$0xff] }
 0xf2f   :  { %v4726_v45 = vpack.c.bf16 %v181_v36, %v180_v0 }
 0xf30   :  { %4669 = vmatpush1.bf16.msra.mxu1 %v5656_v56  ;;  %4701 = vmatpush1.bf16.msra.mxu0 %v5703_v35 }
 0xf31   :  { %4671 = vmatprep.subr.bf16.mxu1 %v5659_v4  ;;  %4703 = vmatprep.subr.bf16.mxu0 %v5707_v55 }
 0xf34   :  { %4673 = vmatpush1.bf16.msra.mxu1 %v5662_v17  ;;  %4705 = vmatpush1.bf16.msra.mxu0 %v5710_v22 }
 0xf35   :  { %4675 = vmatprep.subr.bf16.mxu1 %v5665_v30  ;;  %4707 = vmatprep.subr.bf16.mxu0 %v5713_v51 }
 0xf38   :  { %4677 = vmatpush1.bf16.msra.mxu1 %v5668_v48  ;;  %4709 = vmatpush1.bf16.msra.mxu0 %v5716_v23 }
 0xf39   :  { %4679 = vmatprep.subr.bf16.mxu1 %v5671_v59  ;;  %4711 = vmatprep.subr.bf16.mxu0 %v5719_v24 }
 0xf3c   :  { %4681 = vmatpush1.bf16.msra.mxu1 %v5674_v39  ;;  %4713 = vmatpush1.bf16.msra.mxu0 %v5722_v53 }
 0xf3d   :  { %4683 = vmatprep.subr.bf16.mxu1 %v5677_v46  ;;  %4715 = vmatprep.subr.bf16.mxu0 %v5725_v6 }
 0xf40   :  { %4685 = vmatpush1.bf16.msra.mxu1 %v5680_v25  ;;  %4717 = vmatpush1.bf16.msra.mxu0 %v5728_v12 }
 0xf41   :  { %4687 = vmatprep.subr.bf16.mxu1 %v5683_v11  ;;  %4719 = vmatprep.subr.bf16.mxu0 %v5731_v21  ;;  %v182_v21 = vld [vmem:[#allocation4 + $0x488] sm:$0xff] }
 0xf44   :  { %4689 = vmatpush1.bf16.msra.mxu1 %v5686_v9  ;;  %4721 = vmatpush1.bf16.msra.mxu0 %v5734_v44  ;;  %v183_v44 = vld [vmem:[#allocation4 + $0x4a8] sm:$0xff] }
 0xf45   :  { %4691 = vmatprep.subr.bf16.mxu1 %v5689_v18  ;;  %4723 = vmatprep.subr.bf16.mxu0 %v5737_v54  ;;  %v4730_v1 = vpack.c.bf16 %v183_v44, %v182_v21 }
 0xf48   :  { %4693 = vmatpush1.bf16.msra.mxu1 %v5741_v47  ;;  %4725 = vmatpush1.bf16.msra.mxu0 %v5743_v10 }
 0xf49   :  { %4727 = vmatprep.subr.bf16.mxu1 %v4726_v45 }
 0xffe   :  { %v3059_v56 = vpop.f32.mrb[28].mxu1  ;;  %v3130_v4 = vpop.f32.mrb[30].mxu0 }
 0xfff   :  { %v3060_v17 = vadd.f32 %v3059_v56, %v5785_v29  ;;  %v3061_v30 = vpop.f32.mrb[29].mxu1  ;;  %v3132_v48 = vpop.f32.mrb[31].mxu0  ;;  %v3131_v25 = vadd.f32 %v3130_v4, %v5795_v8 }
0x1000   :  { %v3062_v59 = vadd.f32 %v3061_v30, %v5789_v33  ;;  %v3133_v11 = vadd.f32 %v3132_v48, %v5799_v2 }
0x1001   :  { %v3552_v39 = vmul.f32 -1.442695, %v3060_v17  ;;  %v3554_v9 = vmul.f32 -1.442695, %v3131_v25 }
0x1002   :  { %v3553_v46 = vmul.f32 -1.442695, %v3062_v59  ;;  %v3441_v59 = vand.u32 127, %v205_v62 }
0x1003   :  { %5055 = vpow2.f32 %v3552_v39 }
0x1004   :  { %5057 = vpow2.f32 %v3553_v46  ;;  %vm3442_vm2 = vcmp.ge.s32.totalorder %v3441_v59, 3  ;;  %vm3443_vm3 = vcmp.lt.s32.totalorder %v3441_v59, 6 }
0x1005   :  { %5059 = vtanh.f32 %v3133_v11  ;;  %vm6092_vm4 = vmand %vm3442_vm2, %vm3443_vm3 }
0x1006   :  { %5061 = vpow2.f32 %v3554_v9 }
0x100d   :  { %v5056_v18 = vpop.eup %5055 }
0x100e   :  { %v3144_v14 = vadd.f32 1.0, %v5056_v18  ;;  %v5058_v43 = vpop.eup %5057 }
0x100f   :  { %v3145_v35 = vadd.f32 1.0, %v5058_v43  ;;  %v5060_v55 = vpop.eup %5059 }
0x1010   :  { %5063 = vrcp.f32 %v3144_v14  ;;  %v5062_v22 = vpop.eup %5061 }
0x1011   :  { %5065 = vrcp.f32 %v3145_v35  ;;  %v3146_v53 = vadd.f32 1.0, %v5062_v22 }
0x1013   :  { %5067 = vrcp.f32 %v3146_v53 }
0x101a   :  { %v5064_v51 = vpop.eup %5063 }
0x101b   :  { %v3155_v23 = vmul.f32 %v5064_v51, %v5060_v55  ;;  %v5066_v24 = vpop.eup %5065 }
0x101c   :  { %v3154_v6 = vmul.f32 %v5066_v24, %v6033_v42 }
0x101d   :  { %v5068_v54 = vpop.eup %5067 }
0x101e   :  { %v6077_v12 = vadd.f32 %v3155_v23, %v3154_v6 }
0x1020   :  { %5069 = vtanh.f32 %v6077_v12 }
0x102a   :  { %v5070_v47 = vpop.eup %5069 }
0x102b   :  { %v3158_v10 = vmul.f32 %v5070_v47, %v5068_v54 }
0x102d   :  { %3225 = vmatmul.mubr.f32.vlgmr.msra.gmra.mrb[30].mxu1 %v3158_v10  ;;  %3296 = vmatmul.mubr.f32.vlgmr.msra.gmra.mrb[32].mxu0 %v3158_v10 }
0x102e   :  { %4729 = vmatpush3.bf16.msra.mxu1 %v4726_v45  ;;  %3666 = vmatprep.mubr.f32.mxu1 %v5806_v20  ;;  %v4750_v20 = vpack.c.bf16 %v193_v41, %v192_v28 }
0x102f   :  { %4731 = vmatprep.subr.bf16.mxu1 %v4730_v1 }
0x1032   :  { %4733 = vmatpush3.bf16.msra.mxu1 %v4730_v1 }
0x1033   :  { %4735 = vmatprep.subr.bf16.mxu1 %v4734_v61 }
0x1036   :  { %4737 = vmatpush3.bf16.msra.mxu1 %v4734_v61 }
0x1037   :  { %4739 = vmatprep.subr.bf16.mxu1 %v4738_v63 }
0x103a   :  { %4741 = vmatpush3.bf16.msra.mxu1 %v4738_v63 }
0x103b   :  { %4743 = vmatprep.subr.bf16.mxu1 %v4742_v52 }
0x103e   :  { %4745 = vmatpush3.bf16.msra.mxu1 %v4742_v52 }
0x103f   :  { %4747 = vmatprep.subr.bf16.mxu1 %v4746_v57 }
0x1042   :  { %4749 = vmatpush3.bf16.msra.mxu1 %v4746_v57 }
0x1043   :  { %4751 = vmatprep.subr.bf16.mxu1 %v4750_v20 }
0x1046   :  { %4753 = vmatpush3.bf16.msra.mxu1 %v4750_v20 }
0x1047   :  { %4755 = vmatprep.subr.bf16.mxu1 %v4754_v5 }
0x104a   :  { %4757 = vmatpush3.bf16.msra.mxu1 %v4754_v5 }
0x104d   :  { %3667 = vmatmul.mubr.f32.vlgmr.msra.gmra.mrb[32].mxu1 %v5852_v15 }
0x104e   :  { %3669 = vmatprep.mubr.f32.mxu1 %v5898_v37 }
0x1051   :  { %3670 = vmatmul.mubr.f32.gmra.mrb[34].mxu1 %v5944_v60 }
0x1052   :  { %3672 = vmatprep.mubr.f32.mxu1 %v5990_v26 }
0x1055   :  { %3673 = vmatmul.mubr.f32.gmra.mrb[36].mxu1 %v6036_v40 }
0x1056   :  { %3675 = vmatprep.mubr.f32.mxu1 %v3158_v10 }
0x1100   :  { %v3226_v7 = vpop.f32.mrb[30].mxu1  ;;  %v3297_v42 = vpop.f32.mrb[32].mxu0 }
0x1101   :  { %v3227_v27 = vadd.f32 %v3226_v7, %v5785_v29  ;;  %v3228_v34 = vpop.f32.mrb[31].mxu1  ;;  %v3299_v0 = vpop.f32.mrb[33].mxu0  ;;  %v3298_v15 = vadd.f32 %v3297_v42, %v5795_v8  ;;  %v35_v8 = vld [vmem:[#allocation4 + $0x2a] ss:$0 sm:$0xff] }
0x1102   :  { %v3229_v36 = vadd.f32 %v3228_v34, %v5789_v33  ;;  %v3300_v37 = vadd.f32 %v3299_v0, %v5799_v2 }
0x1103   :  { %v3555_v45 = vmul.f32 -1.442695, %v3227_v27  ;;  %v3557_v60 = vmul.f32 -1.442695, %v3298_v15 }
0x1104   :  { %v3556_v56 = vmul.f32 -1.442695, %v3229_v36 }
0x1105   :  { %5071 = vpow2.f32 %v3555_v45 }
0x1106   :  { %5073 = vpow2.f32 %v3556_v56 }
0x1107   :  { %5075 = vtanh.f32 %v3300_v37 }
0x1108   :  { %5077 = vpow2.f32 %v3557_v60 }
0x110f   :  { %v5072_v26 = vpop.eup %5071 }
0x1110   :  { %v3311_v40 = vadd.f32 1.0, %v5072_v26  ;;  %v5074_v4 = vpop.eup %5073 }
0x1111   :  { %v3312_v29 = vadd.f32 1.0, %v5074_v4  ;;  %v5076_v17 = vpop.eup %5075 }
0x1112   :  { %5079 = vrcp.f32 %v3311_v40  ;;  %v5078_v30 = vpop.eup %5077 }
0x1113   :  { %5081 = vrcp.f32 %v3312_v29  ;;  %v3313_v46 = vadd.f32 1.0, %v5078_v30 }
0x1115   :  { %5083 = vrcp.f32 %v3313_v46 }
0x111c   :  { %v5080_v33 = vpop.eup %5079 }
0x111d   :  { %v3322_v48 = vmul.f32 %v5080_v33, %v5076_v17  ;;  %v5082_v39 = vpop.eup %5081 }
0x111e   :  { %v3321_v2 = vmul.f32 %v5082_v39, %v6077_v12 }
0x111f   :  { %v5084_v50 = vpop.eup %5083 }
0x1120   :  { %v3668_v25 = vpop.f32.mrb[32].mxu1  ;;  %v3323_v11 = vadd.f32 %v3322_v48, %v3321_v2 }
0x1121   :  { %v3407_v9 = vadd.f32 %v3668_v25, %v35_v8  ;;  %v3401_v18 = vpop.f32.mrb[33].mxu1 }
0x1122   :  { %v3402_v14 = vadd.f32 %v3401_v18, %v35_v8  ;;  %5085 = vtanh.f32 %v3323_v11 }
0x1123   :  { %v3446_v43 = vmul.f32 %v3407_v9, %v3407_v9 }
0x1124   :  { %v3445_v62 = vmul.f32 %v3402_v14, %v3402_v14  ;;  %v3671_v55 = vpop.f32.mrb[34].mxu1 }
0x1125   :  { %v3454_v22 = vadd.f32 1e-05, %v3446_v43  ;;  %v3417_v51 = vadd.f32 %v3671_v55, %v35_v8  ;;  %v3411_v23 = vpop.f32.mrb[35].mxu1 }
0x1126   :  { %v3453_v24 = vadd.f32 1e-05, %v3445_v62  ;;  %v3412_v53 = vadd.f32 %v3411_v23, %v35_v8 }
0x1127   :  { %v3462_v6 = vsel %vm6092_vm4, %v3454_v22, %v3407_v9  ;;  %v3448_v12 = vmul.f32 %v3417_v51, %v3417_v51 }
0x1128   :  { %3470 = vst [vmem:[#allocation7 + $0x8] sm:$0xff] %v3462_v6  ;;  %v3461_v21 = vsel %vm6092_vm4, %v3453_v24, %v3402_v14  ;;  %v3447_v44 = vmul.f32 %v3412_v53, %v3412_v53  ;;  %v3674_v54 = vpop.f32.mrb[36].mxu1 }
0x1129   :  { %3469 = vst [vmem:[#allocation7] sm:$0xff] %v3461_v21  ;;  %v3456_v47 = vadd.f32 1e-05, %v3448_v12  ;;  %v3427_v10 = vadd.f32 %v3674_v54, %v35_v8  ;;  %v3421_v1 = vpop.f32.mrb[37].mxu1 }
0x112a   :  { %v3455_v58 = vadd.f32 1e-05, %v3447_v44  ;;  %v3422_v13 = vadd.f32 %v3421_v1, %v35_v8 }
0x112b   :  { %v3464_v61 = vsel %vm6092_vm4, %v3456_v47, %v3417_v51  ;;  %v3450_v3 = vmul.f32 %v3427_v10, %v3427_v10 }
0x112c   :  { %3472 = vst [vmem:[#allocation7 + $0x18] sm:$0xff] %v3464_v61  ;;  %v3463_v63 = vsel %vm6092_vm4, %v3455_v58, %v3412_v53  ;;  %v3449_v31 = vmul.f32 %v3422_v13, %v3422_v13  ;;  %v5086_v19 = vpop.eup %5085 }
0x112d   :  { %3471 = vst [vmem:[#allocation7 + $0x10] sm:$0xff] %v3463_v63  ;;  %v3458_v52 = vadd.f32 1e-05, %v3450_v3  ;;  %v3325_v16 = vmul.f32 %v5086_v19, %v5084_v50 }
0x112e   :  { %v3457_v32 = vadd.f32 1e-05, %v3449_v31 }
0x112f   :  { %v3466_v57 = vsel %vm6092_vm4, %v3458_v52, %v3427_v10  ;;  %3676 = vmatmul.mubr.f32.gmra.mrb[38].mxu1 %v3325_v16 }
0x1130   :  { %3474 = vst [vmem:[#allocation7 + $0x28] sm:$0xff] %v3466_v57  ;;  %v3465_v28 = vsel %vm6092_vm4, %v3457_v32, %v3422_v13 }
0x1131   :  { %3473 = vst [vmem:[#allocation7 + $0x20] sm:$0xff] %v3465_v28 }
0x1202   :  { %v3677_v41 = vpop.f32.mrb[38].mxu1 }
0x1203   :  { %v3437_v20 = vadd.f32 %v3677_v41, %v35_v8  ;;  %v3431_v49 = vpop.f32.mrb[39].mxu1 }
0x1204   :  { %v3432_v38 = vadd.f32 %v3431_v49, %v35_v8 }
0x1205   :  { %v3452_v5 = vmul.f32 %v3437_v20, %v3437_v20 }
0x1206   :  { %v3451_v7 = vmul.f32 %v3432_v38, %v3432_v38 }
0x1207   :  { %v3460_v42 = vadd.f32 1e-05, %v3452_v5 }
0x1208   :  { %v3459_v27 = vadd.f32 1e-05, %v3451_v7 }
0x1209   :  { %v3468_v34 = vsel %vm6092_vm4, %v3460_v42, %v3437_v20 }
0x120a   :  { %3476 = vst [vmem:[#allocation7 + $0x38] sm:$0xff] %v3468_v34  ;;  %v3467_v0 = vsel %vm6092_vm4, %v3459_v27, %v3432_v38 }
0x120b   :  { %3475 = vst [vmem:[#allocation7 + $0x30] sm:$0xff] %v3467_v0 }
0x120c   :  { %5120 = shalt.err (!%p5117_p12)
}
0x120d   :  { %s5121_s14 = scalar_lea.hbm %s6126_s2, 1024 }
0x120e   :  { %p5122_p13 = scmp.ne.s32.totalorder %s6126_s2, %s5121_s14  ;;  %p5125_p0 = scmp.lt.u32.totalorder %s5121_s14, %s6126_s2 }
0x1210   :  { %p5127_p1 = pnand %p5125_p0, %p5122_p13 }
0x1212   :  { %5130 = shalt.err (!%p5127_p1)
}
0x1213   :  { %s5142_s19 = smov 128   ;;  %s5143_s20 = smov 8  }
0x1214   :  { %3488 = dma.vmem_to_hbm [thread:$0]  %s3483_s10, 1024, %s6126_s2, [#allocation6], %s5142_s19, %s5142_s19, %s5143_s20  }
0x1215   :  { %5133 = dma.done.wait [#allocation6], 1024  }
0x1216   :  { %5134 = vsyncadd [#allocation6], 4294966272 }
0x1217   :  { %3492 = vsyncpa [#allocation5], 1 }
0x1218   :  { %3493 = vsyncpa [#allocation6], 1 }

</bundles_post_ra>
